<compile_context>
chip_gen: v7x
topology: tpu7x:2x2x1
jax: 0.10.0
libtpu: 0.0.40
codegen_flags: <defaults>
</compile_context>

<pallas_src>
import math
import functools

import numpy as np
import jax
import jax.numpy as jnp
from jax.experimental import pallas as pl
from jax.experimental.pallas import tpu as pltpu


def _pos_embed_kernel(y_ref, x_ref, invd_ref, off_ref, o_ref, *, F):
    """One (D, t_hw) tile of the positional map, D = 2*F.

    y_ref, x_ref : (1, t_hw)  precomputed (normalized) y / x coordinates per
                              flat spatial position p = h*W + w.
    invd_ref     : (F, 1)     1 / dim_t[k]         (per-channel constant)
    off_ref      : (F, 1)     0 (even k) or pi/2 (odd k)  -> cos via sin(x+pi/2)
    o_ref        : (D, t_hw)  rows [0:F]  = pos_y, rows [F:2F] = pos_x.
    """
    invd = invd_ref[...]                      # (F, 1)
    off = off_ref[...]                        # (F, 1)
    # Single fused multiply-add + single sin per element; broadcasts are
    # sublane (y/x rows) and lane (per-channel columns) broadcasts only.
    o_ref[0:F, :] = jnp.sin(y_ref[...] * invd + off)
    o_ref[F:, :] = jnp.sin(x_ref[...] * invd + off)


def _pick_hw_tile(hw, d, dtype_bytes=4, budget_bytes=2 * 1024 * 1024):
    """Largest lane-tile (multiple of 128, divides hw) whose output block fits the budget."""
    if hw % 128 != 0:
        return hw  # must use the full (un-tiled) lane extent
    max_tile = max(128, (budget_bytes // (d * dtype_bytes)) // 128 * 128)
    t = min(hw, max_tile)
    while hw % t != 0:
        t -= 128
    return t


def position_embedding_sine(x, num_pos_feats=64, temperature=10000,
                            normalize=False, scale=None):
    """x: (t, bs, c, h, w).  Returns (bs, 2*num_pos_feats, h, w) float32."""
    if scale is not None and normalize is False:
        raise ValueError("normalize should be True if scale is passed")
    if scale is None:
        scale = 2 * math.pi

    t, bs, c, h, w = x.shape
    F = num_pos_feats
    D = 2 * F
    HW = h * w

    # ---- trace-time numpy constants (shape-only dependence) -----------------
    yv = np.arange(1, h + 1, dtype=np.float32)
    xv = np.arange(1, w + 1, dtype=np.float32)
    if normalize:
        eps = 1e-6
        yv = yv / (np.float32(h) + eps) * np.float32(scale)
        xv = xv / (np.float32(w) + eps) * np.float32(scale)
    y_row = np.repeat(yv, w)[None, :].astype(np.float32)       # (1, HW): y of p = p // W
    x_row = np.tile(xv, h)[None, :].astype(np.float32)         # (1, HW): x of p = p %  W

    k = np.arange(F, dtype=np.float32)
    dim_t = np.float32(temperature) ** (2.0 * np.floor(k / 2.0) / np.float32(F))
    inv_dim_t = (1.0 / dim_t).astype(np.float32)[:, None]       # (F, 1)
    off = np.where((np.arange(F) % 2) == 1,
                   np.float32(np.pi / 2), np.float32(0.0)).astype(np.float32)[:, None]

    # ---- pallas_call: single batch-invariant (D, HW) slab --------------------
    t_hw = _pick_hw_tile(HW, D)
    n_tiles = HW // t_hw

    kernel = functools.partial(_pos_embed_kernel, F=F)

    pos_flat = pl.pallas_call(
        kernel,
        out_shape=jax.ShapeDtypeStruct((D, HW), jnp.float32),
        grid=(n_tiles,),
        in_specs=[
            pl.BlockSpec((1, t_hw), lambda j: (0, j)),
            pl.BlockSpec((1, t_hw), lambda j: (0, j)),
            pl.BlockSpec((F, 1), lambda j: (0, 0)),
            pl.BlockSpec((F, 1), lambda j: (0, 0)),
        ],
        out_specs=pl.BlockSpec((D, t_hw), lambda j: (0, j)),
        compiler_params=pltpu.CompilerParams(dimension_semantics=("parallel",)),
    )(jnp.asarray(y_row), jnp.asarray(x_row),
      jnp.asarray(inv_dim_t), jnp.asarray(off))

    # (D, HW) -> (1, D, H, W) is a free row-major reshape; broadcast to batch.
    pos = pos_flat.reshape(1, D, h, w)
    return jnp.broadcast_to(pos, (bs, D, h, w))


def _reference_jax(x, num_pos_feats=64, temperature=10000, normalize=False, scale=None):
    """Pure-JAX replica of the PyTorch forward for a correctness check."""
    if scale is None:
        scale = 2 * math.pi
    t, bs, c, h, w = x.shape
    y_embed = jnp.tile(jnp.arange(1, h + 1)[None, :, None], (bs, 1, w)).astype(jnp.float32)
    x_embed = jnp.tile(jnp.arange(1, w + 1)[None, None, :], (bs, h, 1)).astype(jnp.float32)
    if normalize:
        eps = 1e-6
        y_embed = y_embed / (y_embed[:, -1:, :] + eps) * scale
        x_embed = x_embed / (x_embed[:, :, -1:] + eps) * scale
    dim_t = jnp.arange(num_pos_feats, dtype=jnp.float32)
    dim_t = temperature ** (2 * (dim_t // 2) / num_pos_feats)
    pos_x = x_embed[:, :, :, None] / dim_t
    pos_y = y_embed[:, :, :, None] / dim_t
    pos_x = jnp.stack((jnp.sin(pos_x[:, :, :, 0::2]), jnp.cos(pos_x[:, :, :, 1::2])),
                      axis=4).reshape(bs, h, w, -1)
    pos_y = jnp.stack((jnp.sin(pos_y[:, :, :, 0::2]), jnp.cos(pos_y[:, :, :, 1::2])),
                      axis=4).reshape(bs, h, w, -1)
    pos = jnp.concatenate((pos_y, pos_x), axis=3).transpose(0, 3, 1, 2)
    return pos


if __name__ == "__main__":
    key = jax.random.PRNGKey(0)
    # (t, bs, c, h, w) -- values are irrelevant to the embedding, only the shape.
    x = jax.random.normal(key, (2, 2, 4, 16, 16), dtype=jnp.float32)

    out = position_embedding_sine(x, num_pos_feats=64, temperature=10000, normalize=False)
    out = jax.block_until_ready(out)
    ref = _reference_jax(x, num_pos_feats=64, temperature=10000, normalize=False)
    assert out.shape == (2, 128, 16, 16), out.shape
    assert jnp.allclose(out, ref, atol=1e-4, rtol=1e-4)

    # Also exercise the normalize=True path.
    out_n = position_embedding_sine(x, num_pos_feats=64, temperature=10000, normalize=True)
    out_n = jax.block_until_ready(out_n)
    ref_n = _reference_jax(x, num_pos_feats=64, temperature=10000, normalize=True)
    assert jnp.allclose(out_n, ref_n, atol=1e-4, rtol=1e-4)

    print("KERNEL_OK")
</pallas_src>

<mosaic_0001>
module attributes {stable_mosaic.version = 11 : i64} {
  func.func @_pos_embed_kernel(%arg0: i32, %arg1: memref<1x256xf32, #tpu.memory_space<vmem>>, %arg2: memref<1x256xf32, #tpu.memory_space<vmem>>, %arg3: memref<64x1xf32, #tpu.memory_space<vmem>>, %arg4: memref<64x1xf32, #tpu.memory_space<vmem>>, %arg5: memref<128x256xf32, #tpu.memory_space<vmem>>) attributes {dimension_semantics = [#tpu.dimension_semantics<parallel>], iteration_bounds = array<i64: 1>, scalar_prefetch = 0 : i64, scratch_operands = 0 : i64, tpu.core_type = #tpu.core_type<tc>, window_params = [{transform_indices = @transform_0, window_bounds = array<i64: 1, 256>}, {transform_indices = @transform_1, window_bounds = array<i64: 1, 256>}, {pipeline_mode = #tpu.pipeline_mode<synchronous>, transform_indices = @transform_2, window_bounds = array<i64: 64, 1>}, {pipeline_mode = #tpu.pipeline_mode<synchronous>, transform_indices = @transform_3, window_bounds = array<i64: 64, 1>}, {transform_indices = @transform_4, window_bounds = array<i64: 128, 256>}]} {
    %c0 = arith.constant 0 : index
    %c0_0 = arith.constant 0 : index
    %0 = vector.load %arg3[%c0, %c0_0] : memref<64x1xf32, #tpu.memory_space<vmem>>, vector<64x1xf32>
    %c0_1 = arith.constant 0 : index
    %c0_2 = arith.constant 0 : index
    %1 = vector.load %arg4[%c0_1, %c0_2] : memref<64x1xf32, #tpu.memory_space<vmem>>, vector<64x1xf32>
    %c0_3 = arith.constant 0 : index
    %c0_4 = arith.constant 0 : index
    %2 = vector.load %arg1[%c0_3, %c0_4] : memref<1x256xf32, #tpu.memory_space<vmem>>, vector<1x256xf32>
    %3 = vector.broadcast %2 : vector<1x256xf32> to vector<64x256xf32>
    %4 = vector.broadcast %0 : vector<64x1xf32> to vector<64x256xf32>
    %5 = arith.mulf %3, %4 : vector<64x256xf32>
    %6 = vector.broadcast %1 : vector<64x1xf32> to vector<64x256xf32>
    %7 = arith.addf %5, %6 : vector<64x256xf32>
    %8 = math.sin %7 : vector<64x256xf32>
    %c0_5 = arith.constant 0 : index
    %c0_6 = arith.constant 0 : index
    %9 = vector.load %arg5[%c0_5, %c0_6] : memref<128x256xf32, #tpu.memory_space<vmem>>, vector<64x256xf32>
    tpu.vector_store %arg5[%c0_5, %c0_6], %8 {strides = array<i32>} : memref<128x256xf32, #tpu.memory_space<vmem>>, vector<64x256xf32>,
    %c0_7 = arith.constant 0 : index
    %c0_8 = arith.constant 0 : index
    %10 = vector.load %arg2[%c0_7, %c0_8] : memref<1x256xf32, #tpu.memory_space<vmem>>, vector<1x256xf32>
    %11 = vector.broadcast %10 : vector<1x256xf32> to vector<64x256xf32>
    %12 = vector.broadcast %0 : vector<64x1xf32> to vector<64x256xf32>
    %13 = arith.mulf %11, %12 : vector<64x256xf32>
    %14 = vector.broadcast %1 : vector<64x1xf32> to vector<64x256xf32>
    %15 = arith.addf %13, %14 : vector<64x256xf32>
    %16 = math.sin %15 : vector<64x256xf32>
    %c64 = arith.constant 64 : index
    %c0_9 = arith.constant 0 : index
    %17 = vector.load %arg5[%c64, %c0_9] : memref<128x256xf32, #tpu.memory_space<vmem>>, vector<64x256xf32>
    tpu.vector_store %arg5[%c64, %c0_9], %16 {strides = array<i32>} : memref<128x256xf32, #tpu.memory_space<vmem>>, vector<64x256xf32>,
    return
  }
  func.func @transform_0(%arg0: i32) -> (i32, i32) {
    %c0_i32 = arith.constant 0 : i32
    %c0_i32_0 = arith.constant 0 : i32
    return %c0_i32, %arg0 : i32, i32
  }
  func.func @transform_1(%arg0: i32) -> (i32, i32) {
    %c0_i32 = arith.constant 0 : i32
    %c0_i32_0 = arith.constant 0 : i32
    return %c0_i32, %arg0 : i32, i32
  }
  func.func @transform_2(%arg0: i32) -> (i32, i32) {
    %c0_i32 = arith.constant 0 : i32
    %c0_i32_0 = arith.constant 0 : i32
    %c0_i32_1 = arith.constant 0 : i32
    return %c0_i32, %c0_i32_0 : i32, i32
  }
  func.func @transform_3(%arg0: i32) -> (i32, i32) {
    %c0_i32 = arith.constant 0 : i32
    %c0_i32_0 = arith.constant 0 : i32
    %c0_i32_1 = arith.constant 0 : i32
    return %c0_i32, %c0_i32_0 : i32, i32
  }
  func.func @transform_4(%arg0: i32) -> (i32, i32) {
    %c0_i32 = arith.constant 0 : i32
    %c0_i32_0 = arith.constant 0 : i32
    return %c0_i32, %arg0 : i32, i32
  }
}

</mosaic_0001>

<bundles_post_ra>
// kernel: tpu_custom_call.1
= control target key start
LH: loop header
LB: loop body
LE: loop exit
PB: predicated region body
PF: predicated region fallthrough
CT: control target
= control target key end

     0   :  { %v3998_v2 = vmov 0   ;;  %s6760_s0 = inlined_call_operand.vmem [shape: f32[1,256], index: 0, kind: input, shape index: {}]   ;;  %s6761_s1 = inlined_call_operand.vmem [shape: f32[1,256], index: 1, kind: input, shape index: {}]   ;;  %s6762_s2 = inlined_call_operand.vmem [shape: f32[64,1], index: 2, kind: input, shape index: {}]   ;;  %s6763_s3 = inlined_call_operand.vmem [shape: f32[64,1], index: 3, kind: input, shape index: {}]   ;;  %s6764_s4 = inlined_call_operand.hbm [shape: f32[128,256], index: 4, kind: output, shape index: {}]  }
   0x1   :  { %v20_v0 = vld [vmem:[%s6762_s2 + $0x10] sm:$0xff]  ;;  %v18_v1 = vld [vmem:[%s6762_s2] sm:$0xff]  ;;  %3845 = vset.pattern.permute.xlu1 %v3998_v2  ;;  %3844 = vset.pattern.permute.xlu0 %v3998_v2  ;;  %v21_v3 = vld [vmem:[%s6762_s2 + $0x18] sm:$0xff] }
   0x2   :  { %58 = vperm.xlu1 %3845, %v20_v0   ;;  %48 = vperm.xlu0 %3844, %v18_v1   ;;  %v19_v4 = vld [vmem:[%s6762_s2 + $0x8] sm:$0xff] }
   0x3   :  { %9 = vsyncpa [#allocation3], 0  ;;  %v23_v5 = vld [vmem:[%s6762_s2 + $0x28] sm:$0xff]  ;;  %v22_v6 = vld [vmem:[%s6762_s2 + $0x20] sm:$0xff]  ;;  %v36_v17 = vlaneseq }
   0x4   :  { %v25_v7 = vld [vmem:[%s6762_s2 + $0x38] sm:$0xff]  ;;  %v24_v8 = vld [vmem:[%s6762_s2 + $0x30] sm:$0xff]  ;;  %v27_v9 = vld [vmem:[%s6763_s3 + $0x8] sm:$0xff] }
   0x5   :  { %v26_v10 = vld [vmem:[%s6763_s3] sm:$0xff]  ;;  %v29_v11 = vld [vmem:[%s6763_s3 + $0x18] sm:$0xff]  ;;  %v28_v12 = vld [vmem:[%s6763_s3 + $0x10] sm:$0xff]  ;;  %v4085_v20 = vshrl.u32 %v36_v17, 7 }
   0x6   :  { %63 = vperm.xlu1 %3845, %v21_v3   ;;  %53 = vperm.xlu0 %3844, %v19_v4   ;;  %v31_v13 = vld [vmem:[%s6763_s3 + $0x28] sm:$0xff]  ;;  %v30_v14 = vld [vmem:[%s6763_s3 + $0x20] sm:$0xff]  ;;  %v33_v15 = vld [vmem:[%s6763_s3 + $0x38] sm:$0xff]  ;;  %v3999_v4 = vmov 683565275  }
   0x7   :  { %v32_v16 = vld [vmem:[%s6763_s3 + $0x30] sm:$0xff]  ;;  %v6766_v23 = vsub.s32 0, %v4085_v20  ;;  %v6765_v24 = vsub.s32 1, %v4085_v20  ;;  %v34_v27 = vld [vmem:[%s6760_s0] sm:$0x3] }
   0x9   :  { %v4102_v28 = vrot.slane %v34_v27, %v6766_v23  ;;  %v4106_v29 = vrot.slane %v34_v27, %v6765_v24 }
   0xa   :  { %73 = vperm.xlu1 %3845, %v23_v5   ;;  %68 = vperm.xlu0 %3844, %v22_v6  }
   0xe   :  { %83 = vperm.xlu1 %3845, %v25_v7   ;;  %78 = vperm.xlu0 %3844, %v24_v8   ;;  %v6774_v8 = vmov 2475754826  }
  0x12   :  { %109 = vperm.xlu1 %3845, %v27_v9   ;;  %104 = vperm.xlu0 %3844, %v26_v10   ;;  %v4001_v10 = vmov 2131351028  }
  0x16   :  { %119 = vperm.xlu1 %3845, %v29_v11   ;;  %114 = vperm.xlu0 %3844, %v28_v12   ;;  %v4002_v12 = vmov 2102212464  }
  0x1a   :  { %129 = vperm.xlu1 %3845, %v31_v13   ;;  %124 = vperm.xlu0 %3844, %v30_v14   ;;  %v4003_v14 = vmov 920167782  }
  0x1e   :  { %139 = vperm.xlu1 %3845, %v33_v15   ;;  %134 = vperm.xlu0 %3844, %v32_v16  }
  0x81   :  { %v4081_v18 = vpop.permute.xlu1 %58  ;;  %v4083_v19 = vpop.permute.xlu0 %48 }
  0x82   :  { %v86_v32 = vmul.f32 %v4083_v19, %v4102_v28  ;;  %v87_v33 = vmul.f32 %v4083_v19, %v4106_v29 }
  0x85   :  { %v4087_v21 = vpop.permute.xlu1 %63  ;;  %v4089_v22 = vpop.permute.xlu0 %53 }
  0x86   :  { %v88_v42 = vmul.f32 %v4089_v22, %v4102_v28  ;;  %v89_v56 = vmul.f32 %v4089_v22, %v4106_v29 }
  0x89   :  { %v4093_v25 = vpop.permute.xlu1 %73  ;;  %v4095_v26 = vpop.permute.xlu0 %68 }
  0x8d   :  { %v4108_v30 = vpop.permute.xlu0 %78  ;;  %v4110_v31 = vpop.permute.xlu1 %83 }
  0x91   :  { %v4116_v34 = vpop.permute.xlu0 %104  ;;  %v4125_v38 = vpop.permute.xlu1 %109 }
  0x92   :  { %v4119_v35 = vadd.f32 %v4116_v34, %v86_v32  ;;  %v4122_v36 = vadd.f32 %v4116_v34, %v87_v33  ;;  %v4133_v45 = vadd.f32 %v4125_v38, %v88_v42  ;;  %v4144_v60 = vadd.f32 %v4125_v38, %v89_v56 }
  0x94   :  { %v161_v37 = vand.u32 2139095040, %v4119_v35  ;;  %v158_v39 = vand.u32 2147483647, %v4119_v35  ;;  %v262_v40 = vand.u32 2147483647, %v4122_v36  ;;  %v265_v41 = vand.u32 2139095040, %v4122_v36 }
  0x95   :  { %v366_v52 = vand.u32 2147483647, %v4133_v45  ;;  %v369_v53 = vand.u32 2139095040, %v4133_v45  ;;  %vm160_vm13 = vcmp.lt.s32.totalorder %v4119_v35, 0  ;;  %vm264_vm15 = vcmp.lt.s32.totalorder %v4122_v36, 0 }
  0x96   :  { %v162_v43 = vshrl.u32 %v161_v37, 23  ;;  %v266_v44 = vshrl.u32 %v265_v41, 23  ;;  %v165_v47 = vand.u32 8388607, %v158_v39  ;;  %v269_v49 = vand.u32 8388607, %v262_v40 }
  0x97   :  { %v370_v59 = vshrl.u32 %v369_v53, 23  ;;  %v4154_v2 = vand.u32 8388607, %v366_v52  ;;  %v6768_v37 = vmov 1326507024  }
  0x98   :  { %v3578_v46 = vadd.s32 4294967169, %v162_v43  ;;  %v3582_v48 = vadd.s32 4294967169, %v266_v44  ;;  %v166_v54 = vor.u32 8388608, %v165_v47  ;;  %v270_v55 = vor.u32 8388608, %v269_v49 }
  0x99   :  { %v4157_v7 = vadd.s32 4294967169, %v370_v59  ;;  %vm4241_vm14 = vcmp.le.f32.partialorder %v158_v39, 0.7853982 }
  0x9a   :  { %v168_v50 = vadd.s32 1, %v3578_v46  ;;  %v272_v51 = vadd.s32 1, %v3582_v48  ;;  %v4146_v63 = vshll.u32 %v166_v54, 8  ;;  %v4150_v1 = vshll.u32 %v270_v55, 8 }
  0x9c   :  { %vm169_vm0 = vcmp.gt.s32.totalorder %v168_v50, 0  ;;  %vm273_vm1 = vcmp.gt.s32.totalorder %v272_v51, 0 }
  0x9d   :  { %v170_v57 = vsel %vm169_vm0, %v168_v50, 0  ;;  %v274_v58 = vsel %vm273_vm1, %v272_v51, 0 }
  0x9e   :  { %v171_v61 = vshrl.u32 %v170_v57, 5  ;;  %v172_v62 = vand.u32 31, %v170_v57  ;;  %v4148_v0 = vshrl.u32 %v274_v58, 5  ;;  %v276_v6 = vand.u32 31, %v274_v58 }
  0xa0   :  { %v173_v3 = vsub.s32 32, %v172_v62  ;;  %v175_v5 = vshll.u32 %v3999_v4, %v172_v62  ;;  %v178_v9 = vshll.u32 %v6774_v8, %v172_v62  ;;  %v181_v11 = vshll.u32 %v4001_v10, %v172_v62 }
  0xa1   :  { %v184_v13 = vshll.u32 %v4002_v12, %v172_v62  ;;  %v187_v15 = vshll.u32 %v4003_v14, %v172_v62  ;;  %vm190_vm2 = vcmp.lt.s32.totalorder %v171_v61, 1  ;;  %vm191_vm3 = vcmp.lt.s32.totalorder %v171_v61, 2 }
  0xa2   :  { %v176_v16 = vshrl.u32 %v6774_v8, %v173_v3  ;;  %v179_v17 = vshrl.u32 %v4001_v10, %v173_v3  ;;  %v182_v27 = vshrl.u32 %v4002_v12, %v173_v3  ;;  %v174_v32 = vshrl.u32 %v3999_v4, %v173_v3 }
  0xa3   :  { %v185_v33 = vshrl.u32 %v4003_v14, %v173_v3  ;;  %v188_v41 = vshrl.u32 %v6768_v37, %v173_v3  ;;  %v277_v46 = vsub.s32 32, %v276_v6  ;;  %vm192_vm4 = vcmp.lt.s32.totalorder %v171_v61, 3 }
  0xa4   :  { %v177_v42 = vor.u32 %v176_v16, %v175_v5  ;;  %v180_v43 = vor.u32 %v179_v17, %v178_v9  ;;  %v183_v44 = vor.u32 %v182_v27, %v181_v11  ;;  %vm193_vm5 = vcmp.lt.s32.totalorder %v171_v61, 4 }
  0xa5   :  { %v186_v47 = vor.u32 %v185_v33, %v184_v13  ;;  %v189_v48 = vor.u32 %v188_v41, %v187_v15  ;;  %v279_v57 = vshll.u32 %v3999_v4, %v276_v6  ;;  %v280_v62 = vshrl.u32 %v6774_v8, %v277_v46 }
  0xa6   :  { %v194_v49 = vsel %vm190_vm2, %v174_v32, %v177_v42  ;;  %v195_v50 = vsel %vm193_vm5, %v183_v44, 2102212464  ;;  %v198_v51 = vsel %vm190_vm2, %v177_v42, %v180_v43  ;;  %v202_v53 = vsel %vm190_vm2, %v180_v43, %v183_v44 }
  0xa7   :  { %v196_v54 = vsel %vm192_vm4, %v180_v43, %v195_v50  ;;  %v199_v55 = vsel %vm193_vm5, %v186_v47, 920167782  ;;  %v203_v56 = vsel %vm193_vm5, %v189_v48, 1326507024  ;;  %v282_v3 = vshll.u32 %v6774_v8, %v276_v6 }
  0xa8   :  { %v200_v58 = vsel %vm192_vm4, %v183_v44, %v199_v55  ;;  %v204_v59 = vsel %vm192_vm4, %v186_v47, %v203_v56  ;;  %v197_v5 = vsel %vm191_vm3, %v194_v49, %v196_v54  ;;  %v283_v13 = vshrl.u32 %v4001_v10, %v277_v46 }
  0xa9   :  { %v201_v9 = vsel %vm191_vm3, %v198_v51, %v200_v58  ;;  %v205_v11 = vsel %vm191_vm3, %v202_v53, %v204_v59  ;;  %v281_v32 = vor.u32 %v280_v62, %v279_v57  ;;  %v285_v41 = vshll.u32 %v4001_v10, %v276_v6 }
  0xaa   :  { %v4180_v15 = vmul.u32.u64.low %v4146_v63, %v205_v11  ;;  %v4181_v16 = vmul.u32.u64.high %v4146_v63, %v205_v11, %v4180_v15  ;;  %v4184_v17 = vmul.u32.u64.low %v4146_v63, %v201_v9  ;;  %v4185_v27 = vmul.u32.u64.high %v4146_v63, %v201_v9, %v4184_v17 }
  0xab   :  { %v284_v33 = vor.u32 %v283_v13, %v282_v3  ;;  %v286_v42 = vshrl.u32 %v4002_v12, %v277_v46  ;;  %v278_v61 = vshrl.u32 %v3999_v4, %v277_v46  ;;  %v288_v43 = vshll.u32 %v4002_v12, %v276_v6 }
  0xac   :  { %v289_v44 = vshrl.u32 %v4003_v14, %v277_v46  ;;  %v292_v47 = vshrl.u32 %v6768_v37, %v277_v46  ;;  %v213_v48 = vmul.u32 %v4146_v63, %v197_v5  ;;  %v291_v50 = vshll.u32 %v4003_v14, %v276_v6 }
  0xad   :  { %v287_v49 = vor.u32 %v286_v42, %v285_v41  ;;  %vm294_vm6 = vcmp.lt.s32.totalorder %v4148_v0, 1  ;;  %vm215_vm7 = vc.u32 %v4181_v16, %v4184_v17  ;;  %v216_v51 = vadd.s32 1, %v4185_v27 }
  0xae   :  { %v290_v53 = vor.u32 %v289_v44, %v288_v43  ;;  %vm295_vm8 = vcmp.lt.s32.totalorder %v4148_v0, 2  ;;  %v293_v54 = vor.u32 %v292_v47, %v291_v50  ;;  %vm296_vm9 = vcmp.lt.s32.totalorder %v4148_v0, 3 }
  0xaf   :  { %vm297_vm10 = vcmp.lt.s32.totalorder %v4148_v0, 4  ;;  %v302_v46 = vsel %vm294_vm6, %v281_v32, %v284_v33  ;;  %v217_v63 = vsel %vm215_vm7, %v216_v51, %v4185_v27  ;;  %v306_v56 = vsel %vm294_vm6, %v284_v33, %v287_v49 }
  0xb0   :  { %v299_v55 = vsel %vm297_vm10, %v287_v49, 2102212464  ;;  %v303_v6 = vsel %vm297_vm10, %v290_v53, 920167782  ;;  %v218_v57 = vadd.s32 %v217_v63, %v213_v48  ;;  %v298_v58 = vsel %vm294_vm6, %v278_v61, %v281_v32 }
  0xb1   :  { %v304_v59 = vsel %vm296_vm9, %v287_v49, %v303_v6  ;;  %v307_v62 = vsel %vm297_vm10, %v293_v54, 1326507024  ;;  %v300_v3 = vsel %vm296_vm9, %v284_v33, %v299_v55  ;;  %v376_v11 = vadd.s32 1, %v4157_v7 }
  0xb2   :  { %v305_v5 = vsel %vm295_vm8, %v302_v46, %v304_v59  ;;  %v308_v9 = vsel %vm296_vm9, %v290_v53, %v307_v62  ;;  %v219_v13 = vadd.s32 536870912, %v218_v57  ;;  %v301_v61 = vsel %vm295_vm8, %v298_v58, %v300_v3 }
  0xb3   :  { %v309_v15 = vsel %vm295_vm8, %v306_v56, %v308_v9  ;;  %v4210_v27 = vmul.u32.u64.low %v4150_v1, %v305_v5  ;;  %v4211_v41 = vmul.u32.u64.high %v4150_v1, %v305_v5, %v4210_v27  ;;  %vm377_vm11 = vcmp.gt.s32.totalorder %v376_v11, 0 }
  0xb4   :  { %v4215_v32 = vmul.u32.u64.low %v4150_v1, %v309_v15  ;;  %v4216_v42 = vmul.u32.u64.high %v4150_v1, %v309_v15, %v4215_v32  ;;  %v220_v33 = vshrl.u32 %v219_v13, 30  ;;  %v378_v43 = vsel %vm377_vm11, %v376_v11, 0 }
  0xb5   :  { %v380_v7 = vand.u32 31, %v378_v43  ;;  %v473_v44 = vand.u32 2139095040, %v4144_v60  ;;  %v320_v48 = vadd.s32 1, %v4211_v41  ;;  %v374_v49 = vor.u32 8388608, %v4154_v2 }
  0xb6   :  { %v221_v47 = vshll.u32 %v220_v33, 30  ;;  %v317_v50 = vmul.u32 %v4150_v1, %v301_v61  ;;  %vm319_vm12 = vc.u32 %v4216_v42, %v4210_v27  ;;  %v470_v53 = vand.u32 2147483647, %v4144_v60 }
  0xb7   :  { %v381_v51 = vsub.s32 32, %v380_v7  ;;  %v4229_v0 = vmul.f32 %v4081_v18, %v4102_v28  ;;  %v244_v46 = vsub.s32 4, %v220_v33  ;;  %v321_v63 = vsel %vm319_vm12, %v320_v48, %v4211_v41 }
  0xb8   :  { %v4231_v54 = vsub.s32 %v218_v57, %v221_v47  ;;  %v4236_v2 = vmul.f32 %v4081_v18, %v4106_v29  ;;  %v322_v1 = vadd.s32 %v321_v63, %v317_v50  ;;  %v474_v55 = vshrl.u32 %v473_v44, 23 }
  0xb9   :  { %v214_v56 = vadd.s32 %v4184_v17, %v4181_v16  ;;  %v4248_v58 = vshll.u32 %v374_v49, 8  ;;  %v4250_v62 = vshrl.u32 %v378_v43, 5  ;;  %v384_v3 = vshrl.u32 %v6774_v8, %v381_v51 }
  0xba   :  { %v224_v57 = vsub.s32 0, %v4231_v54  ;;  %v323_v59 = vadd.s32 536870912, %v322_v1  ;;  %v4255_v5 = vand.u32 8388607, %v470_v53  ;;  %v245_v9 = vsel %vm160_vm13, %v244_v46, %v220_v33 }
  0xbb   :  { %v387_v16 = vshrl.u32 %v4001_v10, %v381_v51  ;;  %v390_v17 = vshrl.u32 %v4002_v12, %v381_v51  ;;  %v383_v13 = vshll.u32 %v3999_v4, %v380_v7  ;;  %v393_v15 = vshrl.u32 %v4003_v14, %v381_v51 }
  0xbc   :  { %v3579_v39 = vmin.u32 %v224_v57, %v4231_v54  ;;  %v324_v11 = vshrl.u32 %v323_v59, 30  ;;  %v3590_v41 = vadd.s32 4294967169, %v474_v55  ;;  %v386_v61 = vshll.u32 %v6774_v8, %v380_v7 }
  0xbd   :  { %v389_v43 = vshll.u32 %v4001_v10, %v380_v7  ;;  %v396_v44 = vshrl.u32 %v6768_v37, %v381_v51  ;;  %v247_v33 = vsel %vm4241_vm14, 0, %v245_v9  ;;  %v385_v48 = vor.u32 %v384_v3, %v383_v13 }
  0xbe   :  { %v226_v32 = vclz %v3579_v39  ;;  %v325_v47 = vshll.u32 %v324_v11, 30  ;;  %v392_v49 = vshll.u32 %v4002_v12, %v380_v7  ;;  %v388_v46 = vor.u32 %v387_v16, %v386_v61 }
  0xbf   :  { %v391_v63 = vor.u32 %v390_v17, %v389_v43  ;;  %v395_v55 = vshll.u32 %v4003_v14, %v380_v7  ;;  %v348_v59 = vsub.s32 4, %v324_v11  ;;  %v382_v39 = vshrl.u32 %v3999_v4, %v381_v51 }
  0xc0   :  { %v3580_v50 = vadd.s32 4294967294, %v226_v32  ;;  %v4272_v57 = vsub.s32 %v322_v1, %v325_v47  ;;  %v394_v24 = vor.u32 %v393_v15, %v392_v49  ;;  %vm398_vm1 = vcmp.lt.s32.totalorder %v4250_v62, 1 }
  0xc1   :  { %v397_v23 = vor.u32 %v396_v44, %v395_v55  ;;  %vm399_vm2 = vcmp.lt.s32.totalorder %v4250_v62, 2  ;;  %vm4279_vm3 = vcmp.le.f32.partialorder %v262_v40, 0.7853982  ;;  %vm400_vm4 = vcmp.lt.s32.totalorder %v4250_v62, 3 }
  0xc2   :  { %vm3581_vm0 = vcmp.lt.s32.totalorder %v3580_v50, 0  ;;  %v328_v7 = vsub.s32 0, %v4272_v57  ;;  %vm401_vm5 = vcmp.lt.s32.totalorder %v4250_v62, 4  ;;  %v406_v17 = vsel %vm398_vm1, %v385_v48, %v388_v46 }
  0xc3   :  { %v229_v3 = vsel %vm3581_vm0, 0, %v3580_v50  ;;  %v403_v16 = vsel %vm401_vm5, %v391_v63, 2102212464  ;;  %v407_v40 = vsel %vm401_vm5, %v394_v24, 920167782  ;;  %v410_v32 = vsel %vm398_vm1, %v388_v46, %v391_v63 }
  0xc4   :  { %v230_v51 = vsub.s32 32, %v229_v3  ;;  %v234_v1 = vsub.s32 4294967266, %v229_v3  ;;  %v231_v13 = vshll.u32 %v4231_v54, %v229_v3  ;;  %v3583_v15 = vmin.u32 %v328_v7, %v4272_v57 }
  0xc5   :  { %v408_v44 = vsel %vm400_vm4, %v391_v63, %v407_v40  ;;  %v411_v47 = vsel %vm401_vm5, %v397_v23, 1326507024  ;;  %v349_v50 = vsel %vm264_vm15, %v348_v59, %v324_v11  ;;  %v402_v55 = vsel %vm398_vm1, %v382_v39, %v385_v48 }
  0xc6   :  { %v232_v61 = vshrl.u32 %v214_v56, %v230_v51  ;;  %v235_v43 = vadd.s32 127, %v234_v1  ;;  %v330_v49 = vclz %v3583_v15  ;;  %v404_v54 = vsel %vm400_vm4, %v388_v46, %v403_v16 }
  0xc7   :  { %v409_v56 = vsel %vm399_vm2, %v406_v17, %v408_v44  ;;  %v412_v51 = vsel %vm400_vm4, %v394_v24, %v411_v47  ;;  %v405_v46 = vsel %vm399_vm2, %v402_v55, %v404_v54  ;;  %v251_v16 = vadd.s32 3, %v247_v33  ;;  %v4322_v47 = vpop.permute.xlu0 %114 }
  0xc8   :  { %v233_v3 = vor.u32 %v232_v61, %v231_v13  ;;  %v236_v7 = vshll.u32 %v235_v43, 23  ;;  %v3584_v63 = vadd.s32 4294967294, %v330_v49  ;;  %v413_v23 = vsel %vm399_vm2, %v410_v32, %v412_v51 }
  0xc9   :  { %v4307_v11 = vmul.u32.u64.low %v4248_v58, %v409_v56  ;;  %v4308_v59 = vmul.u32.u64.high %v4248_v58, %v409_v56, %v4307_v11  ;;  %v4313_v39 = vmul.u32.u64.low %v4248_v58, %v413_v23  ;;  %v4314_v1 = vmul.u32.u64.high %v4248_v58, %v413_v23, %v4313_v39 }
  0xca   :  { %v237_v48 = vor.u32 4788187, %v236_v7  ;;  %v318_v24 = vadd.s32 %v4210_v27, %v4216_v42  ;;  %vm3585_vm6 = vcmp.lt.s32.totalorder %v3584_v63, 0  ;;  %v480_v17 = vadd.s32 1, %v3590_v41 }
  0xcb   :  { %v240_v15 = vcvt.s32.f32 %v233_v3  ;;  %v333_v40 = vsel %vm3585_vm6, 0, %v3584_v63  ;;  %v351_v32 = vsel %vm4279_vm3, 0, %v349_v50  ;;  %v421_v62 = vmul.u32 %v4248_v58, %v405_v46 }
  0xcc   :  { %v238_v13 = vand.u32 2147483647, %v237_v48  ;;  %v334_v61 = vsub.s32 32, %v333_v40  ;;  %v338_v43 = vsub.s32 4294967266, %v333_v40  ;;  %v424_v44 = vadd.s32 1, %v4308_v59 }
  0xcd   :  { %v335_v49 = vshll.u32 %v4272_v57, %v333_v40  ;;  %vm423_vm7 = vc.u32 %v4314_v1, %v4307_v11  ;;  %vm481_vm8 = vcmp.gt.s32.totalorder %v480_v17, 0  ;;  %v355_v54 = vadd.s32 3, %v351_v32 }
  0xce   :  { %v241_v33 = vmul.f32 %v240_v15, %v238_v13  ;;  %v336_v27 = vshrl.u32 %v318_v24, %v334_v61  ;;  %v339_v42 = vadd.s32 127, %v338_v43  ;;  %v425_v41 = vsel %vm423_vm7, %v424_v44, %v4308_v59 }
  0xcf   :  { %v482_v55 = vsel %vm481_vm8, %v480_v17, 0  ;;  %v426_v3 = vadd.s32 %v425_v41, %v421_v62  ;;  %v4329_v58 = vadd.f32 %v4322_v47, %v4229_v0  ;;  %v4333_v57 = vadd.f32 %v4322_v47, %v4236_v2 }
  0xd0   :  { %v242_v50 = vxor.u32 2147483648, %v241_v33  ;;  %v484_v7 = vand.u32 31, %v482_v55  ;;  %v337_v56 = vor.u32 %v336_v27, %v335_v49  ;;  %v340_v51 = vshll.u32 %v339_v42, 23 }
  0xd1   :  { %v427_v23 = vadd.s32 536870912, %v426_v3  ;;  %v4340_v46 = vand.u32 3, %v251_v16  ;;  %vm368_vm9 = vcmp.lt.s32.totalorder %v4133_v45, 0  ;;  %v4343_v0 = vand.u32 3, %v355_v54 }
  0xd2   :  { %v243_v63 = vsel %vm160_vm13, %v242_v50, %v241_v33  ;;  %v485_v59 = vsub.s32 32, %v484_v7  ;;  %v341_v39 = vor.u32 4788187, %v340_v51  ;;  %v478_v2 = vor.u32 8388608, %v4255_v5 }
  0xd3   :  { %v246_v48 = vsel %vm4241_vm14, %v4119_v35, %v243_v63  ;;  %v428_v24 = vshrl.u32 %v427_v23, 30  ;;  %v344_v13 = vcvt.s32.f32 %v337_v56  ;;  %v4347_v15 = vadd.s32 %v4307_v11, %v4314_v1 }
  0xd4   :  { %3846 = vcosq.f32 %v246_v48  ;;  %v342_v17 = vand.u32 2147483647, %v341_v39  ;;  %vm4351_vm10 = vcmp.le.f32.partialorder %v366_v52, 0.7853982  ;;  %v4355_v40 = vshrl.u32 %v482_v55, 5 }
  0xd5   :  { %3848 = vsinq.f32 %v246_v48  ;;  %v429_v16 = vshll.u32 %v428_v24, 30  ;;  %v488_v32 = vshrl.u32 %v6774_v8, %v485_v59  ;;  %v491_v61 = vshrl.u32 %v4001_v10, %v485_v59 }
  0xd6   :  { %v345_v5 = vmul.f32 %v344_v13, %v342_v17  ;;  %v494_v43 = vshrl.u32 %v4002_v12, %v485_v59  ;;  %v496_v62 = vshll.u32 %v4002_v12, %v484_v7  ;;  %v497_v11 = vshrl.u32 %v4003_v14, %v485_v59 }
  0xd7   :  { %vm257_vm11 = vcmp.eq.s32.totalorder %v4340_v46, 2  ;;  %v4363_v52 = vsub.s32 %v426_v3, %v429_v16  ;;  %v452_v1 = vsub.s32 4, %v428_v24  ;;  %v487_v44 = vshll.u32 %v3999_v4, %v484_v7 }
  0xd8   :  { %v490_v33 = vshll.u32 %v6774_v8, %v484_v7  ;;  %vm254_vm12 = vcmp.eq.s32.totalorder %v4340_v46, 0  ;;  %v346_v49 = vxor.u32 2147483648, %v345_v5  ;;  %v493_v27 = vshll.u32 %v4001_v10, %v484_v7 }
  0xd9   :  { %v498_v42 = vor.u32 %v497_v11, %v496_v62  ;;  %v500_v41 = vshrl.u32 %v6768_v37, %v485_v59  ;;  %vm253_vm13 = vcmp.lt.s32.totalorder %v4340_v46, 2  ;;  %v432_v55 = vsub.s32 0, %v4363_v52 }
  0xda   :  { %v489_v50 = vor.u32 %v488_v32, %v487_v44  ;;  %v492_v54 = vor.u32 %v491_v61, %v490_v33  ;;  %v4372_v3 = vshll.u32 %v478_v2, 8  ;;  %vm250_vm14 = vweird.f32 %v4119_v35 }
  0xdb   :  { %v347_v56 = vsel %vm264_vm15, %v346_v49, %v345_v5  ;;  %v495_v51 = vor.u32 %v494_v43, %v493_v27  ;;  %v499_v63 = vshll.u32 %v4003_v14, %v484_v7  ;;  %v577_v23 = vand.u32 2139095040, %v4329_v58 }
  0xdc   :  { %v350_v48 = vsel %vm4279_vm3, %v4122_v36, %v347_v56  ;;  %v3587_v39 = vmin.u32 %v432_v55, %v4363_v52  ;;  %v453_v2 = vsel %vm368_vm9, %v452_v1, %v428_v24  ;;  %vm505_vm0 = vcmp.lt.s32.totalorder %v4355_v40, 4 }
  0xdd   :  { %3850 = vcosq.f32 %v350_v48  ;;  %v501_v17 = vor.u32 %v500_v41, %v499_v63  ;;  %vm502_vm15 = vcmp.lt.s32.totalorder %v4355_v40, 1  ;;  %v511_v7 = vsel %vm505_vm0, %v498_v42, 920167782 }
  0xde   :  { %v3847_v13 = vpop.eup %3846  ;;  %3852 = vsinq.f32 %v350_v48  ;;  %v434_v16 = vclz %v3587_v39  ;;  %vm504_vm1 = vcmp.lt.s32.totalorder %v4355_v40, 3  ;;  %v510_v9 = vsel %vm502_vm15, %v489_v50, %v492_v54 }
  0xdf   :  { %v3849_v32 = vpop.eup %3848  ;;  %v258_v61 = vxor.u32 2147483648, %v3847_v13  ;;  %v455_v24 = vsel %vm4351_vm10, 0, %v453_v2  ;;  %v486_v5 = vshrl.u32 %v3999_v4, %v485_v59  ;;  %v512_v43 = vsel %vm504_vm1, %v495_v51, %v511_v7 }
  0xe0   :  { %v255_v62 = vxor.u32 2147483648, %v3849_v32  ;;  %v3588_v11 = vadd.s32 4294967294, %v434_v16  ;;  %vm503_vm2 = vcmp.lt.s32.totalorder %v4355_v40, 2  ;;  %v507_v1 = vsel %vm505_vm0, %v495_v51, 2102212464 }
  0xe1   :  { %v259_v44 = vsel %vm257_vm11, %v258_v61, %v3849_v32  ;;  %v513_v33 = vsel %vm503_vm2, %v510_v9, %v512_v43  ;;  %v514_v49 = vsel %vm502_vm15, %v492_v54, %v495_v51  ;;  %v515_v59 = vsel %vm505_vm0, %v501_v17, 1326507024 }
  0xe2   :  { %v256_v27 = vsel %vm254_vm12, %v3847_v13, %v255_v62  ;;  %vm3589_vm3 = vcmp.lt.s32.totalorder %v3588_v11, 0  ;;  %v516_v41 = vsel %vm504_vm1, %v498_v42, %v515_v59  ;;  %v578_v55 = vshrl.u32 %v577_v23, 23 }
  0xe3   :  { %v260_v56 = vsel %vm253_vm13, %v256_v27, %v259_v44  ;;  %v437_v63 = vsel %vm3589_vm3, 0, %v3588_v11  ;;  %v506_v48 = vsel %vm502_vm15, %v486_v5, %v489_v50  ;;  %v517_v51 = vsel %vm503_vm2, %v514_v49, %v516_v41 }
  0xe4   :  { %v261_v39 = vsel %vm250_vm14, nan, %v260_v56  ;;  %vm354_vm4 = vweird.f32 %v4122_v36  ;;  %v438_v2 = vsub.s32 32, %v437_v63  ;;  %v442_v17 = vsub.s32 4294967266, %v437_v63 }
  0xe5   :  { %v508_v42 = vsel %vm504_vm1, %v492_v54, %v507_v1  ;;  %v4424_v46 = vmul.u32.u64.low %v4372_v3, %v517_v51  ;;  %v4425_v23 = vmul.u32.u64.high %v4372_v3, %v517_v51, %v4424_v46  ;;  %1822 = vst [vmem:[#allocation2] sm:$0xff] %v261_v39  ;;  %v439_v35 = vshll.u32 %v4363_v52, %v437_v63 }
  0xe6   :  { %v4428_v7 = vmul.u32.u64.low %v4372_v3, %v513_v33  ;;  %v4429_v50 = vmul.u32.u64.high %v4372_v3, %v513_v33, %v4428_v7  ;;  %v440_v13 = vshrl.u32 %v4347_v15, %v438_v2  ;;  %v443_v16 = vadd.s32 127, %v442_v17 }
  0xe7   :  { %v3594_v9 = vadd.s32 4294967169, %v578_v55  ;;  %v3851_v32 = vpop.eup %3850  ;;  %vm358_vm5 = vcmp.eq.s32.totalorder %v4343_v0, 0  ;;  %vm361_vm6 = vcmp.eq.s32.totalorder %v4343_v0, 2  ;;  %v509_v54 = vsel %vm503_vm2, %v506_v48, %v508_v42 }
  0xe8   :  { %v574_v61 = vand.u32 2147483647, %v4329_v58  ;;  %v3853_v5 = vpop.eup %3852  ;;  %v362_v43 = vxor.u32 2147483648, %v3851_v32  ;;  %v441_v62 = vor.u32 %v440_v13, %v439_v35  ;;  %v444_v11 = vshll.u32 %v443_v16, 23 }
  0xe9   :  { %v584_v1 = vadd.s32 1, %v3594_v9  ;;  %v359_v52 = vxor.u32 2147483648, %v3853_v5  ;;  %v459_v44 = vadd.s32 3, %v455_v24  ;;  %vm527_vm7 = vc.u32 %v4425_v23, %v4428_v7 }
  0xea   :  { %v528_v15 = vadd.s32 1, %v4429_v50  ;;  %v363_v33 = vsel %vm361_vm6, %v362_v43, %v3853_v5  ;;  %v445_v49 = vor.u32 4788187, %v444_v11  ;;  %v525_v59 = vmul.u32 %v4372_v3, %v509_v54 }
  0xeb   :  { %vm585_vm8 = vcmp.gt.s32.totalorder %v584_v1, 0  ;;  %vm357_vm11 = vcmp.lt.s32.totalorder %v4343_v0, 2  ;;  %v360_v40 = vsel %vm358_vm5, %v3851_v32, %v359_v52  ;;  %v448_v56 = vcvt.s32.f32 %v441_v62 }
  0xec   :  { %v529_v27 = vsel %vm527_vm7, %v528_v15, %v4429_v50  ;;  %v586_v41 = vsel %vm585_vm8, %v584_v1, 0  ;;  %v364_v55 = vsel %vm357_vm11, %v360_v40, %v363_v33  ;;  %v446_v24 = vand.u32 2147483647, %v445_v49 }
  0xed   :  { %v530_v63 = vadd.s32 %v529_v27, %v525_v59  ;;  %v4449_v48 = vmul.f32 %v4087_v21, %v4102_v28  ;;  %v4453_v3 = vmul.f32 %v4087_v21, %v4106_v29  ;;  %v365_v51 = vsel %vm354_vm4, nan, %v364_v55 }
  0xee   :  { %v588_v0 = vand.u32 31, %v586_v41  ;;  %v4459_v39 = vmul.f32 %v4095_v26, %v4102_v28  ;;  %v449_v2 = vmul.f32 %v448_v56, %v446_v24  ;;  %v4461_v17 = vand.u32 3, %v459_v44  ;;  %1823 = vst [vmem:[#allocation2 + $0x8] sm:$0xff] %v365_v51 }
  0xef   :  { %v531_v42 = vadd.s32 536870912, %v530_v63  ;;  %v581_v46 = vand.u32 8388607, %v574_v61  ;;  %v587_v50 = vshrl.u32 %v586_v41, 5  ;;  %v681_v13 = vand.u32 2139095040, %v4333_v57 }
  0xf0   :  { %v589_v35 = vsub.s32 32, %v588_v0  ;;  %v450_v16 = vxor.u32 2147483648, %v449_v2  ;;  %v591_v9 = vshll.u32 %v3999_v4, %v588_v0  ;;  %v594_v32 = vshll.u32 %v6774_v8, %v588_v0 }
  0xf1   :  { %v4466_v36 = vshrl.u32 %v531_v42, 30  ;;  %v597_v43 = vshll.u32 %v4001_v10, %v588_v0  ;;  %v600_v52 = vshll.u32 %v4002_v12, %v588_v0  ;;  %v582_v27 = vor.u32 8388608, %v581_v46 }
  0xf2   :  { %v592_v54 = vshrl.u32 %v6774_v8, %v589_v35  ;;  %v595_v5 = vshrl.u32 %v4001_v10, %v589_v35  ;;  %v598_v62 = vshrl.u32 %v4002_v12, %v589_v35  ;;  %v451_v11 = vsel %vm368_vm9, %v450_v16, %v449_v2 }
  0xf3   :  { %v533_v1 = vshll.u32 %v4466_v36, 30  ;;  %v601_v44 = vshrl.u32 %v4003_v14, %v589_v35  ;;  %v454_v15 = vsel %vm4351_vm10, %v4133_v45, %v451_v11  ;;  %v603_v55 = vshll.u32 %v4003_v14, %v588_v0 }
  0xf4   :  { %v593_v33 = vor.u32 %v592_v54, %v591_v9  ;;  %v596_v49 = vor.u32 %v595_v5, %v594_v32  ;;  %v599_v59 = vor.u32 %v598_v62, %v597_v43  ;;  %3854 = vcosq.f32 %v454_v15 }
  0xf5   :  { %v4482_v40 = vsub.s32 %v530_v63, %v533_v1  ;;  %v602_v41 = vor.u32 %v601_v44, %v600_v52  ;;  %3856 = vsinq.f32 %v454_v15  ;;  %v604_v24 = vshrl.u32 %v6768_v37, %v589_v35 }
  0xf6   :  { %v682_v56 = vshrl.u32 %v681_v13, 23  ;;  %vm606_vm9 = vcmp.lt.s32.totalorder %v587_v50, 1  ;;  %vm608_vm12 = vcmp.lt.s32.totalorder %v587_v50, 3  ;;  %vm609_vm13 = vcmp.lt.s32.totalorder %v587_v50, 4 }
  0xf7   :  { %v536_v51 = vsub.s32 0, %v4482_v40  ;;  %v605_v6 = vor.u32 %v604_v24, %v603_v55  ;;  %v611_v2 = vsel %vm609_vm13, %v599_v59, 2102212464  ;;  %v614_v42 = vsel %vm606_vm9, %v593_v33, %v596_v49 }
  0xf8   :  { %v615_v16 = vsel %vm609_vm13, %v602_v41, 920167782  ;;  %v590_v46 = vshrl.u32 %v3999_v4, %v589_v35  ;;  %vm607_vm10 = vcmp.lt.s32.totalorder %v587_v50, 2  ;;  %v618_v13 = vsel %vm606_vm9, %v596_v49, %v599_v59 }
  0xf9   :  { %v3591_v63 = vmin.u32 %v536_v51, %v4482_v40  ;;  %v616_v0 = vsel %vm608_vm12, %v599_v59, %v615_v16  ;;  %v619_v32 = vsel %vm609_vm13, %v605_v6, 1326507024  ;;  %v622_v54 = vshll.u32 %v582_v27, 8 }
  0xfa   :  { %v617_v9 = vsel %vm607_vm10, %v614_v42, %v616_v0  ;;  %vm472_vm14 = vcmp.lt.s32.totalorder %v4144_v60, 0  ;;  %v610_v43 = vsel %vm606_vm9, %v590_v46, %v593_v33  ;;  %v612_v62 = vsel %vm608_vm12, %v596_v49, %v611_v2 }
  0xfb   :  { %v538_v5 = vclz %v3591_v63  ;;  %vm458_vm0 = vweird.f32 %v4133_v45  ;;  %vm4499_vm15 = vcmp.le.f32.partialorder %v470_v53, 0.7853982  ;;  %v556_v11 = vsub.s32 4, %v4466_v36 }
  0xfc   :  { %v620_v1 = vsel %vm608_vm12, %v602_v41, %v619_v32  ;;  %v4505_v52 = vmul.u32.u64.low %v622_v54, %v617_v9  ;;  %v4506_v44 = vmul.u32.u64.high %v622_v54, %v617_v9, %v4505_v52  ;;  %vm461_vm1 = vcmp.lt.s32.totalorder %v4461_v17, 2  ;;  %v4529_v32 = vpop.permute.xlu1 %119 }
  0xfd   :  { %v3592_v15 = vadd.s32 4294967294, %v538_v5  ;;  %v621_v33 = vsel %vm607_vm10, %v618_v13, %v620_v1  ;;  %v3598_v49 = vadd.s32 4294967169, %v682_v56  ;;  %vm462_vm2 = vcmp.eq.s32.totalorder %v4461_v17, 0  ;;  %v4531_v5 = vpop.permute.xlu0 %124 }
  0xfe   :  { %v613_v53 = vsel %vm607_vm10, %v610_v43, %v612_v62  ;;  %v4513_v59 = vmul.u32.u64.low %v622_v54, %v621_v33  ;;  %v4514_v27 = vmul.u32.u64.high %v622_v54, %v621_v33, %v4513_v59  ;;  %v3855_v55 = vpop.eup %3854  ;;  %vm465_vm3 = vcmp.eq.s32.totalorder %v4461_v17, 2 }
  0xff   :  { %v526_v41 = vadd.s32 %v4428_v7, %v4425_v23  ;;  %vm3593_vm4 = vcmp.lt.s32.totalorder %v3592_v15, 0  ;;  %v688_v24 = vadd.s32 1, %v3598_v49  ;;  %v3857_v51 = vpop.eup %3856  ;;  %v466_v6 = vxor.u32 2147483648, %v3855_v55 }
 0x100   :  { %v541_v2 = vsel %vm3593_vm4, 0, %v3592_v15  ;;  %v557_v56 = vsel %vm472_vm14, %v556_v11, %v4466_v36  ;;  %v632_v50 = vadd.s32 1, %v4506_v44  ;;  %v463_v42 = vxor.u32 2147483648, %v3857_v51 }
 0x101   :  { %v542_v16 = vsub.s32 32, %v541_v2  ;;  %v546_v63 = vsub.s32 4294967266, %v541_v2  ;;  %v629_v46 = vmul.u32 %v622_v54, %v613_v53  ;;  %v467_v0 = vsel %vm465_vm3, %v466_v6, %v3857_v51 }
 0x102   :  { %v543_v9 = vshll.u32 %v4482_v40, %v541_v2  ;;  %vm631_vm5 = vc.u32 %v4514_v27, %v4505_v52  ;;  %vm689_vm6 = vcmp.gt.s32.totalorder %v688_v24, 0  ;;  %v464_v23 = vsel %vm462_vm2, %v3855_v55, %v463_v42 }
 0x103   :  { %v544_v7 = vshrl.u32 %v526_v41, %v542_v16  ;;  %v547_v13 = vadd.s32 127, %v546_v63  ;;  %v633_v36 = vsel %vm631_vm5, %v632_v50, %v4506_v44  ;;  %v468_v54 = vsel %vm461_vm1, %v464_v23, %v467_v0 }
 0x104   :  { %v634_v43 = vadd.s32 %v633_v36, %v629_v46  ;;  %v678_v40 = vand.u32 2147483647, %v4333_v57  ;;  %v690_v62 = vsel %vm689_vm6, %v688_v24, 0  ;;  %v469_v11 = vsel %vm458_vm0, nan, %v468_v54 }
 0x105   :  { %v545_v1 = vor.u32 %v544_v7, %v543_v9  ;;  %v548_v15 = vshll.u32 %v547_v13, 23  ;;  %v559_v33 = vsel %vm4499_vm15, 0, %v557_v56  ;;  %v4542_v44 = vmul.f32 %v4095_v26, %v4106_v29  ;;  %1824 = vst [vmem:[#allocation2 + $0x10] sm:$0xff] %v469_v11 }
 0x106   :  { %v4546_v17 = vmul.f32 %v4093_v25, %v4102_v28  ;;  %v635_v49 = vadd.s32 536870912, %v634_v43  ;;  %v692_v53 = vand.u32 31, %v690_v62  ;;  %v4550_v45 = vadd.f32 %v4529_v32, %v4449_v48 }
 0x107   :  { %v4554_v59 = vadd.f32 %v4529_v32, %v4453_v3  ;;  %v4558_v55 = vadd.f32 %v4531_v5, %v4459_v39  ;;  %v549_v41 = vor.u32 4788187, %v548_v15  ;;  %v563_v24 = vadd.s32 3, %v559_v33 }
 0x108   :  { %v4560_v51 = vshrl.u32 %v635_v49, 30  ;;  %v685_v6 = vand.u32 8388607, %v678_v40  ;;  %v693_v2 = vsub.s32 32, %v692_v53  ;;  %v552_v50 = vcvt.s32.f32 %v545_v1 }
 0x109   :  { %v550_v56 = vand.u32 2147483647, %v549_v41  ;;  %v4564_v48 = vshrl.u32 %v690_v62, 5  ;;  %v695_v42 = vshll.u32 %v3999_v4, %v692_v53  ;;  %v698_v39 = vshll.u32 %v6774_v8, %v692_v53 }
 0x10a   :  { %v637_v3 = vshll.u32 %v4560_v51, 30  ;;  %v696_v16 = vshrl.u32 %v6774_v8, %v693_v2  ;;  %v701_v63 = vshll.u32 %v4001_v10, %v692_v53  ;;  %v699_v0 = vshrl.u32 %v4001_v10, %v693_v2 }
 0x10b   :  { %v553_v46 = vmul.f32 %v552_v50, %v550_v56  ;;  %v702_v9 = vshrl.u32 %v4002_v12, %v693_v2  ;;  %v705_v23 = vshrl.u32 %v4003_v14, %v693_v2  ;;  %v4574_v7 = vand.u32 3, %v563_v24 }
 0x10c   :  { %v4576_v13 = vsub.s32 %v634_v43, %v637_v3  ;;  %v704_v36 = vshll.u32 %v4002_v12, %v692_v53  ;;  %v708_v54 = vshrl.u32 %v6768_v37, %v693_v2  ;;  %v697_v11 = vor.u32 %v696_v16, %v695_v42 }
 0x10d   :  { %v554_v62 = vxor.u32 2147483648, %v553_v46  ;;  %v700_v1 = vor.u32 %v699_v0, %v698_v39  ;;  %v703_v15 = vor.u32 %v702_v9, %v701_v63  ;;  %v686_v49 = vor.u32 8388608, %v685_v6 }
 0x10e   :  { %v640_v33 = vsub.s32 0, %v4576_v13  ;;  %v706_v41 = vor.u32 %v705_v23, %v704_v36  ;;  %v707_v56 = vshll.u32 %v4003_v14, %v692_v53  ;;  %v694_v43 = vshrl.u32 %v3999_v4, %v693_v2 }
 0x10f   :  { %v555_v24 = vsel %vm472_vm14, %v554_v62, %v553_v46  ;;  %vm710_vm7 = vcmp.lt.s32.totalorder %v4564_v48, 1  ;;  %v785_v50 = vand.u32 2139095040, %v4550_v45  ;;  %vm713_vm8 = vcmp.lt.s32.totalorder %v4564_v48, 4 }
 0x110   :  { %v558_v42 = vsel %vm4499_vm15, %v4144_v60, %v555_v24  ;;  %v3595_v3 = vmin.u32 %v640_v33, %v4576_v13  ;;  %v709_v16 = vor.u32 %v708_v54, %v707_v56  ;;  %v715_v53 = vsel %vm713_vm8, %v703_v15, 2102212464 }
 0x111   :  { %3858 = vcosq.f32 %v558_v42  ;;  %v718_v6 = vsel %vm710_vm7, %v697_v11, %v700_v1  ;;  %v719_v2 = vsel %vm713_vm8, %v706_v41, 920167782  ;;  %vm712_vm11 = vcmp.lt.s32.totalorder %v4564_v48, 3 }
 0x112   :  { %3860 = vsinq.f32 %v558_v42  ;;  %v642_v39 = vclz %v3595_v3  ;;  %v726_v35 = vshll.u32 %v686_v49, 8  ;;  %vm711_vm9 = vcmp.lt.s32.totalorder %v4564_v48, 2 }
 0x113   :  { %v714_v63 = vsel %vm710_vm7, %v694_v43, %v697_v11  ;;  %v720_v46 = vsel %vm712_vm11, %v703_v15, %v719_v2  ;;  %v722_v0 = vsel %vm710_vm7, %v700_v1, %v703_v15  ;;  %vm4606_vm12 = vcmp.le.f32.partialorder %v574_v61, 0.7853982 }
 0x114   :  { %v3596_v23 = vadd.s32 4294967294, %v642_v39  ;;  %v716_v36 = vsel %vm712_vm11, %v700_v1, %v715_v53  ;;  %v721_v54 = vsel %vm711_vm9, %v718_v6, %v720_v46  ;;  %v723_v62 = vsel %vm713_vm8, %v709_v16, 1326507024 }
 0x115   :  { %v724_v33 = vsel %vm712_vm11, %v706_v41, %v723_v62  ;;  %v4614_v11 = vmul.u32.u64.low %v726_v35, %v721_v54  ;;  %v4615_v49 = vmul.u32.u64.high %v726_v35, %v721_v54, %v4614_v11  ;;  %v786_v15 = vshrl.u32 %v785_v50, 23 }
 0x116   :  { %vm3597_vm13 = vcmp.lt.s32.totalorder %v3596_v23, 0  ;;  %v660_v61 = vsub.s32 4, %v4560_v51  ;;  %v725_v56 = vsel %vm711_vm9, %v722_v0, %v724_v33  ;;  %v782_v1 = vand.u32 2147483647, %v4550_v45 }
 0x117   :  { %v645_v24 = vsel %vm3597_vm13, 0, %v3596_v23  ;;  %v4622_v43 = vmul.u32.u64.low %v726_v35, %v725_v56  ;;  %v4623_v42 = vmul.u32.u64.high %v726_v35, %v725_v56, %v4622_v43  ;;  %v3602_v3 = vadd.s32 4294967169, %v786_v15 }
 0x118   :  { %vm562_vm10 = vweird.f32 %v4144_v60  ;;  %v630_v41 = vadd.s32 %v4505_v52, %v4514_v27  ;;  %v646_v16 = vsub.s32 32, %v645_v24  ;;  %v650_v50 = vsub.s32 4294967266, %v645_v24 }
 0x119   :  { %v717_v53 = vsel %vm711_vm9, %v714_v63, %v716_v36  ;;  %vm569_vm14 = vcmp.eq.s32.totalorder %v4574_v7, 2  ;;  %vm576_vm0 = vcmp.lt.s32.totalorder %v4329_v58, 0  ;;  %v736_v6 = vadd.s32 1, %v4615_v49 }
 0x11a   :  { %v792_v2 = vadd.s32 1, %v3602_v3  ;;  %v647_v39 = vshll.u32 %v4576_v13, %v645_v24  ;;  %v648_v46 = vshrl.u32 %v630_v41, %v646_v16  ;;  %v651_v0 = vadd.s32 127, %v650_v50 }
 0x11b   :  { %v661_v52 = vsel %vm576_vm0, %v660_v61, %v4560_v51  ;;  %v3859_v27 = vpop.eup %3858  ;;  %v733_v23 = vmul.u32 %v726_v35, %v717_v53  ;;  %vm735_vm15 = vc.u32 %v4623_v42, %v4614_v11  ;;  %v789_v48 = vand.u32 8388607, %v782_v1 }
 0x11c   :  { %vm793_vm1 = vcmp.gt.s32.totalorder %v792_v2, 0  ;;  %v3861_v63 = vpop.eup %3860  ;;  %v570_v36 = vxor.u32 2147483648, %v3859_v27  ;;  %v649_v54 = vor.u32 %v648_v46, %v647_v39  ;;  %v652_v62 = vshll.u32 %v651_v0, 23 }
 0x11d   :  { %v737_v13 = vsel %vm735_vm15, %v736_v6, %v4615_v49  ;;  %v567_v33 = vxor.u32 2147483648, %v3861_v63  ;;  %v663_v15 = vsel %vm4606_vm12, 0, %v661_v52  ;;  %v794_v61 = vsel %vm793_vm1, %v792_v2, 0 }
 0x11e   :  { %v738_v51 = vadd.s32 %v737_v13, %v733_v23  ;;  %vm566_vm2 = vcmp.eq.s32.totalorder %v4574_v7, 0  ;;  %v571_v35 = vsel %vm569_vm14, %v570_v36, %v3861_v63  ;;  %v653_v56 = vor.u32 4788187, %v652_v62 }
 0x11f   :  { %v889_v24 = vand.u32 2139095040, %v4554_v59  ;;  %vm565_vm3 = vcmp.lt.s32.totalorder %v4574_v7, 2  ;;  %v568_v43 = vsel %vm566_vm2, %v3859_v27, %v567_v33  ;;  %v796_v41 = vand.u32 31, %v794_v61 }
 0x120   :  { %v739_v3 = vadd.s32 536870912, %v738_v51  ;;  %v572_v49 = vsel %vm565_vm3, %v568_v43, %v571_v35  ;;  %v654_v16 = vand.u32 2147483647, %v653_v56  ;;  %v656_v50 = vcvt.s32.f32 %v649_v54 }
 0x121   :  { %v667_v53 = vadd.s32 3, %v663_v15  ;;  %v573_v6 = vsel %vm562_vm10, nan, %v572_v49  ;;  %v790_v39 = vor.u32 8388608, %v789_v48  ;;  %v797_v46 = vsub.s32 32, %v796_v41 }
 0x122   :  { %v4651_v2 = vshrl.u32 %v739_v3, 30  ;;  %v657_v0 = vmul.f32 %v656_v50, %v654_v16  ;;  %v795_v52 = vshrl.u32 %v794_v61, 5  ;;  %v799_v23 = vshll.u32 %v3999_v4, %v796_v41  ;;  %1825 = vst [vmem:[#allocation2 + $0x18] sm:$0xff] %v573_v6 }
 0x123   :  { %v890_v63 = vshrl.u32 %v889_v24, 23  ;;  %v800_v27 = vshrl.u32 %v6774_v8, %v797_v46  ;;  %v802_v36 = vshll.u32 %v6774_v8, %v796_v41  ;;  %v805_v54 = vshll.u32 %v4001_v10, %v796_v41 }
 0x124   :  { %v741_v7 = vshll.u32 %v4651_v2, 30  ;;  %v658_v60 = vxor.u32 2147483648, %v657_v0  ;;  %v803_v62 = vshrl.u32 %v4001_v10, %v797_v46  ;;  %v806_v48 = vshrl.u32 %v4002_v12, %v797_v46 }
 0x125   :  { %v809_v13 = vshrl.u32 %v4003_v14, %v797_v46  ;;  %v4661_v33 = vand.u32 3, %v667_v53  ;;  %v808_v61 = vshll.u32 %v4002_v12, %v796_v41  ;;  %v4666_v35 = vshll.u32 %v790_v39, 8 }
 0x126   :  { %v4663_v15 = vsub.s32 %v738_v51, %v741_v7  ;;  %v659_v56 = vsel %vm576_vm0, %v658_v60, %v657_v0  ;;  %v801_v24 = vor.u32 %v800_v27, %v799_v23  ;;  %v804_v43 = vor.u32 %v803_v62, %v802_v36 }
 0x127   :  { %v807_v3 = vor.u32 %v806_v48, %v805_v54  ;;  %v662_v49 = vsel %vm4606_vm12, %v4329_v58, %v659_v56  ;;  %v810_v50 = vor.u32 %v809_v13, %v808_v61  ;;  %v3606_v53 = vadd.s32 4294967169, %v890_v63 }
 0x128   :  { %v744_v16 = vsub.s32 0, %v4663_v15  ;;  %3862 = vcosq.f32 %v662_v49  ;;  %v811_v51 = vshll.u32 %v4003_v14, %v796_v41  ;;  %v812_v6 = vshrl.u32 %v6768_v37, %v797_v46 }
 0x129   :  { %vm814_vm4 = vcmp.lt.s32.totalorder %v795_v52, 1  ;;  %3864 = vsinq.f32 %v662_v49  ;;  %vm680_vm5 = vcmp.lt.s32.totalorder %v4333_v57, 0  ;;  %v798_v0 = vshrl.u32 %v3999_v4, %v797_v46 }
 0x12a   :  { %v3599_v39 = vmin.u32 %v744_v16, %v4663_v15  ;;  %vm817_vm6 = vcmp.lt.s32.totalorder %v795_v52, 4  ;;  %v813_v9 = vor.u32 %v812_v6, %v811_v51  ;;  %v822_v7 = vsel %vm814_vm4, %v801_v24, %v804_v43 }
 0x12b   :  { %v819_v23 = vsel %vm817_vm6, %v807_v3, 2102212464  ;;  %v823_v27 = vsel %vm817_vm6, %v810_v50, 920167782  ;;  %vm815_vm7 = vcmp.lt.s32.totalorder %v795_v52, 2  ;;  %vm816_vm8 = vcmp.lt.s32.totalorder %v795_v52, 3 }
 0x12c   :  { %v746_v63 = vclz %v3599_v39  ;;  %v818_v41 = vsel %vm814_vm4, %v798_v0, %v801_v24  ;;  %v820_v36 = vsel %vm816_vm8, %v804_v43, %v819_v23  ;;  %v824_v54 = vsel %vm816_vm8, %v807_v3, %v823_v27 }
 0x12d   :  { %v826_v60 = vsel %vm814_vm4, %v804_v43, %v807_v3  ;;  %v827_v62 = vsel %vm817_vm6, %v813_v9, 1326507024  ;;  %vm4684_vm11 = vcmp.le.f32.partialorder %v678_v40, 0.7853982  ;;  %v825_v13 = vsel %vm815_vm7, %v822_v7, %v824_v54 }
 0x12e   :  { %v3600_v48 = vadd.s32 4294967294, %v746_v63  ;;  %v828_v61 = vsel %vm816_vm8, %v810_v50, %v827_v62  ;;  %vm669_vm9 = vcmp.lt.s32.totalorder %v4661_v33, 2  ;;  %v764_v56 = vsub.s32 4, %v4651_v2 }
 0x12f   :  { %v829_v24 = vsel %vm815_vm7, %v826_v60, %v828_v61  ;;  %v4693_v49 = vmul.u32.u64.low %v4666_v35, %v825_v13  ;;  %v4694_v43 = vmul.u32.u64.high %v4666_v35, %v825_v13, %v4693_v49  ;;  %v821_v40 = vsel %vm815_vm7, %v818_v41, %v820_v36 }
 0x130   :  { %vm3601_vm12 = vcmp.lt.s32.totalorder %v3600_v48, 0  ;;  %v4699_v3 = vmul.u32.u64.low %v4666_v35, %v829_v24  ;;  %v4700_v16 = vmul.u32.u64.high %v4666_v35, %v829_v24, %v4699_v3  ;;  %vm670_vm13 = vcmp.eq.s32.totalorder %v4661_v33, 0 }
 0x131   :  { %v749_v50 = vsel %vm3601_vm12, 0, %v3600_v48  ;;  %v6767_v51 = vand.u32 2147483647, %v4554_v59  ;;  %v896_v6 = vadd.s32 1, %v3606_v53  ;;  %vm673_vm10 = vcmp.eq.s32.totalorder %v4661_v33, 2 }
 0x132   :  { %v734_v39 = vadd.s32 %v4614_v11, %v4623_v42  ;;  %v750_v0 = vsub.s32 32, %v749_v50  ;;  %v754_v9 = vsub.s32 4294967266, %v749_v50  ;;  %v3863_v23 = vpop.eup %3862  ;;  %v765_v52 = vsel %vm680_vm5, %v764_v56, %v4651_v2 }
 0x133   :  { %v837_v7 = vmul.u32 %v4666_v35, %v821_v40  ;;  %v840_v27 = vadd.s32 1, %v4694_v43  ;;  %vm897_vm14 = vcmp.gt.s32.totalorder %v896_v6, 0  ;;  %v3865_v63 = vpop.eup %3864  ;;  %v674_v41 = vxor.u32 2147483648, %v3863_v23 }
 0x134   :  { %v751_v53 = vshll.u32 %v4663_v15, %v749_v50  ;;  %v752_v36 = vshrl.u32 %v734_v39, %v750_v0  ;;  %v755_v54 = vadd.s32 127, %v754_v9  ;;  %v671_v60 = vxor.u32 2147483648, %v3865_v63 }
 0x135   :  { %vm839_vm0 = vc.u32 %v4700_v16, %v4693_v49  ;;  %v893_v11 = vand.u32 8388607, %v6767_v51  ;;  %v898_v42 = vsel %vm897_vm14, %v896_v6, 0  ;;  %v675_v2 = vsel %vm673_vm10, %v674_v41, %v3865_v63 }
 0x136   :  { %v753_v35 = vor.u32 %v752_v36, %v751_v53  ;;  %v756_v62 = vshll.u32 %v755_v54, 23  ;;  %v841_v48 = vsel %vm839_vm0, %v840_v27, %v4694_v43  ;;  %v672_v15 = vsel %vm670_vm13, %v3863_v23, %v671_v60 }
 0x137   :  { %v767_v13 = vsel %vm4684_vm11, 0, %v765_v52  ;;  %v842_v61 = vadd.s32 %v841_v48, %v837_v7  ;;  %v900_v56 = vand.u32 31, %v898_v42  ;;  %v4726_v24 = vmul.f32 %v4093_v25, %v4106_v29 }
 0x138   :  { %vm666_vm15 = vweird.f32 %v4329_v58  ;;  %v676_v40 = vsel %vm669_vm9, %v672_v15, %v675_v2  ;;  %v757_v3 = vor.u32 4788187, %v756_v62  ;;  %v4733_v43 = vmul.f32 %v4108_v30, %v4102_v28 }
 0x139   :  { %v677_v50 = vsel %vm666_vm15, nan, %v676_v40  ;;  %v843_v6 = vadd.s32 536870912, %v842_v61  ;;  %v901_v39 = vsub.s32 32, %v900_v56  ;;  %v760_v9 = vcvt.s32.f32 %v753_v35 }
 0x13a   :  { %v758_v0 = vand.u32 2147483647, %v757_v3  ;;  %v771_v23 = vadd.s32 3, %v767_v13  ;;  %v894_v52 = vor.u32 8388608, %v893_v11  ;;  %1826 = vst [vmem:[#allocation2 + $0x20] sm:$0xff] %v677_v50  ;;  %v899_v27 = vshrl.u32 %v898_v42, 5 }
 0x13b   :  { %v4735_v7 = vshrl.u32 %v843_v6, 30  ;;  %v904_v58 = vshrl.u32 %v6774_v8, %v901_v39  ;;  %v993_v33 = vand.u32 2139095040, %v4558_v55  ;;  %v907_v41 = vshrl.u32 %v4001_v10, %v901_v39 }
 0x13c   :  { %v761_v63 = vmul.f32 %v760_v9, %v758_v0  ;;  %v910_v53 = vshrl.u32 %v4002_v12, %v901_v39  ;;  %v913_v36 = vshrl.u32 %v4003_v14, %v901_v39  ;;  %v903_v60 = vshll.u32 %v3999_v4, %v900_v56 }
 0x13d   :  { %v845_v54 = vshll.u32 %v4735_v7, 30  ;;  %v906_v11 = vshll.u32 %v6774_v8, %v900_v56  ;;  %v909_v2 = vshll.u32 %v4001_v10, %v900_v56  ;;  %v912_v35 = vshll.u32 %v4002_v12, %v900_v56 }
 0x13e   :  { %v762_v42 = vxor.u32 2147483648, %v761_v63  ;;  %v915_v62 = vshll.u32 %v4003_v14, %v900_v56  ;;  %v916_v48 = vshrl.u32 %v6768_v37, %v901_v39  ;;  %v4751_v15 = vadd.f32 %v4531_v5, %v4542_v44 }
 0x13f   :  { %v4753_v13 = vsub.s32 %v842_v61, %v845_v54  ;;  %v905_v40 = vor.u32 %v904_v58, %v903_v60  ;;  %v911_v3 = vor.u32 %v910_v53, %v909_v2  ;;  %v908_v6 = vor.u32 %v907_v41, %v906_v11 }
 0x140   :  { %v763_v50 = vsel %vm680_vm5, %v762_v42, %v761_v63  ;;  %v914_v0 = vor.u32 %v913_v36, %v912_v35  ;;  %v917_v9 = vor.u32 %v916_v48, %v915_v62  ;;  %v4760_v51 = vand.u32 3, %v771_v23 }
 0x141   :  { %v766_v56 = vsel %vm4684_vm11, %v4333_v57, %v763_v50  ;;  %v848_v37 = vsub.s32 0, %v4753_v13  ;;  %v934_v44 = vshll.u32 %v894_v52, 8  ;;  %vm784_vm1 = vcmp.lt.s32.totalorder %v4550_v45, 0 }
 0x142   :  { %3866 = vcosq.f32 %v766_v56  ;;  %v902_v61 = vshrl.u32 %v3999_v4, %v901_v39  ;;  %vm921_vm2 = vcmp.lt.s32.totalorder %v899_v27, 4  ;;  %v994_v58 = vshrl.u32 %v993_v33, 23 }
 0x143   :  { %3868 = vsinq.f32 %v766_v56  ;;  %v3603_v63 = vmin.u32 %v848_v37, %v4753_v13  ;;  %vm918_vm3 = vcmp.lt.s32.totalorder %v899_v27, 1  ;;  %v923_v41 = vsel %vm921_vm2, %v911_v3, 2102212464 }
 0x144   :  { %v926_v53 = vsel %vm918_vm3, %v905_v40, %v908_v6  ;;  %v927_v46 = vsel %vm921_vm2, %v914_v0, 920167782  ;;  %v930_v36 = vsel %vm918_vm3, %v908_v6, %v911_v3  ;;  %v931_v23 = vsel %vm921_vm2, %v917_v9, 1326507024 }
 0x145   :  { %vm4768_vm4 = vcmp.le.f32.partialorder %v782_v1, 0.7853982  ;;  %v850_v54 = vclz %v3603_v63  ;;  %vm919_vm5 = vcmp.lt.s32.totalorder %v899_v27, 2  ;;  %vm920_vm6 = vcmp.lt.s32.totalorder %v899_v27, 3 }
 0x146   :  { %v922_v39 = vsel %vm918_vm3, %v902_v61, %v905_v40  ;;  %v924_v33 = vsel %vm920_vm6, %v908_v6, %v923_v41  ;;  %v928_v60 = vsel %vm920_vm6, %v911_v3, %v927_v46  ;;  %v932_v11 = vsel %vm920_vm6, %v914_v0, %v931_v23 }
 0x147   :  { %v3610_v37 = vadd.s32 4294967169, %v994_v58  ;;  %v3604_v2 = vadd.s32 4294967294, %v850_v54  ;;  %v868_v42 = vsub.s32 4, %v4735_v7  ;;  %v929_v35 = vsel %vm919_vm5, %v926_v53, %v928_v60 }
 0x148   :  { %v933_v62 = vsel %vm919_vm5, %v930_v36, %v932_v11  ;;  %v4776_v1 = vmul.u32.u64.low %v934_v44, %v929_v35  ;;  %v4777_v9 = vmul.u32.u64.high %v934_v44, %v929_v35, %v4776_v1  ;;  %vm774_vm7 = vcmp.eq.s32.totalorder %v4760_v51, 0 }
 0x149   :  { %v4773_v48 = vmul.u32.u64.low %v934_v44, %v933_v62  ;;  %v4774_v50 = vmul.u32.u64.high %v934_v44, %v933_v62, %v4773_v48  ;;  %vm3605_vm8 = vcmp.lt.s32.totalorder %v3604_v2, 0  ;;  %v925_v27 = vsel %vm919_vm5, %v922_v39, %v924_v33 }
 0x14a   :  { %v1000_v40 = vadd.s32 1, %v3610_v37  ;;  %vm777_vm11 = vcmp.eq.s32.totalorder %v4760_v51, 2  ;;  %v838_v3 = vadd.s32 %v4693_v49, %v4700_v16  ;;  %v853_v6 = vsel %vm3605_vm8, 0, %v3604_v2 }
 0x14b   :  { %v990_v0 = vand.u32 2147483647, %v4558_v55  ;;  %v854_v56 = vsub.s32 32, %v853_v6  ;;  %v858_v61 = vsub.s32 4294967266, %v853_v6  ;;  %v869_v58 = vsel %vm784_vm1, %v868_v42, %v4735_v7 }
 0x14c   :  { %vm1001_vm9 = vcmp.gt.s32.totalorder %v1000_v40, 0  ;;  %v3867_v63 = vpop.eup %3866  ;;  %v941_v41 = vmul.u32 %v934_v44, %v925_v27  ;;  %vm943_vm12 = vc.u32 %v4774_v50, %v4776_v1  ;;  %v944_v53 = vadd.s32 1, %v4777_v9 }
 0x14d   :  { %v1002_v46 = vsel %vm1001_vm9, %v1000_v40, 0  ;;  %v3869_v36 = vpop.eup %3868  ;;  %v778_v49 = vxor.u32 2147483648, %v3867_v63  ;;  %v855_v16 = vshll.u32 %v4753_v13, %v853_v6  ;;  %v856_v23 = vshrl.u32 %v838_v3, %v854_v56  ;;  %v4804_v56 = vpop.permute.xlu1 %129 }
 0x14e   :  { %v859_v54 = vadd.s32 127, %v858_v61  ;;  %v775_v39 = vxor.u32 2147483648, %v3869_v36  ;;  %v871_v33 = vsel %vm4768_vm4, 0, %v869_v58  ;;  %v945_v7 = vsel %vm943_vm12, %v944_v53, %v4777_v9 }
 0x14f   :  { %v1004_v60 = vand.u32 31, %v1002_v46  ;;  %v779_v44 = vsel %vm777_vm11, %v778_v49, %v3869_v36  ;;  %v857_v11 = vor.u32 %v856_v23, %v855_v16  ;;  %v946_v2 = vadd.s32 %v945_v7, %v941_v41 }
 0x150   :  { %v860_v37 = vshll.u32 %v859_v54, 23  ;;  %vm770_vm13 = vweird.f32 %v4333_v57  ;;  %vm773_vm10 = vcmp.lt.s32.totalorder %v4760_v51, 2  ;;  %v776_v13 = vsel %vm774_vm7, %v3867_v63, %v775_v39 }
 0x151   :  { %v1005_v42 = vsub.s32 32, %v1004_v60  ;;  %v780_v35 = vsel %vm773_vm10, %v776_v13, %v779_v44  ;;  %v875_v48 = vadd.s32 3, %v871_v33  ;;  %v947_v27 = vadd.s32 536870912, %v946_v2 }
 0x152   :  { %v861_v62 = vor.u32 4788187, %v860_v37  ;;  %v781_v9 = vsel %vm770_vm13, nan, %v780_v35  ;;  %v864_v40 = vcvt.s32.f32 %v857_v11  ;;  %v997_v3 = vand.u32 8388607, %v990_v0 }
 0x153   :  { %v1008_v6 = vshrl.u32 %v6774_v8, %v1005_v42  ;;  %v948_v61 = vshrl.u32 %v947_v27, 30  ;;  %v1011_v58 = vshrl.u32 %v4001_v10, %v1005_v42  ;;  %v1014_v51 = vshrl.u32 %v4002_v12, %v1005_v42  ;;  %1827 = vst [vmem:[#allocation2 + $0x28] sm:$0xff] %v781_v9 }
 0x154   :  { %v862_v57 = vand.u32 2147483647, %v861_v62  ;;  %v1003_v63 = vshrl.u32 %v1002_v46, 5  ;;  %v1007_v41 = vshll.u32 %v3999_v4, %v1004_v60  ;;  %v1016_v53 = vshll.u32 %v4002_v12, %v1004_v60 }
 0x155   :  { %v1017_v36 = vshrl.u32 %v4003_v14, %v1005_v42  ;;  %v949_v16 = vshll.u32 %v948_v61, 30  ;;  %v1010_v23 = vshll.u32 %v6774_v8, %v1004_v60  ;;  %v1013_v54 = vshll.u32 %v4001_v10, %v1004_v60 }
 0x156   :  { %v865_v49 = vmul.f32 %v864_v40, %v862_v57  ;;  %v4815_v39 = vadd.f32 %v4804_v56, %v4546_v17  ;;  %v1009_v33 = vor.u32 %v1008_v6, %v1007_v41  ;;  %v6790_v44 = vmov 1326507024  }
 0x157   :  { %v1018_v7 = vor.u32 %v1017_v36, %v1016_v53  ;;  %v1020_v46 = vshrl.u32 %v6790_v44, %v1005_v42  ;;  %vm888_vm14 = vcmp.lt.s32.totalorder %v4554_v59, 0  ;;  %v4819_v37 = vsub.s32 %v946_v2, %v949_v16 }
 0x158   :  { %v866_v11 = vxor.u32 2147483648, %v865_v49  ;;  %v1012_v13 = vor.u32 %v1011_v58, %v1010_v23  ;;  %v1015_v35 = vor.u32 %v1014_v51, %v1013_v54  ;;  %v4821_v62 = vand.u32 3, %v875_v48 }
 0x159   :  { %v998_v27 = vor.u32 8388608, %v997_v3  ;;  %v1019_v9 = vshll.u32 %v4003_v14, %v1004_v60  ;;  %v1097_v40 = vand.u32 2139095040, %v4751_v15  ;;  %v952_v6 = vsub.s32 0, %v4819_v37 }
 0x15a   :  { %v867_v17 = vsel %vm784_vm1, %v866_v11, %v865_v49  ;;  %vm1022_vm0 = vcmp.lt.s32.totalorder %v1003_v63, 1  ;;  %vm1025_vm15 = vcmp.lt.s32.totalorder %v1003_v63, 4  ;;  %vm1024_vm2 = vcmp.lt.s32.totalorder %v1003_v63, 3 }
 0x15b   :  { %v870_v2 = vsel %vm4768_vm4, %v4550_v45, %v867_v17  ;;  %v1021_v57 = vor.u32 %v1020_v46, %v1019_v9  ;;  %v1031_v48 = vsel %vm1025_vm15, %v1018_v7, 920167782  ;;  %v3607_v60 = vmin.u32 %v952_v6, %v4819_v37 }
 0x15c   :  { %3870 = vcosq.f32 %v870_v2  ;;  %v1027_v3 = vsel %vm1025_vm15, %v1015_v35, 2102212464  ;;  %v1030_v58 = vsel %vm1022_vm0, %v1009_v33, %v1012_v13  ;;  %v972_v51 = vsub.s32 4, %v948_v61 }
 0x15d   :  { %3872 = vsinq.f32 %v870_v2  ;;  %v1006_v41 = vshrl.u32 %v3999_v4, %v1005_v42  ;;  %v1032_v53 = vsel %vm1024_vm2, %v1015_v35, %v1031_v48  ;;  %v954_v36 = vclz %v3607_v60 }
 0x15e   :  { %vm1023_vm1 = vcmp.lt.s32.totalorder %v1003_v63, 2  ;;  %v1034_v52 = vsel %vm1022_vm0, %v1012_v13, %v1015_v35  ;;  %v1038_v49 = vshll.u32 %v998_v27, 8  ;;  %v1028_v23 = vsel %vm1024_vm2, %v1012_v13, %v1027_v3 }
 0x15f   :  { %v1026_v16 = vsel %vm1022_vm0, %v1006_v41, %v1009_v33  ;;  %v1033_v54 = vsel %vm1023_vm1, %v1030_v58, %v1032_v53  ;;  %v1035_v46 = vsel %vm1025_vm15, %v1021_v57, 1326507024  ;;  %v3608_v11 = vadd.s32 4294967294, %v954_v36 }
 0x160   :  { %v1036_v9 = vsel %vm1024_vm2, %v1018_v7, %v1035_v46  ;;  %v4843_v17 = vmul.u32.u64.low %v1038_v49, %v1033_v54  ;;  %v4844_v42 = vmul.u32.u64.high %v1038_v49, %v1033_v54, %v4843_v17  ;;  %v6791_v6 = vand.u32 2147483647, %v4554_v59 }
 0x161   :  { %v973_v33 = vsel %vm888_vm14, %v972_v51, %v948_v61  ;;  %v1037_v13 = vsel %vm1023_vm1, %v1034_v52, %v1036_v9  ;;  %v1098_v27 = vshrl.u32 %v1097_v40, 23  ;;  %vm877_vm4 = vcmp.lt.s32.totalorder %v4821_v62, 2 }
 0x162   :  { %vm4849_vm3 = vcmp.le.f32.partialorder %v6791_v6, 0.7853982  ;;  %vm3609_vm5 = vcmp.lt.s32.totalorder %v3608_v11, 0  ;;  %v1029_v7 = vsel %vm1023_vm1, %v1026_v16, %v1028_v23  ;;  %vm878_vm6 = vcmp.eq.s32.totalorder %v4821_v62, 0 }
 0x163   :  { %v4858_v2 = vmul.u32.u64.low %v1038_v49, %v1037_v13  ;;  %v4859_v57 = vmul.u32.u64.high %v1038_v49, %v1037_v13, %v4858_v2  ;;  %v957_v48 = vsel %vm3609_vm5, 0, %v3608_v11  ;;  %v1094_v60 = vand.u32 2147483647, %v4751_v15 }
 0x164   :  { %v3614_v3 = vadd.s32 4294967169, %v1098_v27  ;;  %v942_v61 = vadd.s32 %v4776_v1, %v4774_v50  ;;  %v958_v58 = vsub.s32 32, %v957_v48  ;;  %v962_v51 = vsub.s32 4294967266, %v957_v48 }
 0x165   :  { %v1048_v40 = vadd.s32 1, %v4844_v42  ;;  %v959_v41 = vshll.u32 %v4819_v37, %v957_v48  ;;  %v975_v63 = vsel %vm4849_vm3, 0, %v973_v33  ;;  %v1045_v53 = vmul.u32 %v1038_v49, %v1029_v7 }
 0x166   :  { %v1104_v36 = vadd.s32 1, %v3614_v3  ;;  %v3871_v52 = vpop.eup %3870  ;;  %v960_v16 = vshrl.u32 %v942_v61, %v958_v58  ;;  %v963_v23 = vadd.s32 127, %v962_v51  ;;  %vm1047_vm7 = vc.u32 %v4859_v57, %v4843_v17 }
 0x167   :  { %v1201_v54 = vand.u32 2139095040, %v4815_v39  ;;  %v3873_v50 = vpop.eup %3872  ;;  %vm881_vm8 = vcmp.eq.s32.totalorder %v4821_v62, 2  ;;  %v882_v1 = vxor.u32 2147483648, %v3871_v52  ;;  %v1049_v46 = vsel %vm1047_vm7, %v1048_v40, %v4844_v42 }
 0x168   :  { %vm1105_vm11 = vcmp.gt.s32.totalorder %v1104_v36, 0  ;;  %v879_v37 = vxor.u32 2147483648, %v3873_v50  ;;  %v961_v11 = vor.u32 %v960_v16, %v959_v41  ;;  %v964_v9 = vshll.u32 %v963_v23, 23 }
 0x169   :  { %v1050_v49 = vadd.s32 %v1049_v46, %v1045_v53  ;;  %v883_v6 = vsel %vm881_vm8, %v882_v1, %v3873_v50  ;;  %v979_v33 = vadd.s32 3, %v975_v63  ;;  %v1101_v13 = vand.u32 8388607, %v1094_v60 }
 0x16a   :  { %v1106_v27 = vsel %vm1105_vm11, %v1104_v36, 0  ;;  %v880_v7 = vsel %vm878_vm6, %v3871_v52, %v879_v37  ;;  %v965_v2 = vor.u32 4788187, %v964_v9  ;;  %v1202_v3 = vshrl.u32 %v1201_v54, 23 }
 0x16b   :  { %v1051_v48 = vadd.s32 536870912, %v1050_v49  ;;  %v4880_v42 = vadd.f32 %v4804_v56, %v4726_v24  ;;  %vm874_vm9 = vweird.f32 %v4550_v45  ;;  %v884_v61 = vsel %vm877_vm4, %v880_v7, %v883_v6 }
 0x16c   :  { %v1108_v58 = vand.u32 31, %v1106_v27  ;;  %v885_v51 = vsel %vm874_vm9, nan, %v884_v61  ;;  %v966_v40 = vand.u32 2147483647, %v965_v2  ;;  %v968_v41 = vcvt.s32.f32 %v961_v11 }
 0x16d   :  { %v4885_v63 = vshrl.u32 %v1051_v48, 30  ;;  %v4887_v53 = vand.u32 3, %v979_v33  ;;  %v1102_v36 = vor.u32 8388608, %v1101_v13  ;;  %v6771_v16 = vand.u32 2147483647, %v4815_v39  ;;  %1828 = vst [vmem:[#allocation2 + $0x30] sm:$0xff] %v885_v51 }
 0x16e   :  { %v1109_v52 = vsub.s32 32, %v1108_v58  ;;  %v969_v24 = vmul.f32 %v968_v41, %v966_v40  ;;  %v1111_v45 = vshll.u32 %v3999_v4, %v1108_v58  ;;  %v3618_v62 = vadd.s32 4294967169, %v1202_v3 }
 0x16f   :  { %v1053_v23 = vshll.u32 %v4885_v63, 30  ;;  %v1114_v50 = vshll.u32 %v6774_v8, %v1108_v58  ;;  %v1117_v9 = vshll.u32 %v4001_v10, %v1108_v58  ;;  %v1107_v33 = vshrl.u32 %v1106_v27, 5 }
 0x170   :  { %v1112_v54 = vshrl.u32 %v6774_v8, %v1109_v52  ;;  %v1115_v1 = vshrl.u32 %v4001_v10, %v1109_v52  ;;  %v1118_v46 = vshrl.u32 %v4002_v12, %v1109_v52  ;;  %v970_v37 = vxor.u32 2147483648, %v969_v24 }
 0x171   :  { %v4896_v11 = vsub.s32 %v1050_v49, %v1053_v23  ;;  %v1121_v6 = vshrl.u32 %v4003_v14, %v1109_v52  ;;  %v1120_v7 = vshll.u32 %v4002_v12, %v1108_v58  ;;  %v4901_v2 = vshll.u32 %v1102_v36, 8 }
 0x172   :  { %v1113_v13 = vor.u32 %v1112_v54, %v1111_v45  ;;  %v971_v48 = vsel %vm888_vm14, %v970_v37, %v969_v24  ;;  %v1116_v61 = vor.u32 %v1115_v1, %v1114_v50  ;;  %v1119_v51 = vor.u32 %v1118_v46, %v1117_v9 }
 0x173   :  { %v1056_v3 = vsub.s32 0, %v4896_v11  ;;  %v974_v49 = vsel %vm4849_vm3, %v4554_v59, %v971_v48  ;;  %vm992_vm12 = vcmp.lt.s32.totalorder %v4558_v55, 0  ;;  %v1122_v40 = vor.u32 %v1121_v6, %v1120_v7 }
 0x174   :  { %v1123_v27 = vshll.u32 %v4003_v14, %v1108_v58  ;;  %v1124_v41 = vshrl.u32 %v6790_v44, %v1109_v52  ;;  %3874 = vcosq.f32 %v974_v49  ;;  %v4915_v24 = vand.u32 8388607, %v6771_v16 }
 0x175   :  { %v3611_v36 = vmin.u32 %v1056_v3, %v4896_v11  ;;  %v1208_v23 = vadd.s32 1, %v3618_v62  ;;  %3876 = vsinq.f32 %v974_v49  ;;  %v1076_v45 = vsub.s32 4, %v4885_v63 }
 0x176   :  { %v1110_v35 = vshrl.u32 %v3999_v4, %v1109_v52  ;;  %v1125_v54 = vor.u32 %v1124_v41, %v1123_v27  ;;  %vm4921_vm13 = vcmp.le.f32.partialorder %v990_v0, 0.7853982  ;;  %vm1126_vm10 = vcmp.lt.s32.totalorder %v1107_v33, 1 }
 0x177   :  { %v1058_v50 = vclz %v3611_v36  ;;  %vm1127_vm14 = vcmp.lt.s32.totalorder %v1107_v33, 2  ;;  %vm1129_vm0 = vcmp.lt.s32.totalorder %v1107_v33, 4  ;;  %vm1128_vm15 = vcmp.lt.s32.totalorder %v1107_v33, 3 }
 0x178   :  { %v1131_v1 = vsel %vm1129_vm0, %v1119_v51, 2102212464  ;;  %v1134_v46 = vsel %vm1126_vm10, %v1113_v13, %v1116_v61  ;;  %v1135_v62 = vsel %vm1129_vm0, %v1122_v40, 920167782  ;;  %vm985_vm2 = vcmp.eq.s32.totalorder %v4887_v53, 2 }
 0x179   :  { %v3612_v37 = vadd.s32 4294967294, %v1058_v50  ;;  %v1130_v9 = vsel %vm1126_vm10, %v1110_v35, %v1113_v13  ;;  %v1136_v52 = vsel %vm1128_vm15, %v1119_v51, %v1135_v62  ;;  %v1138_v6 = vsel %vm1126_vm10, %v1116_v61, %v1119_v51 }
 0x17a   :  { %vm982_vm1 = vcmp.eq.s32.totalorder %v4887_v53, 0  ;;  %v1132_v0 = vsel %vm1128_vm15, %v1116_v61, %v1131_v1  ;;  %v1137_v7 = vsel %vm1127_vm14, %v1134_v46, %v1136_v52  ;;  %v1139_v48 = vsel %vm1129_vm0, %v1125_v54, 1326507024 }
 0x17b   :  { %vm1209_vm3 = vcmp.gt.s32.totalorder %v1208_v23, 0  ;;  %vm981_vm4 = vcmp.lt.s32.totalorder %v4887_v53, 2  ;;  %vm3613_vm5 = vcmp.lt.s32.totalorder %v3612_v37, 0  ;;  %v1140_v3 = vsel %vm1128_vm15, %v1122_v40, %v1139_v48 }
 0x17c   :  { %v4933_v49 = vmul.u32.u64.low %v4901_v2, %v1137_v7  ;;  %v4934_v27 = vmul.u32.u64.high %v4901_v2, %v1137_v7, %v4933_v49  ;;  %vm978_vm6 = vweird.f32 %v4554_v59  ;;  %v1046_v13 = vadd.s32 %v4843_v17, %v4859_v57 }
 0x17d   :  { %v1061_v61 = vsel %vm3613_vm5, 0, %v3612_v37  ;;  %v1141_v51 = vsel %vm1127_vm14, %v1138_v6, %v1140_v3  ;;  %v1210_v41 = vsel %vm1209_vm3, %v1208_v23, 0  ;;  %v1077_v40 = vsel %vm992_vm12, %v1076_v45, %v4885_v63 }
 0x17e   :  { %v1062_v36 = vsub.s32 32, %v1061_v61  ;;  %v1066_v35 = vsub.s32 4294967266, %v1061_v61  ;;  %v1133_v54 = vsel %vm1127_vm14, %v1130_v9, %v1132_v0  ;;  %v1206_v46 = vor.u32 8388608, %v4915_v24  ;;  %v3875_v17 = vpop.eup %3874 }
 0x17f   :  { %v4946_v50 = vmul.u32.u64.low %v4901_v2, %v1141_v51  ;;  %v4947_v1 = vmul.u32.u64.high %v4901_v2, %v1141_v51, %v4946_v50  ;;  %v1212_v62 = vand.u32 31, %v1210_v41  ;;  %v1063_v57 = vshll.u32 %v4896_v11, %v1061_v61  ;;  %v3877_v6 = vpop.eup %3876 }
 0x180   :  { %v1064_v37 = vshrl.u32 %v1046_v13, %v1062_v36  ;;  %v1067_v23 = vadd.s32 127, %v1066_v35  ;;  %v1152_v52 = vadd.s32 1, %v4934_v27  ;;  %v986_v7 = vxor.u32 2147483648, %v3875_v17 }
 0x181   :  { %v1079_v63 = vsel %vm4921_vm13, 0, %v1077_v40  ;;  %v1149_v33 = vmul.u32 %v4901_v2, %v1133_v54  ;;  %v1213_v45 = vsub.s32 32, %v1212_v62  ;;  %v983_v9 = vxor.u32 2147483648, %v3877_v6 }
 0x182   :  { %v1065_v0 = vor.u32 %v1064_v37, %v1063_v57  ;;  %v1068_v48 = vshll.u32 %v1067_v23, 23  ;;  %v4955_v24 = vshrl.u32 %v1210_v41, 5  ;;  %v987_v11 = vsel %vm985_vm2, %v986_v7, %v3877_v6 }
 0x183   :  { %vm1151_vm7 = vc.u32 %v4947_v1, %v4933_v49  ;;  %v1215_v3 = vshll.u32 %v3999_v4, %v1212_v62  ;;  %v1218_v13 = vshll.u32 %v6774_v8, %v1212_v62  ;;  %v984_v61 = vsel %vm982_vm1, %v3875_v17, %v983_v9 }
 0x184   :  { %v1069_v2 = vor.u32 4788187, %v1068_v48  ;;  %v1153_v51 = vsel %vm1151_vm7, %v1152_v52, %v4934_v27  ;;  %v1221_v36 = vshll.u32 %v4001_v10, %v1212_v62  ;;  %v988_v41 = vsel %vm981_vm4, %v984_v61, %v987_v11 }
 0x185   :  { %v1154_v35 = vadd.s32 %v1153_v51, %v1149_v33  ;;  %v1216_v40 = vshrl.u32 %v6774_v8, %v1213_v45  ;;  %v1219_v54 = vshrl.u32 %v4001_v10, %v1213_v45  ;;  %v989_v50 = vsel %vm978_vm6, nan, %v988_v41 }
 0x186   :  { %v1070_v57 = vand.u32 2147483647, %v1069_v2  ;;  %v1072_v37 = vcvt.s32.f32 %v1065_v0  ;;  %v1222_v17 = vshrl.u32 %v4002_v12, %v1213_v45  ;;  %v1224_v27 = vshll.u32 %v4002_v12, %v1212_v62  ;;  %1829 = vst [vmem:[#allocation2 + $0x38] sm:$0xff] %v989_v50 }
 0x187   :  { %v1155_v23 = vadd.s32 536870912, %v1154_v35  ;;  %v1217_v6 = vor.u32 %v1216_v40, %v1215_v3  ;;  %v1225_v52 = vshrl.u32 %v4003_v14, %v1213_v45  ;;  %vm1096_vm8 = vcmp.lt.s32.totalorder %v4751_v15, 0 }
 0x188   :  { %v1073_v53 = vmul.f32 %v1072_v37, %v1070_v57  ;;  %v1220_v7 = vor.u32 %v1219_v54, %v1218_v13  ;;  %v1227_v33 = vshll.u32 %v4003_v14, %v1212_v62  ;;  %v1228_v59 = vshrl.u32 %v6790_v44, %v1213_v45 }
 0x189   :  { %v1083_v9 = vadd.s32 3, %v1079_v63  ;;  %v1156_v48 = vshrl.u32 %v1155_v23, 30  ;;  %v1223_v0 = vor.u32 %v1222_v17, %v1221_v36  ;;  %v1226_v11 = vor.u32 %v1225_v52, %v1224_v27 }
 0x18a   :  { %v1074_v61 = vxor.u32 2147483648, %v1073_v53  ;;  %v1229_v2 = vor.u32 %v1228_v59, %v1227_v33  ;;  %vm1230_vm11 = vcmp.lt.s32.totalorder %v4955_v24, 1  ;;  %v1246_v3 = vshll.u32 %v1206_v46, 8 }
 0x18b   :  { %v1157_v51 = vshll.u32 %v1156_v48, 30  ;;  %v1214_v41 = vshrl.u32 %v3999_v4, %v1213_v45  ;;  %vm1231_vm9 = vcmp.lt.s32.totalorder %v4955_v24, 2  ;;  %vm1233_vm10 = vcmp.lt.s32.totalorder %v4955_v24, 4 }
 0x18c   :  { %v1075_v62 = vsel %vm992_vm12, %v1074_v61, %v1073_v53  ;;  %vm1232_vm14 = vcmp.lt.s32.totalorder %v4955_v24, 3  ;;  %v1238_v63 = vsel %vm1230_vm11, %v1217_v6, %v1220_v7  ;;  %v1239_v13 = vsel %vm1233_vm10, %v1226_v11, 920167782 }
 0x18d   :  { %v1078_v46 = vsel %vm4921_vm13, %v4558_v55, %v1075_v62  ;;  %v4991_v36 = vsub.s32 %v1154_v35, %v1157_v51  ;;  %v1180_v45 = vsub.s32 4, %v1156_v48  ;;  %v1235_v40 = vsel %vm1233_vm10, %v1223_v0, 2102212464  ;;  %v5002_v35 = vpop.permute.xlu0 %134 }
 0x18e   :  { %3878 = vcosq.f32 %v1078_v46  ;;  %v1240_v54 = vsel %vm1232_vm14, %v1223_v0, %v1239_v13  ;;  %v1242_v50 = vsel %vm1230_vm11, %v1220_v7, %v1223_v0  ;;  %v1243_v57 = vsel %vm1233_vm10, %v1229_v2, 1326507024 }
 0x18f   :  { %3880 = vsinq.f32 %v1078_v46  ;;  %v1160_v37 = vsub.s32 0, %v4991_v36  ;;  %v1234_v17 = vsel %vm1230_vm11, %v1214_v41, %v1217_v6  ;;  %v1241_v58 = vsel %vm1231_vm9, %v1238_v63, %v1240_v54 }
 0x190   :  { %v1236_v23 = vsel %vm1232_vm14, %v1220_v7, %v1235_v40  ;;  %v1244_v27 = vsel %vm1232_vm14, %v1226_v11, %v1243_v57  ;;  %v5008_v52 = vmul.u32.u64.low %v1246_v3, %v1241_v58  ;;  %v5009_v53 = vmul.u32.u64.high %v1246_v3, %v1241_v58, %v5008_v52 }
 0x191   :  { %v1084_v33 = vand.u32 3, %v1083_v9  ;;  %v3615_v59 = vmin.u32 %v1160_v37, %v4991_v36  ;;  %v1181_v6 = vsel %vm1096_vm8, %v1180_v45, %v1156_v48  ;;  %v1245_v0 = vsel %vm1231_vm9, %v1242_v50, %v1244_v27 }
 0x192   :  { %v99_v61 = vmul.f32 %v4108_v30, %v4106_v29  ;;  %v5021_v7 = vmul.f32 %v4110_v31, %v4102_v28  ;;  %v5023_v11 = vmul.u32.u64.low %v1246_v3, %v1245_v0  ;;  %v5024_v2 = vmul.u32.u64.high %v1246_v3, %v1245_v0, %v5023_v11 }
 0x193   :  { %v5028_v9 = vadd.f32 %v5002_v35, %v4733_v43  ;;  %vm5032_vm12 = vcmp.le.f32.partialorder %v1094_v60, 0.7853982  ;;  %v1162_v51 = vclz %v3615_v59  ;;  %v1237_v41 = vsel %vm1231_vm9, %v1234_v17, %v1236_v23 }
 0x194   :  { %v1183_v28 = vsel %vm5032_vm12, 0, %v1181_v6  ;;  %v1256_v62 = vadd.s32 1, %v5009_v53  ;;  %v6770_v63 = vand.u32 2147483647, %v4880_v42  ;;  %v1305_v43 = vand.u32 2139095040, %v4880_v42 }
 0x195   :  { %vm1082_vm13 = vweird.f32 %v4558_v55  ;;  %vm1085_vm0 = vcmp.lt.s32.totalorder %v1084_v33, 2  ;;  %vm1086_vm15 = vcmp.eq.s32.totalorder %v1084_v33, 0  ;;  %v3616_v60 = vadd.s32 4294967294, %v1162_v51 }
 0x196   :  { %vm1089_vm2 = vcmp.eq.s32.totalorder %v1084_v33, 2  ;;  %v1253_v13 = vmul.u32 %v1246_v3, %v1237_v41  ;;  %vm1255_vm1 = vc.u32 %v5024_v2, %v5008_v52  ;;  %v1306_v24 = vshrl.u32 %v1305_v43, 23 }
 0x197   :  { %v1150_v46 = vadd.s32 %v4933_v49, %v4947_v1  ;;  %vm3617_vm3 = vcmp.lt.s32.totalorder %v3616_v60, 0  ;;  %v1187_v45 = vadd.s32 3, %v1183_v28  ;;  %v1257_v40 = vsel %vm1255_vm1, %v1256_v62, %v5009_v53 }
 0x198   :  { %v3879_v54 = vpop.eup %3878  ;;  %v1165_v50 = vsel %vm3617_vm3, 0, %v3616_v60  ;;  %v1258_v57 = vadd.s32 %v1257_v40, %v1253_v13  ;;  %v3622_v37 = vadd.s32 4294967169, %v1306_v24  ;;  %v1309_v17 = vand.u32 8388607, %v6770_v63 }
 0x199   :  { %v3881_v58 = vpop.eup %3880  ;;  %v1090_v3 = vxor.u32 2147483648, %v3879_v54  ;;  %v1166_v23 = vsub.s32 32, %v1165_v50  ;;  %v1170_v27 = vsub.s32 4294967266, %v1165_v50  ;;  %v1406_v59 = vand.u32 2147483647, %v5028_v9 }
 0x19a   :  { %v1087_v6 = vxor.u32 2147483648, %v3881_v58  ;;  %v1259_v0 = vadd.s32 536870912, %v1258_v57  ;;  %v1312_v49 = vadd.s32 1, %v3622_v37  ;;  %v1409_v1 = vand.u32 2139095040, %v5028_v9 }
 0x19b   :  { %v1091_v53 = vsel %vm1089_vm2, %v1090_v3, %v3881_v58  ;;  %v1167_v11 = vshll.u32 %v4991_v36, %v1165_v50  ;;  %v1168_v51 = vshrl.u32 %v1150_v46, %v1166_v23  ;;  %v1171_v41 = vadd.s32 127, %v1170_v27 }
 0x19c   :  { %v1088_v28 = vsel %vm1086_vm15, %v3879_v54, %v1087_v6  ;;  %v1260_v62 = vshrl.u32 %v1259_v0, 30  ;;  %v1310_v43 = vor.u32 8388608, %v1309_v17  ;;  %vm1313_vm4 = vcmp.gt.s32.totalorder %v1312_v49, 0 }
 0x19d   :  { %v1092_v60 = vsel %vm1085_vm0, %v1088_v28, %v1091_v53  ;;  %v1169_v13 = vor.u32 %v1168_v51, %v1167_v11  ;;  %v1172_v24 = vshll.u32 %v1171_v41, 23  ;;  %v1314_v40 = vsel %vm1313_vm4, %v1312_v49, 0 }
 0x19e   :  { %v1093_v37 = vsel %vm1082_vm13, nan, %v1092_v60  ;;  %v1261_v63 = vshll.u32 %v1260_v62, 30  ;;  %v1284_v16 = vsub.s32 4, %v1260_v62  ;;  %v1410_v58 = vshrl.u32 %v1409_v1, 23 }
 0x19f   :  { %v5060_v36 = vadd.f32 %v5002_v35, %v99_v61  ;;  %v1173_v46 = vor.u32 4788187, %v1172_v24  ;;  %vm1200_vm5 = vcmp.lt.s32.totalorder %v4815_v39, 0  ;;  %v1316_v54 = vand.u32 31, %v1314_v40  ;;  %1830 = vst [vmem:[#allocation2 + $0x40] sm:$0xff] %v1093_v37 }
 0x1a0   :  { %v5063_v50 = vand.u32 3, %v1187_v45  ;;  %v1254_v33 = vadd.s32 %v5008_v52, %v5024_v2  ;;  %v1262_v17 = vsub.s32 %v1258_v57, %v1261_v63  ;;  %v5067_v3 = vshll.u32 %v1310_v43, 8 }
 0x1a1   :  { %v1174_v55 = vand.u32 2147483647, %v1173_v46  ;;  %v1176_v23 = vcvt.s32.f32 %v1169_v13  ;;  %v1317_v27 = vsub.s32 32, %v1316_v54  ;;  %v5071_v61 = vand.u32 8388607, %v1406_v59 }
 0x1a2   :  { %v1264_v6 = vsub.s32 0, %v1262_v17  ;;  %v5075_v0 = vsel %vm1200_vm5, %v1284_v16, %v1260_v62  ;;  %v1315_v45 = vshrl.u32 %v1314_v40, 5  ;;  %v3626_v49 = vadd.s32 4294967169, %v1410_v58 }
 0x1a3   :  { %v1177_v1 = vmul.f32 %v1176_v23, %v1174_v55  ;;  %v1319_v52 = vshll.u32 %v3999_v4, %v1316_v54  ;;  %v1320_v2 = vshrl.u32 %v6774_v8, %v1317_v27  ;;  %v1323_v63 = vshrl.u32 %v4001_v10, %v1317_v27 }
 0x1a4   :  { %v3619_v57 = vmin.u32 %v1264_v6, %v1262_v17  ;;  %v1322_v53 = vshll.u32 %v6774_v8, %v1316_v54  ;;  %v1325_v11 = vshll.u32 %v4001_v10, %v1316_v54  ;;  %v1326_v51 = vshrl.u32 %v4002_v12, %v1317_v27 }
 0x1a5   :  { %v1178_v41 = vxor.u32 2147483648, %v1177_v1  ;;  %v1321_v28 = vor.u32 %v1320_v2, %v1319_v52  ;;  %v1328_v16 = vshll.u32 %v4002_v12, %v1316_v54  ;;  %v1329_v62 = vshrl.u32 %v4003_v14, %v1317_v27 }
 0x1a6   :  { %v1266_v43 = vclz %v3619_v57  ;;  %v1318_v60 = vshrl.u32 %v3999_v4, %v1317_v27  ;;  %vm1334_vm6 = vcmp.lt.s32.totalorder %v1315_v45, 1  ;;  %vm1335_vm7 = vcmp.lt.s32.totalorder %v1315_v45, 2 }
 0x1a7   :  { %v1179_v13 = vsel %vm1096_vm8, %v1178_v41, %v1177_v1  ;;  %v1324_v24 = vor.u32 %v1323_v63, %v1322_v53  ;;  %v1327_v40 = vor.u32 %v1326_v51, %v1325_v11  ;;  %v1330_v37 = vor.u32 %v1329_v62, %v1328_v16 }
 0x1a8   :  { %v1182_v58 = vsel %vm5032_vm12, %v4751_v15, %v1179_v13  ;;  %v3620_v46 = vadd.s32 4294967294, %v1266_v43  ;;  %v1331_v55 = vshll.u32 %v4003_v14, %v1316_v54  ;;  %v1332_v23 = vshrl.u32 %v6790_v44, %v1317_v27 }
 0x1a9   :  { %3882 = vcosq.f32 %v1182_v58  ;;  %vm1336_vm11 = vcmp.lt.s32.totalorder %v1315_v45, 3  ;;  %vm1337_vm9 = vcmp.lt.s32.totalorder %v1315_v45, 4  ;;  %v1338_v6 = vsel %vm1334_vm6, %v1318_v60, %v1321_v28 }
 0x1aa   :  { %3884 = vsinq.f32 %v1182_v58  ;;  %vm3621_vm10 = vcmp.lt.s32.totalorder %v3620_v46, 0  ;;  %v1333_v1 = vor.u32 %v1332_v23, %v1331_v55  ;;  %v1339_v52 = vsel %vm1337_vm9, %v1327_v40, 2102212464 }
 0x1ab   :  { %v1269_v2 = vsel %vm3621_vm10, 0, %v3620_v46  ;;  %v1340_v63 = vsel %vm1336_vm11, %v1324_v24, %v1339_v52  ;;  %v1342_v48 = vsel %vm1334_vm6, %v1321_v28, %v1324_v24  ;;  %v1343_v57 = vsel %vm1337_vm9, %v1330_v37, 920167782 }
 0x1ac   :  { %v1270_v54 = vsub.s32 32, %v1269_v2  ;;  %v1271_v53 = vshll.u32 %v1262_v17, %v1269_v2  ;;  %v1274_v27 = vsub.s32 4294967266, %v1269_v2  ;;  %v1346_v11 = vsel %vm1334_vm6, %v1324_v24, %v1327_v40 }
 0x1ad   :  { %v1341_v51 = vsel %vm1335_vm7, %v1338_v6, %v1340_v63  ;;  %v1344_v41 = vsel %vm1336_vm11, %v1327_v40, %v1343_v57  ;;  %v1347_v16 = vsel %vm1337_vm9, %v1333_v1, 1326507024  ;;  %v1416_v62 = vadd.s32 1, %v3626_v49 }
 0x1ae   :  { %v1272_v43 = vshrl.u32 %v1254_v33, %v1270_v54  ;;  %v1275_v60 = vadd.s32 127, %v1274_v27  ;;  %v1345_v13 = vsel %vm1335_vm7, %v1342_v48, %v1344_v41  ;;  %v1348_v28 = vsel %vm1336_vm11, %v1330_v37, %v1347_v16 }
 0x1af   :  { %v1349_v58 = vsel %vm1335_vm7, %v1346_v11, %v1348_v28  ;;  %v5106_v17 = vmul.u32.u64.low %v5067_v3, %v1345_v13  ;;  %v5107_v46 = vmul.u32.u64.high %v5067_v3, %v1345_v13, %v5106_v17  ;;  %vm1417_vm8 = vcmp.gt.s32.totalorder %v1416_v62, 0 }
 0x1b0   :  { %v1273_v24 = vor.u32 %v1272_v43, %v1271_v53  ;;  %v1276_v55 = vshll.u32 %v1275_v60, 23  ;;  %v5111_v40 = vmul.u32.u64.low %v5067_v3, %v1349_v58  ;;  %v5112_v23 = vmul.u32.u64.high %v5067_v3, %v1349_v58, %v5111_v40 }
 0x1b1   :  { %vm1186_vm14 = vweird.f32 %v4751_v15  ;;  %vm1189_vm12 = vcmp.lt.s32.totalorder %v5063_v50, 2  ;;  %v6798_v33 = vand.u32 2147483647, %v4815_v39  ;;  %v1418_v49 = vsel %vm1417_vm8, %v1416_v62, 0 }
 0x1b2   :  { %vm1190_vm0 = vcmp.eq.s32.totalorder %v5063_v50, 0  ;;  %v1277_v37 = vor.u32 4788187, %v1276_v55  ;;  %v1420_v1 = vand.u32 31, %v1418_v49  ;;  %vm1193_vm15 = vcmp.eq.s32.totalorder %v5063_v50, 2 }
 0x1b3   :  { %vm5118_vm13 = vcmp.le.f32.partialorder %v6798_v33, 0.7853982  ;;  %v3883_v52 = vpop.eup %3882  ;;  %v1357_v2 = vmul.u32 %v5067_v3, %v1341_v51  ;;  %v1360_v63 = vadd.s32 1, %v5107_v46  ;;  %v1414_v48 = vor.u32 8388608, %v5071_v61 }
 0x1b4   :  { %v1287_v6 = vsel %vm5118_vm13, 0, %v5075_v0  ;;  %v3885_v57 = vpop.eup %3884  ;;  %v1194_v54 = vxor.u32 2147483648, %v3883_v52  ;;  %v1278_v53 = vand.u32 2147483647, %v1277_v37  ;;  %v1280_v27 = vcvt.s32.f32 %v1273_v24 }
 0x1b5   :  { %vm1359_vm2 = vc.u32 %v5112_v23, %v5106_v17  ;;  %v1191_v11 = vxor.u32 2147483648, %v3885_v57  ;;  %v1291_v41 = vadd.s32 3, %v1287_v6  ;;  %v1421_v16 = vsub.s32 32, %v1420_v1  ;;  %v5147_v6 = vpop.permute.xlu1 %139 }
 0x1b6   :  { %v1361_v0 = vsel %vm1359_vm2, %v1360_v63, %v5107_v46  ;;  %v1195_v62 = vsel %vm1193_vm15, %v1194_v54, %v3885_v57  ;;  %v1281_v43 = vmul.f32 %v1280_v27, %v1278_v53  ;;  %v5133_v3 = vshrl.u32 %v1418_v49, 5 }
 0x1b7   :  { %v1362_v60 = vadd.s32 %v1361_v0, %v1357_v2  ;;  %v1192_v61 = vsel %vm1190_vm0, %v3883_v52, %v1191_v11  ;;  %v1423_v51 = vshll.u32 %v3999_v4, %v1420_v1  ;;  %v1424_v13 = vshrl.u32 %v6774_v8, %v1421_v16 }
 0x1b8   :  { %v1427_v28 = vshrl.u32 %v4001_v10, %v1421_v16  ;;  %v1196_v58 = vsel %vm1189_vm12, %v1192_v61, %v1195_v62  ;;  %v1282_v24 = vxor.u32 2147483648, %v1281_v43  ;;  %v1426_v55 = vshll.u32 %v6774_v8, %v1420_v1 }
 0x1b9   :  { %v1363_v46 = vadd.s32 536870912, %v1362_v60  ;;  %v1197_v40 = vsel %vm1186_vm14, nan, %v1196_v58  ;;  %v1425_v33 = vor.u32 %v1424_v13, %v1423_v51  ;;  %v1429_v49 = vshll.u32 %v4001_v10, %v1420_v1 }
 0x1ba   :  { %v1430_v37 = vshrl.u32 %v4002_v12, %v1421_v16  ;;  %v1283_v52 = vsel %vm1200_vm5, %v1282_v24, %v1281_v43  ;;  %v1432_v50 = vshll.u32 %v4002_v12, %v1420_v1  ;;  %v1433_v63 = vshrl.u32 %v4003_v14, %v1421_v16  ;;  %1831 = vst [vmem:[#allocation2 + $0x48] sm:$0xff] %v1197_v40 }
 0x1bb   :  { %v1364_v2 = vshrl.u32 %v1363_v46, 30  ;;  %v1286_v15 = vsel %vm5118_vm13, %v4815_v39, %v1283_v52  ;;  %v1428_v57 = vor.u32 %v1427_v28, %v1426_v55  ;;  %v1435_v54 = vshll.u32 %v4003_v14, %v1420_v1 }
 0x1bc   :  { %v1436_v53 = vshrl.u32 %v6790_v44, %v1421_v16  ;;  %3886 = vcosq.f32 %v1286_v15  ;;  %v1434_v11 = vor.u32 %v1433_v63, %v1432_v50  ;;  %v5160_v0 = vadd.f32 %v5147_v6, %v5021_v7 }
 0x1bd   :  { %v1365_v27 = vshll.u32 %v1364_v2, 30  ;;  %3888 = vsinq.f32 %v1286_v15  ;;  %v1431_v62 = vor.u32 %v1430_v37, %v1429_v49  ;;  %v1292_v61 = vand.u32 3, %v1291_v41 }
 0x1be   :  { %v1437_v43 = vor.u32 %v1436_v53, %v1435_v54  ;;  %vm1438_vm1 = vcmp.lt.s32.totalorder %v5133_v3, 1  ;;  %v1454_v45 = vshll.u32 %v1414_v48, 8  ;;  %v1422_v1 = vshrl.u32 %v3999_v4, %v1421_v16 }
 0x1bf   :  { %v5162_v51 = vsub.s32 %v1362_v60, %v1365_v27  ;;  %vm1441_vm3 = vcmp.lt.s32.totalorder %v5133_v3, 4  ;;  %v1446_v13 = vsel %vm1438_vm1, %v1425_v33, %v1428_v57  ;;  %v1513_v28 = vand.u32 2139095040, %v5060_v36 }
 0x1c0   :  { %vm1439_vm4 = vcmp.lt.s32.totalorder %v5133_v3, 2  ;;  %vm1440_vm5 = vcmp.lt.s32.totalorder %v5133_v3, 3  ;;  %v1447_v41 = vsel %vm1441_vm3, %v1434_v11, 920167782  ;;  %v1443_v60 = vsel %vm1441_vm3, %v1431_v62, 2102212464 }
 0x1c1   :  { %v1368_v7 = vsub.s32 0, %v5162_v51  ;;  %v1448_v48 = vsel %vm1440_vm5, %v1431_v62, %v1447_v41  ;;  %v1450_v16 = vsel %vm1438_vm1, %v1428_v57, %v1431_v62  ;;  %v1451_v58 = vsel %vm1441_vm3, %v1437_v43, 1326507024 }
 0x1c2   :  { %v1388_v46 = vsub.s32 4, %v1364_v2  ;;  %v1449_v55 = vsel %vm1439_vm4, %v1446_v13, %v1448_v48  ;;  %v1452_v40 = vsel %vm1440_vm5, %v1434_v11, %v1451_v58  ;;  %vm1290_vm6 = vweird.f32 %v4815_v39 }
 0x1c3   :  { %v3623_v24 = vmin.u32 %v1368_v7, %v5162_v51  ;;  %vm1304_vm7 = vcmp.lt.s32.totalorder %v4880_v42, 0  ;;  %v1453_v49 = vsel %vm1439_vm4, %v1450_v16, %v1452_v40  ;;  %v6801_v50 = vand.u32 2147483647, %v4880_v42 }
 0x1c4   :  { %v5186_v37 = vmul.u32.u64.low %v1454_v45, %v1449_v55  ;;  %v5187_v52 = vmul.u32.u64.high %v1454_v45, %v1449_v55, %v5186_v37  ;;  %v1442_v54 = vsel %vm1438_vm1, %v1422_v1, %v1425_v33  ;;  %v1444_v53 = vsel %vm1440_vm5, %v1428_v57, %v1443_v60 }
 0x1c5   :  { %vm5191_vm11 = vcmp.le.f32.partialorder %v6801_v50, 0.7853982  ;;  %v1370_v15 = vclz %v3623_v24  ;;  %vm1293_vm9 = vcmp.lt.s32.totalorder %v1292_v61, 2  ;;  %v1514_v62 = vshrl.u32 %v1513_v28, 23 }
 0x1c6   :  { %v5199_v27 = vmul.u32.u64.low %v1454_v45, %v1453_v49  ;;  %v5200_v11 = vmul.u32.u64.high %v1454_v45, %v1453_v49, %v5199_v27  ;;  %v3887_v43 = vpop.eup %3886  ;;  %vm1294_vm10 = vcmp.eq.s32.totalorder %v1292_v61, 0  ;;  %vm1297_vm8 = vcmp.eq.s32.totalorder %v1292_v61, 2 }
 0x1c7   :  { %v3624_v13 = vadd.s32 4294967294, %v1370_v15  ;;  %v1389_v7 = vsel %vm1304_vm7, %v1388_v46, %v1364_v2  ;;  %v3889_v41 = vpop.eup %3888  ;;  %v1298_v48 = vxor.u32 2147483648, %v3887_v43  ;;  %v1445_v33 = vsel %vm1439_vm4, %v1442_v54, %v1444_v53 }
 0x1c8   :  { %v1464_v1 = vadd.s32 1, %v5187_v52  ;;  %v3630_v57 = vadd.s32 4294967169, %v1514_v62  ;;  %v1295_v60 = vxor.u32 2147483648, %v3889_v41  ;;  %v1358_v16 = vadd.s32 %v5106_v17, %v5112_v23 }
 0x1c9   :  { %vm3625_vm14 = vcmp.lt.s32.totalorder %v3624_v13, 0  ;;  %v1510_v28 = vand.u32 2147483647, %v5060_v36  ;;  %v1299_v58 = vsel %vm1297_vm8, %v1298_v48, %v3889_v41  ;;  %v1391_v2 = vsel %vm5191_vm11, 0, %v1389_v7 }
 0x1ca   :  { %v1373_v24 = vsel %vm3625_vm14, 0, %v3624_v13  ;;  %vm1463_vm12 = vc.u32 %v5200_v11, %v5186_v37  ;;  %v1296_v3 = vsel %vm1294_vm10, %v3887_v43, %v1295_v60  ;;  %v1461_v40 = vmul.u32 %v1454_v45, %v1445_v33 }
 0x1cb   :  { %v1374_v46 = vsub.s32 32, %v1373_v24  ;;  %v1378_v55 = vsub.s32 4294967266, %v1373_v24  ;;  %v1300_v49 = vsel %vm1293_vm9, %v1296_v3, %v1299_v58  ;;  %v1375_v50 = vshll.u32 %v5162_v51, %v1373_v24 }
 0x1cc   :  { %v1465_v17 = vsel %vm1463_vm12, %v1464_v1, %v5187_v52  ;;  %v1520_v23 = vadd.s32 1, %v3630_v57  ;;  %v1301_v15 = vsel %vm1290_vm6, nan, %v1300_v49  ;;  %v1395_v62 = vadd.s32 3, %v1391_v2 }
 0x1cd   :  { %v1376_v54 = vshrl.u32 %v1358_v16, %v1374_v46  ;;  %v1379_v53 = vadd.s32 127, %v1378_v55  ;;  %v1466_v27 = vadd.s32 %v1465_v17, %v1461_v40  ;;  %v1517_v43 = vand.u32 8388607, %v1510_v28  ;;  %1832 = vst [vmem:[#allocation2 + $0x50] sm:$0xff] %v1301_v15 }
 0x1ce   :  { %vm1521_vm13 = vcmp.gt.s32.totalorder %v1520_v23, 0  ;;  %v101_v51 = vmul.f32 %v4110_v31, %v4106_v29  ;;  %v1617_v39 = vand.u32 2139095040, %v5160_v0  ;;  %v5229_v1 = vand.u32 3, %v1395_v62 }
 0x1cf   :  { %v1377_v45 = vor.u32 %v1376_v54, %v1375_v50  ;;  %v1380_v61 = vshll.u32 %v1379_v53, 23  ;;  %v1467_v13 = vadd.s32 536870912, %v1466_v27  ;;  %v1522_v7 = vsel %vm1521_vm13, %v1520_v23, 0 }
 0x1d0   :  { %v1524_v52 = vand.u32 31, %v1522_v7  ;;  %v5227_v33 = vadd.f32 %v5147_v6, %v101_v51  ;;  %v1518_v57 = vor.u32 8388608, %v1517_v43  ;;  %v5232_v24 = vadd.s32 %v5186_v37, %v5200_v11 }
 0x1d1   :  { %v1381_v41 = vor.u32 4788187, %v1380_v61  ;;  %v5224_v48 = vshrl.u32 %v1467_v13, 30  ;;  %v1384_v58 = vcvt.s32.f32 %v1377_v45  ;;  %v1618_v55 = vshrl.u32 %v1617_v39, 23 }
 0x1d2   :  { %v1525_v60 = vsub.s32 32, %v1524_v52  ;;  %v1527_v50 = vshll.u32 %v3999_v4, %v1524_v52  ;;  %v1523_v23 = vshrl.u32 %v1522_v7, 5  ;;  %v1530_v37 = vshll.u32 %v6774_v8, %v1524_v52 }
 0x1d3   :  { %v1382_v16 = vand.u32 2147483647, %v1381_v41  ;;  %v1469_v29 = vshll.u32 %v5224_v48, 30  ;;  %v1533_v11 = vshll.u32 %v4001_v10, %v1524_v52  ;;  %v5244_v15 = vshll.u32 %v1518_v57, 8 }
 0x1d4   :  { %v1528_v2 = vshrl.u32 %v6774_v8, %v1525_v60  ;;  %v1531_v3 = vshrl.u32 %v4001_v10, %v1525_v60  ;;  %v1534_v46 = vshrl.u32 %v4002_v12, %v1525_v60  ;;  %v1537_v17 = vshrl.u32 %v4003_v14, %v1525_v60 }
 0x1d5   :  { %v1385_v40 = vmul.f32 %v1384_v58, %v1382_v16  ;;  %v5238_v49 = vsub.s32 %v1466_v27, %v1469_v29  ;;  %v1536_v43 = vshll.u32 %v4002_v12, %v1524_v52  ;;  %vm1408_vm0 = vcmp.lt.s32.totalorder %v5028_v9, 0 }
 0x1d6   :  { %v1529_v62 = vor.u32 %v1528_v2, %v1527_v50  ;;  %v1532_v27 = vor.u32 %v1531_v3, %v1530_v37  ;;  %v1535_v45 = vor.u32 %v1534_v46, %v1533_v11  ;;  %v1539_v61 = vshll.u32 %v4003_v14, %v1524_v52 }
 0x1d7   :  { %v1386_v54 = vxor.u32 2147483648, %v1385_v40  ;;  %v1472_v53 = vsub.s32 0, %v5238_v49  ;;  %v1540_v13 = vshrl.u32 %v6790_v44, %v1525_v60  ;;  %v1538_v39 = vor.u32 %v1537_v17, %v1536_v43 }
 0x1d8   :  { %v3634_v41 = vadd.s32 4294967169, %v1618_v55  ;;  %v1492_v16 = vsub.s32 4, %v5224_v48  ;;  %v1526_v58 = vshrl.u32 %v3999_v4, %v1525_v60  ;;  %vm1542_vm15 = vcmp.lt.s32.totalorder %v1523_v23, 1 }
 0x1d9   :  { %v1387_v7 = vsel %vm1304_vm7, %v1386_v54, %v1385_v40  ;;  %v3627_v51 = vmin.u32 %v1472_v53, %v5238_v49  ;;  %v1541_v29 = vor.u32 %v1540_v13, %v1539_v61  ;;  %vm1545_vm2 = vcmp.lt.s32.totalorder %v1523_v23, 4 }
 0x1da   :  { %v1390_v57 = vsel %vm5191_vm11, %v4880_v42, %v1387_v7  ;;  %vm1543_vm1 = vcmp.lt.s32.totalorder %v1523_v23, 2  ;;  %v1547_v2 = vsel %vm1545_vm2, %v1535_v45, 2102212464  ;;  %v1550_v3 = vsel %vm1542_vm15, %v1529_v62, %v1532_v27 }
 0x1db   :  { %3890 = vcosq.f32 %v1390_v57  ;;  %v1474_v52 = vclz %v3627_v51  ;;  %vm1544_vm3 = vcmp.lt.s32.totalorder %v1523_v23, 3  ;;  %v1551_v55 = vsel %vm1545_vm2, %v1538_v39, 920167782 }
 0x1dc   :  { %3892 = vsinq.f32 %v1390_v57  ;;  %v1554_v40 = vsel %vm1542_vm15, %v1532_v27, %v1535_v45  ;;  %v1546_v50 = vsel %vm1542_vm15, %v1526_v58, %v1529_v62  ;;  %v1552_v63 = vsel %vm1544_vm3, %v1535_v45, %v1551_v55 }
 0x1dd   :  { %v3628_v46 = vadd.s32 4294967294, %v1474_v52  ;;  %v1555_v17 = vsel %vm1545_vm2, %v1541_v29, 1326507024  ;;  %v1624_v37 = vadd.s32 1, %v3634_v41  ;;  %v1548_v11 = vsel %vm1544_vm3, %v1532_v27, %v1547_v2 }
 0x1de   :  { %v1553_v60 = vsel %vm1543_vm1, %v1550_v3, %v1552_v63  ;;  %v1556_v54 = vsel %vm1544_vm3, %v1538_v39, %v1555_v17  ;;  %v1493_v62 = vsel %vm1408_vm0, %v1492_v16, %v5224_v48  ;;  %vm1394_vm6 = vweird.f32 %v4880_v42 }
 0x1df   :  { %vm3629_vm4 = vcmp.lt.s32.totalorder %v3628_v46, 0  ;;  %v1557_v43 = vsel %vm1543_vm1, %v1554_v40, %v1556_v54  ;;  %v5262_v61 = vmul.u32.u64.low %v5244_v15, %v1553_v60  ;;  %v5263_v13 = vmul.u32.u64.high %v5244_v15, %v1553_v60, %v5262_v61 }
 0x1e0   :  { %v1477_v53 = vsel %vm3629_vm4, 0, %v3628_v46  ;;  %vm1625_vm5 = vcmp.gt.s32.totalorder %v1624_v37, 0  ;;  %v1549_v27 = vsel %vm1543_vm1, %v1546_v50, %v1548_v11  ;;  %vm1397_vm7 = vcmp.lt.s32.totalorder %v5229_v1, 2 }
 0x1e1   :  { %v1478_v7 = vsub.s32 32, %v1477_v53  ;;  %v1482_v51 = vsub.s32 4294967266, %v1477_v53  ;;  %v5272_v45 = vmul.u32.u64.low %v5244_v15, %v1557_v43  ;;  %v5273_v39 = vmul.u32.u64.high %v5244_v15, %v1557_v43, %v5272_v45 }
 0x1e2   :  { %v1626_v41 = vsel %vm1625_vm5, %v1624_v37, 0  ;;  %v1479_v57 = vshll.u32 %v5238_v49, %v1477_v53  ;;  %vm5280_vm11 = vcmp.le.f32.partialorder %v1406_v59, 0.7853982  ;;  %v1568_v23 = vadd.s32 1, %v5263_v13 }
 0x1e3   :  { %v1480_v58 = vshrl.u32 %v5232_v24, %v1478_v7  ;;  %v1483_v29 = vadd.s32 127, %v1482_v51  ;;  %v1628_v52 = vand.u32 31, %v1626_v41  ;;  %v1614_v16 = vand.u32 2147483647, %v5160_v0 }
 0x1e4   :  { %vm1398_vm9 = vcmp.eq.s32.totalorder %v5229_v1, 0  ;;  %v1495_v24 = vsel %vm5280_vm11, 0, %v1493_v62  ;;  %v1565_v40 = vmul.u32 %v5244_v15, %v1549_v27  ;;  %vm1567_vm10 = vc.u32 %v5273_v39, %v5262_v61 }
 0x1e5   :  { %v3891_v2 = vpop.eup %3890  ;;  %v1481_v49 = vor.u32 %v1480_v58, %v1479_v57  ;;  %v1484_v3 = vshll.u32 %v1483_v29, 23  ;;  %v1629_v59 = vsub.s32 32, %v1628_v52  ;;  %vm1401_vm8 = vcmp.eq.s32.totalorder %v5229_v1, 2 }
 0x1e6   :  { %v3893_v46 = vpop.eup %3892  ;;  %v1402_v55 = vxor.u32 2147483648, %v3891_v2  ;;  %v1569_v17 = vsel %vm1567_vm10, %v1568_v23, %v5263_v13  ;;  %v1499_v11 = vadd.s32 3, %v1495_v24  ;;  %v1621_v54 = vand.u32 8388607, %v1614_v16 }
 0x1e7   :  { %v1399_v50 = vxor.u32 2147483648, %v3893_v46  ;;  %v1485_v63 = vor.u32 4788187, %v1484_v3  ;;  %v1570_v60 = vadd.s32 %v1569_v17, %v1565_v40  ;;  %v1488_v43 = vcvt.s32.f32 %v1481_v49 }
 0x1e8   :  { %v1403_v37 = vsel %vm1401_vm8, %v1402_v55, %v3893_v46  ;;  %v1627_v7 = vshrl.u32 %v1626_v41, 5  ;;  %v1632_v27 = vshrl.u32 %v6774_v8, %v1629_v59  ;;  %v1635_v13 = vshrl.u32 %v4001_v10, %v1629_v59 }
 0x1e9   :  { %v1400_v53 = vsel %vm1398_vm9, %v3891_v2, %v1399_v50  ;;  %v1486_v15 = vand.u32 2147483647, %v1485_v63  ;;  %v1571_v62 = vadd.s32 536870912, %v1570_v60  ;;  %v1631_v58 = vshll.u32 %v3999_v4, %v1628_v52 }
 0x1ea   :  { %v1404_v51 = vsel %vm1397_vm7, %v1400_v53, %v1403_v37  ;;  %v1638_v29 = vshrl.u32 %v4002_v12, %v1629_v59  ;;  %v1634_v41 = vshll.u32 %v6774_v8, %v1628_v52  ;;  %v1637_v1 = vshll.u32 %v4001_v10, %v1628_v52 }
 0x1eb   :  { %v1405_v45 = vsel %vm1394_vm6, nan, %v1404_v51  ;;  %v1489_v57 = vmul.f32 %v1488_v43, %v1486_v15  ;;  %v5306_v23 = vshrl.u32 %v1571_v62, 30  ;;  %v1641_v2 = vshrl.u32 %v4003_v14, %v1629_v59 }
 0x1ec   :  { %1833 = vst [vmem:[#allocation2 + $0x58] sm:$0xff] %v1405_v45  ;;  %v1640_v3 = vshll.u32 %v4002_v12, %v1628_v52  ;;  %v1643_v42 = vshll.u32 %v4003_v14, %v1628_v52  ;;  %v1644_v24 = vshrl.u32 %v6790_v44, %v1629_v59  ;;  %v1622_v55 = vor.u32 8388608, %v1621_v54 }
 0x1ed   :  { %v1490_v49 = vxor.u32 2147483648, %v1489_v57  ;;  %v1573_v46 = vshll.u32 %v5306_v23, 30  ;;  %v1633_v40 = vor.u32 %v1632_v27, %v1631_v58  ;;  %v1636_v50 = vor.u32 %v1635_v13, %v1634_v41 }
 0x1ee   :  { %v1639_v17 = vor.u32 %v1638_v29, %v1637_v1  ;;  %v1642_v37 = vor.u32 %v1641_v2, %v1640_v3  ;;  %v1645_v53 = vor.u32 %v1644_v24, %v1643_v42  ;;  %v5320_v43 = vand.u32 3, %v1499_v11 }
 0x1ef   :  { %v1491_v63 = vsel %vm1408_vm0, %v1490_v49, %v1489_v57  ;;  %v1574_v52 = vsub.s32 %v1570_v60, %v1573_v46  ;;  %v1721_v51 = vand.u32 2139095040, %v5227_v33  ;;  %v1630_v54 = vshrl.u32 %v3999_v4, %v1629_v59 }
 0x1f0   :  { %v1494_v15 = vsel %vm5280_vm11, %v5028_v9, %v1491_v63  ;;  %vm1646_vm14 = vcmp.lt.s32.totalorder %v1627_v7, 1  ;;  %vm1648_vm12 = vcmp.lt.s32.totalorder %v1627_v7, 3  ;;  %vm1649_vm13 = vcmp.lt.s32.totalorder %v1627_v7, 4 }
 0x1f1   :  { %3894 = vcosq.f32 %v1494_v15  ;;  %v1576_v62 = vsub.s32 0, %v1574_v52  ;;  %v1654_v27 = vsel %vm1646_vm14, %v1633_v40, %v1636_v50  ;;  %v1651_v13 = vsel %vm1649_vm13, %v1639_v17, 2102212464 }
 0x1f2   :  { %3896 = vsinq.f32 %v1494_v15  ;;  %v1655_v45 = vsel %vm1649_vm13, %v1642_v37, 920167782  ;;  %v1658_v48 = vsel %vm1646_vm14, %v1636_v50, %v1639_v17  ;;  %v1659_v57 = vsel %vm1649_vm13, %v1645_v53, 1326507024 }
 0x1f3   :  { %v3631_v11 = vmin.u32 %v1576_v62, %v1574_v52  ;;  %vm1647_vm0 = vcmp.lt.s32.totalorder %v1627_v7, 2  ;;  %v1656_v60 = vsel %vm1648_vm12, %v1639_v17, %v1655_v45  ;;  %v1660_v58 = vsel %vm1648_vm12, %v1642_v37, %v1659_v57 }
 0x1f4   :  { %v1657_v59 = vsel %vm1647_vm0, %v1654_v27, %v1656_v60  ;;  %v1661_v29 = vsel %vm1647_vm0, %v1658_v48, %v1660_v58  ;;  %v1662_v41 = vshll.u32 %v1622_v55, 8  ;;  %v1722_v1 = vshrl.u32 %v1721_v51, 23 }
 0x1f5   :  { %v1578_v2 = vclz %v3631_v11  ;;  %v1650_v49 = vsel %vm1646_vm14, %v1630_v54, %v1633_v40  ;;  %v1652_v3 = vsel %vm1648_vm12, %v1636_v50, %v1651_v13  ;;  %vm1498_vm15 = vweird.f32 %v5028_v9 }
 0x1f6   :  { %v5332_v42 = vmul.u32.u64.low %v1662_v41, %v1661_v29  ;;  %v5333_v24 = vmul.u32.u64.high %v1662_v41, %v1661_v29, %v5332_v42  ;;  %v5335_v46 = vmul.u32.u64.low %v1662_v41, %v1657_v59  ;;  %v5336_v63 = vmul.u32.u64.high %v1662_v41, %v1657_v59, %v5335_v46 }
 0x1f7   :  { %v3632_v17 = vadd.s32 4294967294, %v1578_v2  ;;  %v3638_v37 = vadd.s32 4294967169, %v1722_v1  ;;  %vm1502_vm2 = vcmp.eq.s32.totalorder %v5320_v43, 0  ;;  %v1653_v55 = vsel %vm1647_vm0, %v1650_v49, %v1652_v3 }
 0x1f8   :  { %vm1505_vm1 = vcmp.eq.s32.totalorder %v5320_v43, 2  ;;  %v1566_v40 = vadd.s32 %v5262_v61, %v5273_v39  ;;  %v1596_v51 = vsub.s32 4, %v5306_v23  ;;  %vm1671_vm4 = vc.u32 %v5333_v24, %v5335_v46 }
 0x1f9   :  { %vm3633_vm3 = vcmp.lt.s32.totalorder %v3632_v17, 0  ;;  %v1728_v50 = vadd.s32 1, %v3638_v37  ;;  %v1672_v54 = vadd.s32 1, %v5336_v63  ;;  %v1669_v45 = vmul.u32 %v1662_v41, %v1653_v55 }
 0x1fa   :  { %v1581_v15 = vsel %vm3633_vm3, 0, %v3632_v17  ;;  %vm1501_vm6 = vcmp.lt.s32.totalorder %v5320_v43, 2  ;;  %v1718_v29 = vand.u32 2147483647, %v5227_v33  ;;  %vm1512_vm7 = vcmp.lt.s32.totalorder %v5060_v36, 0 }
 0x1fb   :  { %v3895_v53 = vpop.eup %3894  ;;  %v1582_v7 = vsub.s32 32, %v1581_v15  ;;  %v1586_v13 = vsub.s32 4294967266, %v1581_v15  ;;  %v1583_v57 = vshll.u32 %v1574_v52, %v1581_v15  ;;  %v1673_v61 = vsel %vm1671_vm4, %v1672_v54, %v5336_v63 }
 0x1fc   :  { %v3897_v62 = vpop.eup %3896  ;;  %v1506_v27 = vxor.u32 2147483648, %v3895_v53  ;;  %vm1729_vm5 = vcmp.gt.s32.totalorder %v1728_v50, 0  ;;  %v1674_v58 = vadd.s32 %v1673_v61, %v1669_v45  ;;  %v1597_v17 = vsel %vm1512_vm7, %v1596_v51, %v5306_v23 }
 0x1fd   :  { %v1503_v48 = vxor.u32 2147483648, %v3897_v62  ;;  %v1584_v11 = vshrl.u32 %v1566_v40, %v1582_v7  ;;  %v1587_v60 = vadd.s32 127, %v1586_v13  ;;  %v1730_v1 = vsel %vm1729_vm5, %v1728_v50, 0 }
 0x1fe   :  { %v1507_v39 = vsel %vm1505_vm1, %v1506_v27, %v3897_v62  ;;  %v1675_v49 = vadd.s32 536870912, %v1674_v58  ;;  %v1732_v42 = vand.u32 31, %v1730_v1  ;;  %v1725_v37 = vand.u32 8388607, %v1718_v29 }
 0x1ff   :  { %v1504_v59 = vsel %vm1502_vm2, %v3895_v53, %v1503_v48  ;;  %v1585_v2 = vor.u32 %v1584_v11, %v1583_v57  ;;  %v1588_v52 = vshll.u32 %v1587_v60, 23  ;;  %vm5368_vm11 = vcmp.le.f32.partialorder %v1510_v28, 0.7853982 }
 0x200   :  { %v1508_v41 = vsel %vm1501_vm6, %v1504_v59, %v1507_v39  ;;  %v5362_v43 = vshrl.u32 %v1675_v49, 30  ;;  %v1733_v55 = vsub.s32 32, %v1732_v42  ;;  %v1599_v23 = vsel %vm5368_vm11, 0, %v1597_v17 }
 0x201   :  { %v1509_v3 = vsel %vm1498_vm15, nan, %v1508_v41  ;;  %v1589_v63 = vor.u32 4788187, %v1588_v52  ;;  %v1592_v50 = vcvt.s32.f32 %v1585_v2  ;;  %v1735_v28 = vshll.u32 %v3999_v4, %v1732_v42 }
 0x202   :  { %1834 = vst [vmem:[#allocation2 + $0x60] sm:$0xff] %v1509_v3  ;;  %v1677_v53 = vshll.u32 %v5362_v43, 30  ;;  %v1736_v15 = vshrl.u32 %v6774_v8, %v1733_v55  ;;  %v1739_v51 = vshrl.u32 %v4001_v10, %v1733_v55  ;;  %v1742_v54 = vshrl.u32 %v4002_v12, %v1733_v55 }
 0x203   :  { %v1590_v40 = vand.u32 2147483647, %v1589_v63  ;;  %v1745_v7 = vshrl.u32 %v4003_v14, %v1733_v55  ;;  %v1726_v13 = vor.u32 8388608, %v1725_v37  ;;  %v1731_v45 = vshrl.u32 %v1730_v1, 5 }
 0x204   :  { %v5378_v27 = vsub.s32 %v1674_v58, %v1677_v53  ;;  %v1738_v48 = vshll.u32 %v6774_v8, %v1732_v42  ;;  %v1741_v57 = vshll.u32 %v4001_v10, %v1732_v42  ;;  %v1737_v11 = vor.u32 %v1736_v15, %v1735_v28 }
 0x205   :  { %v1593_v62 = vmul.f32 %v1592_v50, %v1590_v40  ;;  %v1744_v60 = vshll.u32 %v4002_v12, %v1732_v42  ;;  %v1747_v58 = vshll.u32 %v4003_v14, %v1732_v42  ;;  %v1748_v2 = vshrl.u32 %v6790_v44, %v1733_v55 }
 0x206   :  { %v1680_v39 = vsub.s32 0, %v5378_v27  ;;  %v1740_v59 = vor.u32 %v1739_v51, %v1738_v48  ;;  %v1743_v41 = vor.u32 %v1742_v54, %v1741_v57  ;;  %v1603_v63 = vadd.s32 3, %v1599_v23 }
 0x207   :  { %v1594_v61 = vxor.u32 2147483648, %v1593_v62  ;;  %v1746_v49 = vor.u32 %v1745_v7, %v1744_v60  ;;  %v1749_v17 = vor.u32 %v1748_v2, %v1747_v58  ;;  %v1766_v37 = vshll.u32 %v1726_v13, 8 }
 0x208   :  { %v3635_v1 = vmin.u32 %v1680_v39, %v5378_v27  ;;  %vm1750_vm9 = vcmp.lt.s32.totalorder %v1731_v45, 1  ;;  %vm1753_vm10 = vcmp.lt.s32.totalorder %v1731_v45, 4  ;;  %v1734_v42 = vshrl.u32 %v3999_v4, %v1733_v55 }
 0x209   :  { %v1595_v52 = vsel %vm1512_vm7, %v1594_v61, %v1593_v62  ;;  %v1755_v50 = vsel %vm1753_vm10, %v1743_v41, 2102212464  ;;  %v1758_v53 = vsel %vm1750_vm9, %v1737_v11, %v1740_v59  ;;  %vm1752_vm8 = vcmp.lt.s32.totalorder %v1731_v45, 3 }
 0x20a   :  { %v1598_v3 = vsel %vm5368_vm11, %v5060_v36, %v1595_v52  ;;  %v1682_v40 = vclz %v3635_v1  ;;  %v1759_v51 = vsel %vm1753_vm10, %v1746_v49, 920167782  ;;  %v1762_v54 = vsel %vm1750_vm9, %v1740_v59, %v1743_v41 }
 0x20b   :  { %3898 = vcosq.f32 %v1598_v3  ;;  %vm1751_vm14 = vcmp.lt.s32.totalorder %v1731_v45, 2  ;;  %v1754_v62 = vsel %vm1750_vm9, %v1734_v42, %v1737_v11  ;;  %v1760_v9 = vsel %vm1752_vm8, %v1743_v41, %v1759_v51 }
 0x20c   :  { %3900 = vsinq.f32 %v1598_v3  ;;  %v3636_v15 = vadd.s32 4294967294, %v1682_v40  ;;  %v1763_v28 = vsel %vm1753_vm10, %v1749_v17, 1326507024  ;;  %v1756_v23 = vsel %vm1752_vm8, %v1740_v59, %v1755_v50  ;;  %v1838_v59 = vld [vmem:[%s6761_s1] sm:$0x3]  ;;  %s4005_s1 = smov [#allocation2]  }
 0x20d   :  { %v1761_v7 = vsel %vm1751_vm14, %v1758_v53, %v1760_v9  ;;  %v1764_v13 = vsel %vm1752_vm8, %v1746_v49, %v1763_v28  ;;  %v1604_v39 = vand.u32 3, %v1603_v63  ;;  %v1670_v60 = vadd.s32 %v5335_v46, %v5333_v24  ;;  %s3567_s22 = sshll.u32 %s4005_s1, 4  ;;  %s3568_s22 = int_to_ptr.vmem [resolvable:$true] %s3567_s22 }
 0x20e   :  { %vm3637_vm12 = vcmp.lt.s32.totalorder %v3636_v15, 0  ;;  %v1765_v57 = vsel %vm1751_vm14, %v1762_v54, %v1764_v13  ;;  %v5397_v61 = vmul.u32.u64.low %v1766_v37, %v1761_v7  ;;  %v5398_v55 = vmul.u32.u64.high %v1766_v37, %v1761_v7, %v5397_v61  ;;  %s3974_s23 = scalar_lea.vmem %s3568_s22, 4096  ;;  %p3979_p1 = scmp.lt.s32.totalorder %s3568_s22, %s3568_s22 }
 0x20f   :  { %v1685_v48 = vsel %vm3637_vm12, 0, %v3636_v15  ;;  %v5406_v41 = vmul.u32.u64.low %v1766_v37, %v1765_v57  ;;  %v5407_v2 = vmul.u32.u64.high %v1766_v37, %v1765_v57, %v5406_v41  ;;  %v1757_v3 = vsel %vm1751_vm14, %v1754_v62, %v1756_v23  ;;  %p3975_p0 = scmp.ne.s32.totalorder %s3568_s22, %s3974_s23  ;;  %p3980_p2 = scmp.lt.s32.totalorder %s3974_s23, %s3974_s23 }
 0x210   :  { %v1686_v58 = vsub.s32 32, %v1685_v48  ;;  %v1690_v11 = vsub.s32 4294967266, %v1685_v48  ;;  %v1687_v52 = vshll.u32 %v5378_v27, %v1685_v48  ;;  %vm1602_vm13 = vweird.f32 %v5060_v36 }
 0x211   :  { %v1776_v63 = vadd.s32 1, %v5398_v55  ;;  %v6808_v24 = vsub.s32 0, %v4085_v20  ;;  %vm1605_vm0 = vcmp.lt.s32.totalorder %v1604_v39, 2  ;;  %vm1616_vm15 = vcmp.lt.s32.totalorder %v5160_v0, 0  ;;  %p3981_p3 = por %p3980_p2, %p3979_p1 }
 0x212   :  { %v1688_v1 = vshrl.u32 %v1670_v60, %v1686_v58  ;;  %v1691_v49 = vadd.s32 127, %v1690_v11  ;;  %v1700_v53 = vsub.s32 4, %v5362_v43  ;;  %v1773_v45 = vmul.u32 %v1766_v37, %v1757_v3 }
 0x213   :  { %v5415_v46 = vrot.slane %v1838_v59, %v6808_v24  ;;  %vm1775_vm2 = vc.u32 %v5407_v2, %v5397_v61  ;;  %vm1609_vm1 = vcmp.eq.s32.totalorder %v1604_v39, 2  ;;  %vm1606_vm3 = vcmp.eq.s32.totalorder %v1604_v39, 0  ;;  %p3982_p4 = pnand %p3981_p3, %p3975_p0 }
 0x214   :  { %v1689_v40 = vor.u32 %v1688_v1, %v1687_v52  ;;  %v1692_v42 = vshll.u32 %v1691_v49, 23  ;;  %v1777_v54 = vsel %vm1775_vm2, %v1776_v63, %v5398_v55  ;;  %v6809_v48 = vsub.s32 1, %v4085_v20 }
 0x215   :  { %v3899_v17 = vpop.eup %3898  ;;  %v1778_v9 = vadd.s32 %v1777_v54, %v1773_v45  ;;  %v1850_v28 = vmul.f32 %v5415_v46, %v4083_v19  ;;  %v1701_v60 = vsel %vm1616_vm15, %v1700_v53, %v5362_v43  ;;  %vm1615_vm4 = vcmp.le.f32.partialorder %v1614_v16, 0.7853982 }
 0x216   :  { %v3901_v50 = vpop.eup %3900  ;;  %v1610_v27 = vxor.u32 2147483648, %v3899_v17  ;;  %v1693_v51 = vor.u32 4788187, %v1692_v42  ;;  %v1696_v13 = vcvt.s32.f32 %v1689_v40  ;;  %v5426_v37 = vrot.slane %v1838_v59, %v6809_v48 }
 0x217   :  { %v1607_v15 = vxor.u32 2147483648, %v3901_v50  ;;  %v1779_v55 = vadd.s32 536870912, %v1778_v9  ;;  %v5433_v58 = vadd.f32 %v1850_v28, %v4116_v34  ;;  %v1703_v39 = vsel %vm1615_vm4, 0, %v1701_v60 }
 0x218   :  { %v1611_v62 = vsel %vm1609_vm1, %v1610_v27, %v3901_v50  ;;  %v1694_v7 = vand.u32 2147483647, %v1693_v51  ;;  %v1851_v52 = vmul.f32 %v5426_v37, %v4083_v19  ;;  %v1707_v24 = vadd.s32 3, %v1703_v39 }
 0x219   :  { %v1608_v23 = vsel %vm1606_vm3, %v3899_v17, %v1607_v15  ;;  %v1780_v20 = vshrl.u32 %v1779_v55, 30  ;;  %v6773_v43 = vand.u32 2147483647, %v5433_v58  ;;  %v1885_v63 = vand.u32 2139095040, %v5433_v58 }
 0x21a   :  { %v1612_v57 = vsel %vm1605_vm0, %v1608_v23, %v1611_v62  ;;  %v1697_v41 = vmul.f32 %v1696_v13, %v1694_v7  ;;  %v5445_v36 = vadd.f32 %v1851_v52, %v4116_v34  ;;  %vm1720_vm5 = vcmp.lt.s32.totalorder %v5227_v33, 0 }
 0x21b   :  { %v1613_v11 = vsel %vm1602_vm13, nan, %v1612_v57  ;;  %v1781_v1 = vshll.u32 %v1780_v20, 30  ;;  %v1804_v3 = vsub.s32 4, %v1780_v20  ;;  %v1886_v40 = vshrl.u32 %v1885_v63, 23 }
 0x21c   :  { %1835 = vst [vmem:[#allocation2 + $0x68] sm:$0xff] %v1613_v11  ;;  %v1698_v59 = vxor.u32 2147483648, %v1697_v41  ;;  %v1889_v42 = vand.u32 8388607, %v6773_v43  ;;  %v1852_v34 = vmul.f32 %v5415_v46, %v4089_v22  ;;  %v1989_v53 = vand.u32 2139095040, %v5445_v36 }
 0x21d   :  { %v1782_v17 = vsub.s32 %v1778_v9, %v1781_v1  ;;  %v1805_v50 = vsel %vm1720_vm5, %v1804_v3, %v1780_v20  ;;  %v3642_v27 = vadd.s32 4294967169, %v1886_v40  ;;  %v1708_v45 = vand.u32 3, %v1707_v24 }
 0x21e   :  { %v1699_v49 = vsel %vm1616_vm15, %v1698_v59, %v1697_v41  ;;  %vm5459_vm6 = vcmp.le.f32.partialorder %v1718_v29, 0.7853982  ;;  %v5464_v54 = vadd.f32 %v1852_v34, %v4125_v38  ;;  %v1990_v9 = vshrl.u32 %v1989_v53, 23 }
 0x21f   :  { %v1702_v16 = vsel %vm1615_vm4, %v5160_v0, %v1699_v49  ;;  %v1784_v19 = vsub.s32 0, %v1782_v17  ;;  %v1892_v62 = vadd.s32 1, %v3642_v27  ;;  %v1807_v23 = vsel %vm5459_vm6, 0, %v1805_v50 }
 0x220   :  { %3902 = vcosq.f32 %v1702_v16  ;;  %v1890_v7 = vor.u32 8388608, %v1889_v42  ;;  %v6772_v13 = vand.u32 2147483647, %v5445_v36  ;;  %v5471_v48 = vmul.f32 %v5426_v37, %v4089_v22 }
 0x221   :  { %3904 = vsinq.f32 %v1702_v16  ;;  %v3639_v15 = vmin.u32 %v1784_v19, %v1782_v17  ;;  %v5475_v29 = vmul.f32 %v5415_v46, %v4081_v18  ;;  %vm1893_vm7 = vcmp.gt.s32.totalorder %v1892_v62, 0 }
 0x222   :  { %v3646_v57 = vadd.s32 4294967169, %v1990_v9  ;;  %vm1706_vm11 = vweird.f32 %v5160_v0  ;;  %vm1709_vm9 = vcmp.lt.s32.totalorder %v1708_v45, 2  ;;  %vm1710_vm10 = vcmp.eq.s32.totalorder %v1708_v45, 0 }
 0x223   :  { %v1786_v28 = vclz %v3639_v15  ;;  %v1894_v55 = vsel %vm1893_vm7, %v1892_v62, 0  ;;  %vm1713_vm8 = vcmp.eq.s32.totalorder %v1708_v45, 2  ;;  %v1774_v11 = vadd.s32 %v5397_v61, %v5407_v2 }
 0x224   :  { %v5480_v41 = vadd.s32 3, %v1807_v23  ;;  %v1896_v22 = vand.u32 31, %v1894_v55  ;;  %v5482_v20 = vshll.u32 %v1890_v7, 8  ;;  %v5486_v59 = vand.u32 8388607, %v6772_v13 }
 0x225   :  { %v3640_v60 = vadd.s32 4294967294, %v1786_v28  ;;  %v2093_v39 = vand.u32 2139095040, %v5464_v54  ;;  %v5489_v49 = vshrl.u32 %v1894_v55, 5  ;;  %v1996_v63 = vadd.s32 1, %v3646_v57 }
 0x226   :  { %v1897_v3 = vsub.s32 32, %v1896_v22  ;;  %v1899_v40 = vshll.u32 %v3999_v4, %v1896_v22  ;;  %v1902_v50 = vshll.u32 %v6774_v8, %v1896_v22  ;;  %v1905_v23 = vshll.u32 %v4001_v10, %v1896_v22 }
 0x227   :  { %vm3641_vm14 = vcmp.lt.s32.totalorder %v3640_v60, 0  ;;  %vm1914_vm12 = vcmp.lt.s32.totalorder %v5489_v49, 1  ;;  %vm1917_vm13 = vcmp.lt.s32.totalorder %v5489_v49, 4  ;;  %vm1915_vm0 = vcmp.lt.s32.totalorder %v5489_v49, 2 }
 0x228   :  { %v1789_v1 = vsel %vm3641_vm14, 0, %v3640_v60  ;;  %v1900_v42 = vshrl.u32 %v6774_v8, %v1897_v3  ;;  %v1903_v34 = vshrl.u32 %v4001_v10, %v1897_v3  ;;  %v1906_v7 = vshrl.u32 %v4002_v12, %v1897_v3 }
 0x229   :  { %v1790_v2 = vsub.s32 32, %v1789_v1  ;;  %v1794_v24 = vsub.s32 4294967266, %v1789_v1  ;;  %v1791_v53 = vshll.u32 %v1782_v17, %v1789_v1  ;;  %v1908_v17 = vshll.u32 %v4002_v12, %v1896_v22 }
 0x22a   :  { %v3903_v52 = vpop.eup %3902  ;;  %v1901_v28 = vor.u32 %v1900_v42, %v1899_v40  ;;  %v1904_v13 = vor.u32 %v1903_v34, %v1902_v50  ;;  %v1907_v8 = vor.u32 %v1906_v7, %v1905_v23  ;;  %v1912_v45 = vshrl.u32 %v6790_v44, %v1897_v3 }
 0x22b   :  { %v3905_v16 = vpop.eup %3904  ;;  %v1714_v61 = vxor.u32 2147483648, %v3903_v52  ;;  %v1792_v15 = vshrl.u32 %v1774_v11, %v1790_v2  ;;  %v1795_v62 = vadd.s32 127, %v1794_v24  ;;  %v1909_v11 = vshrl.u32 %v4003_v14, %v1897_v3 }
 0x22c   :  { %v1711_v19 = vxor.u32 2147483648, %v3905_v16  ;;  %v1919_v40 = vsel %vm1917_vm13, %v1907_v8, 2102212464  ;;  %vm1916_vm15 = vcmp.lt.s32.totalorder %v5489_v49, 3  ;;  %v1926_v42 = vsel %vm1914_vm12, %v1904_v13, %v1907_v8 }
 0x22d   :  { %v1715_v27 = vsel %vm1713_vm8, %v1714_v61, %v3905_v16  ;;  %v1793_v60 = vor.u32 %v1792_v15, %v1791_v53  ;;  %v1796_v55 = vshll.u32 %v1795_v62, 23  ;;  %v1911_v16 = vshll.u32 %v4003_v14, %v1896_v22 }
 0x22e   :  { %v1712_v9 = vsel %vm1710_vm10, %v3903_v52, %v1711_v19  ;;  %v1898_v52 = vshrl.u32 %v3999_v4, %v1897_v3  ;;  %v1910_v2 = vor.u32 %v1909_v11, %v1908_v17  ;;  %vm1997_vm2 = vcmp.gt.s32.totalorder %v1996_v63, 0 }
 0x22f   :  { %v1716_v57 = vsel %vm1709_vm9, %v1712_v9, %v1715_v27  ;;  %v1797_v1 = vor.u32 4788187, %v1796_v55  ;;  %v1800_v61 = vcvt.s32.f32 %v1793_v60  ;;  %v1913_v24 = vor.u32 %v1912_v45, %v1911_v16 }
 0x230   :  { %v1717_v43 = vsel %vm1706_vm11, nan, %v1716_v57  ;;  %v1923_v19 = vsel %vm1917_vm13, %v1910_v2, 920167782  ;;  %v1918_v22 = vsel %vm1914_vm12, %v1898_v52, %v1901_v28  ;;  %v1920_v27 = vsel %vm1916_vm15, %v1904_v13, %v1919_v40 }
 0x231   :  { %1836 = vst [vmem:[#allocation2 + $0x70] sm:$0xff] %v1717_v43  ;;  %v1798_v0 = vand.u32 2147483647, %v1797_v1  ;;  %v1922_v43 = vsel %vm1914_vm12, %v1901_v28, %v1904_v13  ;;  %v1924_v34 = vsel %vm1916_vm15, %v1907_v8, %v1923_v19  ;;  %v1927_v3 = vsel %vm1917_vm13, %v1913_v24, 1326507024 }
 0x232   :  { %v1925_v53 = vsel %vm1915_vm0, %v1922_v43, %v1924_v34  ;;  %v1928_v15 = vsel %vm1916_vm15, %v1910_v2, %v1927_v3  ;;  %v1998_v8 = vsel %vm1997_vm2, %v1996_v63, 0  ;;  %v2094_v13 = vshrl.u32 %v2093_v39, 23 }
 0x233   :  { %v1801_v50 = vmul.f32 %v1800_v61, %v1798_v0  ;;  %v1929_v9 = vsel %vm1915_vm0, %v1926_v42, %v1928_v15  ;;  %v5516_v23 = vmul.u32.u64.low %v5482_v20, %v1925_v53  ;;  %v5517_v7 = vmul.u32.u64.high %v5482_v20, %v1925_v53, %v5516_v23 }
 0x234   :  { %v5521_v57 = vmul.u32.u64.low %v5482_v20, %v1929_v9  ;;  %v5522_v28 = vmul.u32.u64.high %v5482_v20, %v1929_v9, %v5521_v57  ;;  %v5528_v55 = vmul.f32 %v5426_v37, %v4081_v18  ;;  %v1921_v17 = vsel %vm1915_vm0, %v1918_v22, %v1920_v27 }
 0x235   :  { %v1802_v62 = vxor.u32 2147483648, %v1801_v50  ;;  %v2000_v11 = vand.u32 31, %v1998_v8  ;;  %v5536_v52 = vand.u32 3, %v5480_v41  ;;  %v5540_v39 = vmul.f32 %v5415_v46, %v4087_v21 }
 0x236   :  { %v1994_v63 = vor.u32 8388608, %v5486_v59  ;;  %v1940_v18 = vadd.s32 1, %v5517_v7  ;;  %v2090_v49 = vand.u32 2147483647, %v5464_v54  ;;  %v1937_v45 = vmul.u32 %v5482_v20, %v1921_v17 }
 0x237   :  { %v1803_v60 = vsel %vm1720_vm5, %v1802_v62, %v1801_v50  ;;  %v2001_v16 = vsub.s32 32, %v2000_v11  ;;  %vm1939_vm1 = vc.u32 %v5522_v28, %v5516_v23  ;;  %v3650_v51 = vadd.s32 4294967169, %v2094_v13 }
 0x238   :  { %v1806_v1 = vsel %vm5459_vm6, %v5227_v33, %v1803_v60  ;;  %v1941_v41 = vsel %vm1939_vm1, %v1940_v18, %v5517_v7  ;;  %v6812_v61 = vmov 2475754826   ;;  %v1999_v40 = vshrl.u32 %v1998_v8, 5 }
 0x239   :  { %3906 = vcosq.f32 %v1806_v1  ;;  %v2004_v2 = vshrl.u32 %v6812_v61, %v2001_v16  ;;  %v2006_v0 = vshll.u32 %v6812_v61, %v2000_v11  ;;  %v2007_v59 = vshrl.u32 %v4001_v10, %v2001_v16 }
 0x23a   :  { %3908 = vsinq.f32 %v1806_v1  ;;  %v1942_v24 = vadd.s32 %v1941_v41, %v1937_v45  ;;  %v2009_v43 = vshll.u32 %v4001_v10, %v2000_v11  ;;  %v2010_v19 = vshrl.u32 %v4002_v12, %v2001_v16 }
 0x23b   :  { %vm1817_vm3 = vcmp.eq.s32.totalorder %v5536_v52, 2  ;;  %v2003_v20 = vshll.u32 %v3999_v4, %v2000_v11  ;;  %v2008_v42 = vor.u32 %v2007_v59, %v2006_v0  ;;  %v2012_v50 = vshll.u32 %v4002_v12, %v2000_v11 }
 0x23c   :  { %v2013_v22 = vshrl.u32 %v4003_v14, %v2001_v16  ;;  %vm1814_vm4 = vcmp.eq.s32.totalorder %v5536_v52, 0  ;;  %v1943_v34 = vadd.s32 536870912, %v1942_v24  ;;  %v2011_v3 = vor.u32 %v2010_v19, %v2009_v43 }
 0x23d   :  { %v2015_v27 = vshll.u32 %v4003_v14, %v2000_v11  ;;  %v2016_v53 = vshrl.u32 %v6790_v44, %v2001_v16  ;;  %vm1813_vm5 = vcmp.lt.s32.totalorder %v5536_v52, 2  ;;  %v2005_v15 = vor.u32 %v2004_v2, %v2003_v20 }
 0x23e   :  { %v2014_v62 = vor.u32 %v2013_v22, %v2012_v50  ;;  %v5562_v9 = vshll.u32 %v1994_v63, 8  ;;  %v2100_v7 = vadd.s32 1, %v3650_v51  ;;  %vm1810_vm6 = vweird.f32 %v5227_v33 }
 0x23f   :  { %v1944_v57 = vshrl.u32 %v1943_v34, 30  ;;  %v2017_v8 = vor.u32 %v2016_v53, %v2015_v27  ;;  %vm2021_vm7 = vcmp.lt.s32.totalorder %v1999_v40, 4  ;;  %v5567_v13 = vand.u32 8388607, %v2090_v49 }
 0x240   :  { %v2002_v60 = vshrl.u32 %v3999_v4, %v2001_v16  ;;  %vm2018_vm11 = vcmp.lt.s32.totalorder %v1999_v40, 1  ;;  %vm2019_vm9 = vcmp.lt.s32.totalorder %v1999_v40, 2  ;;  %v2027_v17 = vsel %vm2021_vm7, %v2014_v62, 920167782 }
 0x241   :  { %v1945_v11 = vshll.u32 %v1944_v57, 30  ;;  %vm2020_vm10 = vcmp.lt.s32.totalorder %v1999_v40, 3  ;;  %v2023_v1 = vsel %vm2021_vm7, %v2011_v3, 2102212464  ;;  %v2030_v63 = vsel %vm2018_vm11, %v2008_v42, %v2011_v3 }
 0x242   :  { %v2026_v45 = vsel %vm2018_vm11, %v2005_v15, %v2008_v42  ;;  %v2028_v51 = vsel %vm2020_vm10, %v2011_v3, %v2027_v17  ;;  %v2031_v41 = vsel %vm2021_vm7, %v2017_v8, 1326507024  ;;  %vm2101_vm8 = vcmp.gt.s32.totalorder %v2100_v7, 0 }
 0x243   :  { %v3907_v18 = vpop.eup %3906  ;;  %v5570_v59 = vsub.s32 %v1942_v24, %v1945_v11  ;;  %v2022_v43 = vsel %vm2018_vm11, %v2002_v60, %v2005_v15  ;;  %v2032_v19 = vsel %vm2020_vm10, %v2014_v62, %v2031_v41  ;;  %v2024_v16 = vsel %vm2020_vm10, %v2008_v42, %v2023_v1 }
 0x244   :  { %v3909_v2 = vpop.eup %3908  ;;  %v1818_v0 = vxor.u32 2147483648, %v3907_v18  ;;  %v2033_v50 = vsel %vm2019_vm9, %v2030_v63, %v2032_v19  ;;  %v2102_v22 = vsel %vm2101_vm8, %v2100_v7, 0  ;;  %v1968_v53 = vsub.s32 4, %v1944_v57 }
 0x245   :  { %v1815_v20 = vxor.u32 2147483648, %v3909_v2  ;;  %v1948_v27 = vsub.s32 0, %v5570_v59  ;;  %v2029_v3 = vsel %vm2019_vm9, %v2026_v45, %v2028_v51  ;;  %v2104_v62 = vand.u32 31, %v2102_v22 }
 0x246   :  { %v1819_v34 = vsel %vm1817_vm3, %v1818_v0, %v3909_v2  ;;  %v5580_v24 = vmul.u32.u64.low %v5562_v9, %v2033_v50  ;;  %v5581_v15 = vmul.u32.u64.high %v5562_v9, %v2033_v50, %v5580_v24  ;;  %v5587_v7 = vmul.f32 %v5426_v37, %v4087_v21 }
 0x247   :  { %v1816_v8 = vsel %vm1814_vm4, %v3907_v18, %v1815_v20  ;;  %v3643_v60 = vmin.u32 %v1948_v27, %v5570_v59  ;;  %v2025_v17 = vsel %vm2019_vm9, %v2022_v43, %v2024_v16  ;;  %v2105_v18 = vsub.s32 32, %v2104_v62 }
 0x248   :  { %v1820_v42 = vsel %vm1813_vm5, %v1816_v8, %v1819_v34  ;;  %v5594_v1 = vmul.u32.u64.low %v5562_v9, %v2029_v3  ;;  %v5595_v63 = vmul.u32.u64.high %v5562_v9, %v2029_v3, %v5594_v1  ;;  %v5600_v52 = vmul.f32 %v5415_v46, %v4095_v26 }
 0x249   :  { %v1821_v11 = vsel %vm1810_vm6, nan, %v1820_v42  ;;  %v5604_v21 = vadd.f32 %v5471_v48, %v4125_v38  ;;  %vm1884_vm14 = vcmp.lt.s32.totalorder %v5433_v58, 0  ;;  %v1950_v40 = vclz %v3643_v60 }
 0x24a   :  { %1837 = vst [vmem:[#allocation2 + $0x78] sm:$0xff] %v1821_v11  ;;  %v1938_v33 = vadd.s32 %v5516_v23, %v5522_v28  ;;  %v5611_v45 = vsel %vm1884_vm14, %v1968_v53, %v1944_v57  ;;  %v2041_v51 = vmul.u32 %v5562_v9, %v2025_v17  ;;  %v2098_v41 = vor.u32 8388608, %v5567_v13 }
 0x24b   :  { %v3644_v2 = vadd.s32 4294967294, %v1950_v40  ;;  %vm2043_vm12 = vc.u32 %v5581_v15, %v5594_v1  ;;  %v2108_v38 = vshrl.u32 %v6812_v61, %v2105_v18  ;;  %v2111_v48 = vshrl.u32 %v4001_v10, %v2105_v18 }
 0x24c   :  { %v2044_v0 = vadd.s32 1, %v5595_v63  ;;  %v5620_v43 = vshrl.u32 %v2102_v22, 5  ;;  %v2107_v23 = vshll.u32 %v3999_v4, %v2104_v62  ;;  %v2114_v28 = vshrl.u32 %v4002_v12, %v2105_v18 }
 0x24d   :  { %vm3645_vm13 = vcmp.lt.s32.totalorder %v3644_v2, 0  ;;  %v2110_v9 = vshll.u32 %v6812_v61, %v2104_v62  ;;  %v2113_v57 = vshll.u32 %v4001_v10, %v2104_v62  ;;  %v2117_v13 = vshrl.u32 %v4003_v14, %v2105_v18 }
 0x24e   :  { %v1953_v19 = vsel %vm3645_vm13, 0, %v3644_v2  ;;  %v2045_v20 = vsel %vm2043_vm12, %v2044_v0, %v5595_v63  ;;  %v2109_v16 = vor.u32 %v2108_v38, %v2107_v23  ;;  %v2116_v50 = vshll.u32 %v4002_v12, %v2104_v62 }
 0x24f   :  { %v1954_v34 = vsub.s32 32, %v1953_v19  ;;  %v1958_v22 = vsub.s32 4294967266, %v1953_v19  ;;  %v2046_v27 = vadd.s32 %v2045_v20, %v2041_v51  ;;  %v2112_v53 = vor.u32 %v2111_v48, %v2110_v9 }
 0x250   :  { %v2115_v3 = vor.u32 %v2114_v28, %v2113_v57  ;;  %v2118_v8 = vor.u32 %v2117_v13, %v2116_v50  ;;  %v2119_v24 = vshll.u32 %v4003_v14, %v2104_v62  ;;  %v2120_v42 = vshrl.u32 %v6790_v44, %v2105_v18 }
 0x251   :  { %v1955_v60 = vshll.u32 %v5570_v59, %v1953_v19  ;;  %v1956_v17 = vshrl.u32 %v1938_v33, %v1954_v34  ;;  %v1959_v11 = vadd.s32 127, %v1958_v22  ;;  %v2047_v40 = vadd.s32 536870912, %v2046_v27 }
 0x252   :  { %v2106_v63 = vshrl.u32 %v3999_v4, %v2105_v18  ;;  %v2121_v2 = vor.u32 %v2120_v42, %v2119_v24  ;;  %vm2122_vm0 = vcmp.lt.s32.totalorder %v5620_v43, 1  ;;  %vm2123_vm15 = vcmp.lt.s32.totalorder %v5620_v43, 2 }
 0x253   :  { %v1957_v51 = vor.u32 %v1956_v17, %v1955_v60  ;;  %v1960_v38 = vshll.u32 %v1959_v11, 23  ;;  %v2048_v48 = vshrl.u32 %v2047_v40, 30  ;;  %vm2125_vm2 = vcmp.lt.s32.totalorder %v5620_v43, 4 }
 0x254   :  { %vm2124_vm1 = vcmp.lt.s32.totalorder %v5620_v43, 3  ;;  %v2130_v62 = vsel %vm2122_vm0, %v2109_v16, %v2112_v53  ;;  %v2131_v0 = vsel %vm2125_vm2, %v2118_v8, 920167782  ;;  %v2135_v59 = vsel %vm2125_vm2, %v2121_v2, 1326507024 }
 0x255   :  { %v1961_v33 = vor.u32 4788187, %v1960_v38  ;;  %v2049_v23 = vshll.u32 %v2048_v48, 30  ;;  %v2127_v28 = vsel %vm2125_vm2, %v2115_v3, 2102212464  ;;  %v2134_v9 = vsel %vm2122_vm0, %v2112_v53, %v2115_v3 }
 0x256   :  { %v2126_v18 = vsel %vm2122_vm0, %v2106_v63, %v2109_v16  ;;  %v2132_v57 = vsel %vm2124_vm1, %v2115_v3, %v2131_v0  ;;  %v2136_v13 = vsel %vm2124_vm1, %v2118_v8, %v2135_v59  ;;  %v2138_v19 = vshll.u32 %v2098_v41, 8 }
 0x257   :  { %v1962_v20 = vand.u32 2147483647, %v1961_v33  ;;  %v1964_v50 = vcvt.s32.f32 %v1957_v51  ;;  %v5641_v34 = vsub.s32 %v2046_v27, %v2049_v23  ;;  %v2133_v22 = vsel %vm2123_vm15, %v2130_v62, %v2132_v57 }
 0x258   :  { %v2128_v24 = vsel %vm2124_vm1, %v2112_v53, %v2127_v28  ;;  %v2137_v16 = vsel %vm2123_vm15, %v2134_v9, %v2136_v13  ;;  %v5649_v42 = vmul.u32.u64.low %v2138_v19, %v2133_v22  ;;  %v5650_v60 = vmul.u32.u64.high %v2138_v19, %v2133_v22, %v5649_v42 }
 0x259   :  { %v6813_v3 = vand.u32 2147483647, %v5433_v58  ;;  %v1965_v27 = vmul.f32 %v1964_v50, %v1962_v20  ;;  %v2052_v8 = vsub.s32 0, %v5641_v34  ;;  %v2072_v17 = vsub.s32 4, %v2048_v48 }
 0x25a   :  { %v5663_v11 = vmul.u32.u64.low %v2138_v19, %v2137_v16  ;;  %v5664_v40 = vmul.u32.u64.high %v2138_v19, %v2137_v16, %v5663_v11  ;;  %v2197_v63 = vand.u32 2139095040, %v5604_v21  ;;  %v5669_v2 = vadd.f32 %v5475_v29, %v4322_v47 }
 0x25b   :  { %vm5655_vm3 = vcmp.le.f32.partialorder %v6813_v3, 0.7853982  ;;  %v1966_v51 = vxor.u32 2147483648, %v1965_v27  ;;  %v3647_v38 = vmin.u32 %v2052_v8, %v5641_v34  ;;  %v2129_v62 = vsel %vm2123_vm15, %v2126_v18, %v2128_v24 }
 0x25c   :  { %v1971_v53 = vsel %vm5655_vm3, 0, %v5611_v45  ;;  %vm1988_vm4 = vcmp.lt.s32.totalorder %v5445_v36, 0  ;;  %v2148_v0 = vadd.s32 1, %v5650_v60  ;;  %v2194_v45 = vand.u32 2147483647, %v5604_v21 }
 0x25d   :  { %v2198_v59 = vshrl.u32 %v2197_v63, 23  ;;  %v1967_v33 = vsel %vm1884_vm14, %v1966_v51, %v1965_v27  ;;  %v1975_v23 = vadd.s32 3, %v1971_v53  ;;  %v2054_v28 = vclz %v3647_v38 }
 0x25e   :  { %v2073_v29 = vsel %vm1988_vm4, %v2072_v17, %v2048_v48  ;;  %v1970_v43 = vsel %vm5655_vm3, %v5433_v58, %v1967_v33  ;;  %v6816_v9 = vand.u32 2147483647, %v5445_v36  ;;  %v2145_v57 = vmul.u32 %v2138_v19, %v2129_v62 }
 0x25f   :  { %vm2147_vm6 = vc.u32 %v5664_v40, %v5649_v42  ;;  %3910 = vcosq.f32 %v1970_v43  ;;  %v3648_v13 = vadd.s32 4294967294, %v2054_v28  ;;  %v3654_v50 = vadd.s32 4294967169, %v2198_v59 }
 0x260   :  { %vm5686_vm5 = vcmp.le.f32.partialorder %v6816_v9, 0.7853982  ;;  %v2149_v20 = vsel %vm2147_vm6, %v2148_v0, %v5650_v60  ;;  %3912 = vsinq.f32 %v1970_v43  ;;  %v2201_v24 = vand.u32 8388607, %v2194_v45 }
 0x261   :  { %v2075_v48 = vsel %vm5686_vm5, 0, %v2073_v29  ;;  %v2150_v22 = vadd.s32 %v2149_v20, %v2145_v57  ;;  %v5699_v16 = vadd.f32 %v5528_v55, %v4322_v47  ;;  %v1976_v19 = vand.u32 3, %v1975_v23 }
 0x262   :  { %vm3649_vm7 = vcmp.lt.s32.totalorder %v3648_v13, 0  ;;  %v2204_v3 = vadd.s32 1, %v3654_v50  ;;  %v2042_v41 = vadd.s32 %v5594_v1, %v5581_v15  ;;  %v2301_v8 = vand.u32 2139095040, %v5669_v2 }
 0x263   :  { %v2057_v60 = vsel %vm3649_vm7, 0, %v3648_v13  ;;  %v2151_v27 = vadd.s32 536870912, %v2150_v22  ;;  %v2079_v11 = vadd.s32 3, %v2075_v48  ;;  %vm2092_vm11 = vcmp.lt.s32.totalorder %v5464_v54, 0 }
 0x264   :  { %v2058_v17 = vsub.s32 32, %v2057_v60  ;;  %v2062_v53 = vsub.s32 4294967266, %v2057_v60  ;;  %vm2205_vm9 = vcmp.gt.s32.totalorder %v2204_v3, 0  ;;  %v2202_v51 = vor.u32 8388608, %v2201_v24 }
 0x265   :  { %v2152_v63 = vshrl.u32 %v2151_v27, 30  ;;  %v2206_v47 = vsel %vm2205_vm9, %v2204_v3, 0  ;;  %v2298_v55 = vand.u32 2147483647, %v5669_v2  ;;  %v2059_v38 = vshll.u32 %v5641_v34, %v2057_v60 }
 0x266   :  { %v2060_v62 = vshrl.u32 %v2042_v41, %v2058_v17  ;;  %v2063_v0 = vadd.s32 127, %v2062_v53  ;;  %v2208_v15 = vand.u32 31, %v2206_v47  ;;  %vm1974_vm10 = vweird.f32 %v5433_v58 }
 0x267   :  { %vm1977_vm8 = vcmp.lt.s32.totalorder %v1976_v19, 2  ;;  %vm1978_vm14 = vcmp.eq.s32.totalorder %v1976_v19, 0  ;;  %v2153_v1 = vshll.u32 %v2152_v63, 30  ;;  %v2302_v59 = vshrl.u32 %v2301_v8, 23 }
 0x268   :  { %vm1981_vm12 = vcmp.eq.s32.totalorder %v1976_v19, 2  ;;  %v2061_v33 = vor.u32 %v2060_v62, %v2059_v38  ;;  %v2064_v23 = vshll.u32 %v2063_v0, 23  ;;  %v2209_v28 = vsub.s32 32, %v2208_v15 }
 0x269   :  { %v5708_v29 = vand.u32 3, %v2079_v11  ;;  %v2146_v43 = vadd.s32 %v5649_v42, %v5664_v40  ;;  %v5712_v9 = vsub.s32 %v2150_v22, %v2153_v1  ;;  %v2176_v34 = vsub.s32 4, %v2152_v63  ;;  %v3911_v57 = vpop.eup %3910 }
 0x26a   :  { %v2065_v13 = vor.u32 4788187, %v2064_v23  ;;  %v5714_v20 = vshrl.u32 %v2206_v47, 5  ;;  %v5716_v50 = vshll.u32 %v2202_v51, 8  ;;  %v5720_v48 = vand.u32 8388607, %v2298_v55  ;;  %v3913_v24 = vpop.eup %3912 }
 0x26b   :  { %v1982_v3 = vxor.u32 2147483648, %v3911_v57  ;;  %v2068_v41 = vcvt.s32.f32 %v2061_v33  ;;  %v2156_v60 = vsub.s32 0, %v5712_v9  ;;  %v3658_v27 = vadd.s32 4294967169, %v2302_v59 }
 0x26c   :  { %v1979_v42 = vxor.u32 2147483648, %v3913_v24  ;;  %v2066_v40 = vand.u32 2147483647, %v2065_v13  ;;  %v2212_v22 = vshrl.u32 %v6812_v61, %v2209_v28  ;;  %v2215_v8 = vshrl.u32 %v4001_v10, %v2209_v28 }
 0x26d   :  { %v1983_v17 = vsel %vm1981_vm12, %v1982_v3, %v3913_v24  ;;  %v3651_v53 = vmin.u32 %v2156_v60, %v5712_v9  ;;  %v5729_v11 = vsel %vm2092_vm11, %v2176_v34, %v2152_v63  ;;  %v2211_v51 = vshll.u32 %v3999_v4, %v2208_v15 }
 0x26e   :  { %v1980_v47 = vsel %vm1978_vm14, %v3911_v57, %v1979_v42  ;;  %v2069_v38 = vmul.f32 %v2068_v41, %v2066_v40  ;;  %v2214_v62 = vshll.u32 %v6812_v61, %v2208_v15  ;;  %v2218_v0 = vshrl.u32 %v4002_v12, %v2209_v28 }
 0x26f   :  { %v1984_v1 = vsel %vm1977_vm8, %v1980_v47, %v1983_v17  ;;  %v2158_v59 = vclz %v3651_v53  ;;  %v2210_v33 = vshrl.u32 %v3999_v4, %v2209_v28  ;;  %v2217_v23 = vshll.u32 %v4001_v10, %v2208_v15 }
 0x270   :  { %v1985_v63 = vsel %vm1974_vm10, nan, %v1984_v1  ;;  %v2070_v34 = vxor.u32 2147483648, %v2069_v38  ;;  %v2213_v13 = vor.u32 %v2212_v22, %v2211_v51  ;;  %v2216_v24 = vor.u32 %v2215_v8, %v2214_v62 }
 0x271   :  { %v3652_v3 = vadd.s32 4294967294, %v2158_v59  ;;  %v2220_v57 = vshll.u32 %v4002_v12, %v2208_v15  ;;  %v2221_v41 = vshrl.u32 %v4003_v14, %v2209_v28  ;;  %v2224_v60 = vshrl.u32 %v6790_v44, %v2209_v28  ;;  %3546 = vst [vmem:[#allocation2 + $0x80] sm:$0xff] %v1985_v63 }
 0x272   :  { %v2071_v19 = vsel %vm1988_vm4, %v2070_v34, %v2069_v38  ;;  %vm5747_vm13 = vcmp.le.f32.partialorder %v2090_v49, 0.7853982  ;;  %v2219_v58 = vor.u32 %v2218_v0, %v2217_v23  ;;  %v2223_v40 = vshll.u32 %v4003_v14, %v2208_v15 }
 0x273   :  { %vm2226_vm0 = vcmp.lt.s32.totalorder %v5714_v20, 1  ;;  %v2074_v22 = vsel %vm5686_vm5, %v5445_v36, %v2071_v19  ;;  %vm3653_vm15 = vcmp.lt.s32.totalorder %v3652_v3, 0  ;;  %v2222_v28 = vor.u32 %v2221_v41, %v2220_v57 }
 0x274   :  { %vm2227_vm2 = vcmp.lt.s32.totalorder %v5714_v20, 2  ;;  %3914 = vcosq.f32 %v2074_v22  ;;  %v2161_v8 = vsel %vm3653_vm15, 0, %v3652_v3  ;;  %v2225_v17 = vor.u32 %v2224_v60, %v2223_v40 }
 0x275   :  { %vm2228_vm1 = vcmp.lt.s32.totalorder %v5714_v20, 3  ;;  %3916 = vsinq.f32 %v2074_v22  ;;  %v2162_v49 = vsub.s32 32, %v2161_v8  ;;  %v2166_v53 = vsub.s32 4294967266, %v2161_v8 }
 0x276   :  { %vm2229_vm3 = vcmp.lt.s32.totalorder %v5714_v20, 4  ;;  %v2163_v15 = vshll.u32 %v5712_v9, %v2161_v8  ;;  %v2234_v18 = vsel %vm2226_vm0, %v2213_v13, %v2216_v24  ;;  %v2238_v1 = vsel %vm2226_vm0, %v2216_v24, %v2219_v58 }
 0x277   :  { %v2231_v51 = vsel %vm2229_vm3, %v2219_v58, 2102212464  ;;  %v2235_v47 = vsel %vm2229_vm3, %v2222_v28, 920167782  ;;  %v2164_v38 = vshrl.u32 %v2146_v43, %v2162_v49  ;;  %v2167_v62 = vadd.s32 127, %v2166_v53 }
 0x278   :  { %v2236_v0 = vsel %vm2228_vm1, %v2219_v58, %v2235_v47  ;;  %v2230_v59 = vsel %vm2226_vm0, %v2210_v33, %v2213_v13  ;;  %v2239_v9 = vsel %vm2229_vm3, %v2225_v17, 1326507024  ;;  %v2308_v63 = vadd.s32 1, %v3658_v27 }
 0x279   :  { %v2237_v23 = vsel %vm2227_vm2, %v2234_v18, %v2236_v0  ;;  %v2165_v34 = vor.u32 %v2164_v38, %v2163_v15  ;;  %v2168_v3 = vshll.u32 %v2167_v62, 23  ;;  %v2232_v43 = vsel %vm2228_vm1, %v2216_v24, %v2231_v51 }
 0x27a   :  { %v2240_v57 = vsel %vm2228_vm1, %v2222_v28, %v2239_v9  ;;  %v5777_v60 = vmul.u32.u64.low %v5716_v50, %v2237_v23  ;;  %v5778_v19 = vmul.u32.u64.high %v5716_v50, %v2237_v23, %v5777_v60  ;;  %vm2309_vm4 = vcmp.gt.s32.totalorder %v2308_v63, 0 }
 0x27b   :  { %v2241_v41 = vsel %vm2227_vm2, %v2238_v1, %v2240_v57  ;;  %v2169_v33 = vor.u32 4788187, %v2168_v3  ;;  %v2179_v27 = vsel %vm5747_vm13, 0, %v5729_v11  ;;  %vm2078_vm5 = vweird.f32 %v5445_v36 }
 0x27c   :  { %v5785_v13 = vmul.u32.u64.low %v5716_v50, %v2241_v41  ;;  %v5786_v24 = vmul.u32.u64.high %v5716_v50, %v2241_v41, %v5785_v13  ;;  %vm2081_vm6 = vcmp.lt.s32.totalorder %v5708_v29, 2  ;;  %v2233_v58 = vsel %vm2227_vm2, %v2230_v59, %v2232_v43 }
 0x27d   :  { %v2310_v40 = vsel %vm2309_vm4, %v2308_v63, 0  ;;  %vm2082_vm7 = vcmp.eq.s32.totalorder %v5708_v29, 0  ;;  %v2170_v22 = vand.u32 2147483647, %v2169_v33  ;;  %v2172_v28 = vcvt.s32.f32 %v2165_v34 }
 0x27e   :  { %v2312_v8 = vand.u32 31, %v2310_v40  ;;  %v3915_v17 = vpop.eup %3914  ;;  %vm2085_vm9 = vcmp.eq.s32.totalorder %v5708_v29, 2  ;;  %v2183_v11 = vadd.s32 3, %v2179_v27  ;;  %v2252_v49 = vadd.s32 1, %v5778_v19 }
 0x27f   :  { %v2306_v53 = vor.u32 8388608, %v5720_v48  ;;  %v3917_v15 = vpop.eup %3916  ;;  %v2086_v51 = vxor.u32 2147483648, %v3915_v17  ;;  %v2173_v18 = vmul.f32 %v2172_v28, %v2170_v22  ;;  %v2249_v20 = vmul.u32 %v5716_v50, %v2233_v58 }
 0x280   :  { %vm2251_vm10 = vc.u32 %v5786_v24, %v5777_v60  ;;  %v2083_v47 = vxor.u32 2147483648, %v3917_v15  ;;  %v5800_v62 = vshrl.u32 %v2310_v40, 5  ;;  %v2313_v0 = vsub.s32 32, %v2312_v8 }
 0x281   :  { %v2253_v38 = vsel %vm2251_vm10, %v2252_v49, %v5778_v19  ;;  %v2087_v1 = vsel %vm2085_vm9, %v2086_v51, %v3917_v15  ;;  %v2174_v59 = vxor.u32 2147483648, %v2173_v18  ;;  %v2315_v9 = vshll.u32 %v3999_v4, %v2312_v8 }
 0x282   :  { %v2254_v23 = vadd.s32 %v2253_v38, %v2249_v20  ;;  %v2084_v48 = vsel %vm2082_vm7, %v3915_v17, %v2083_v47  ;;  %v2316_v63 = vshrl.u32 %v6812_v61, %v2313_v0  ;;  %v2318_v50 = vshll.u32 %v6812_v61, %v2312_v8 }
 0x283   :  { %v2319_v34 = vshrl.u32 %v4001_v10, %v2313_v0  ;;  %v2088_v3 = vsel %vm2081_vm6, %v2084_v48, %v2087_v1  ;;  %v2175_v43 = vsel %vm2092_vm11, %v2174_v59, %v2173_v18  ;;  %v2321_v41 = vshll.u32 %v4001_v10, %v2312_v8 }
 0x284   :  { %v2255_v57 = vadd.s32 536870912, %v2254_v23  ;;  %v2089_v19 = vsel %vm2078_vm5, nan, %v2088_v3  ;;  %v2178_v33 = vsel %vm5747_vm13, %v5464_v54, %v2175_v43  ;;  %v2317_v27 = vor.u32 %v2316_v63, %v2315_v9 }
 0x285   :  { %v2320_v13 = vor.u32 %v2319_v34, %v2318_v50  ;;  %3918 = vcosq.f32 %v2178_v33  ;;  %v2322_v29 = vshrl.u32 %v4002_v12, %v2313_v0  ;;  %v2324_v40 = vshll.u32 %v4002_v12, %v2312_v8  ;;  %3547 = vst [vmem:[#allocation2 + $0x88] sm:$0xff] %v2089_v19 }
 0x286   :  { %v5818_v58 = vshrl.u32 %v2255_v57, 30  ;;  %3920 = vsinq.f32 %v2178_v33  ;;  %v2325_v22 = vshrl.u32 %v4003_v14, %v2313_v0  ;;  %v2327_v36 = vshll.u32 %v4003_v14, %v2312_v8 }
 0x287   :  { %v2328_v28 = vshrl.u32 %v6790_v44, %v2313_v0  ;;  %v5827_v42 = vmul.f32 %v5426_v37, %v4095_v26  ;;  %v2184_v17 = vand.u32 3, %v2183_v11  ;;  %v2323_v15 = vor.u32 %v2322_v29, %v2321_v41 }
 0x288   :  { %v2257_v49 = vshll.u32 %v5818_v58, 30  ;;  %v5832_v51 = vmul.f32 %v5415_v46, %v4093_v25  ;;  %v5836_v18 = vadd.f32 %v5540_v39, %v4529_v32  ;;  %v2326_v20 = vor.u32 %v2325_v22, %v2324_v40 }
 0x289   :  { %v2329_v8 = vor.u32 %v2328_v28, %v2327_v36  ;;  %vm2330_vm11 = vcmp.lt.s32.totalorder %v5800_v62, 1  ;;  %vm2333_vm8 = vcmp.lt.s32.totalorder %v5800_v62, 4  ;;  %v2346_v26 = vshll.u32 %v2306_v53, 8 }
 0x28a   :  { %v5838_v47 = vsub.s32 %v2254_v23, %v2257_v49  ;;  %vm2196_vm14 = vcmp.lt.s32.totalorder %v5604_v21, 0  ;;  %vm2332_vm12 = vcmp.lt.s32.totalorder %v5800_v62, 3  ;;  %v2338_v11 = vsel %vm2330_vm11, %v2317_v27, %v2320_v13 }
 0x28b   :  { %v2339_v38 = vsel %vm2333_vm8, %v2326_v20, 920167782  ;;  %v2405_v39 = vand.u32 2139095040, %v5699_v16  ;;  %vm2185_vm13 = vcmp.lt.s32.totalorder %v2184_v17, 2  ;;  %vm2331_vm0 = vcmp.lt.s32.totalorder %v5800_v62, 2 }
 0x28c   :  { %v2260_v1 = vsub.s32 0, %v5838_v47  ;;  %v2340_v59 = vsel %vm2332_vm12, %v2323_v15, %v2339_v38  ;;  %vm2182_vm15 = vweird.f32 %v5464_v54  ;;  %v2335_v53 = vsel %vm2333_vm8, %v2323_v15, 2102212464 }
 0x28d   :  { %v2341_v23 = vsel %vm2331_vm0, %v2338_v11, %v2340_v59  ;;  %v2342_v9 = vsel %vm2330_vm11, %v2320_v13, %v2323_v15  ;;  %v2343_v48 = vsel %vm2333_vm8, %v2329_v8, 1326507024  ;;  %vm5858_vm2 = vcmp.le.f32.partialorder %v2194_v45, 0.7853982 }
 0x28e   :  { %v3655_v50 = vmin.u32 %v2260_v1, %v5838_v47  ;;  %v2314_v34 = vshrl.u32 %v3999_v4, %v2313_v0  ;;  %v2344_v3 = vsel %vm2332_vm12, %v2326_v20, %v2343_v48  ;;  %v2402_v43 = vand.u32 2147483647, %v5699_v16 }
 0x28f   :  { %v2345_v57 = vsel %vm2331_vm0, %v2342_v9, %v2344_v3  ;;  %v5869_v41 = vmul.u32.u64.low %v2346_v26, %v2341_v23  ;;  %v5870_v19 = vmul.u32.u64.high %v2346_v26, %v2341_v23, %v5869_v41  ;;  %v2406_v45 = vshrl.u32 %v2405_v39, 23  ;;  %v3919_v33 = vpop.eup %3918 }
 0x290   :  { %v2262_v29 = vclz %v3655_v50  ;;  %v2280_v40 = vsub.s32 4, %v5818_v58  ;;  %v2334_v0 = vsel %vm2330_vm11, %v2314_v34, %v2317_v27  ;;  %v2336_v22 = vsel %vm2332_vm12, %v2320_v13, %v2335_v53  ;;  %v3921_v36 = vpop.eup %3920 }
 0x291   :  { %v2190_v28 = vxor.u32 2147483648, %v3919_v33  ;;  %v5878_v49 = vmul.u32.u64.low %v2346_v26, %v2345_v57  ;;  %v5879_v15 = vmul.u32.u64.high %v2346_v26, %v2345_v57, %v5878_v49  ;;  %v3662_v20 = vadd.s32 4294967169, %v2406_v45 }
 0x292   :  { %vm2186_vm1 = vcmp.eq.s32.totalorder %v2184_v17, 0  ;;  %v2187_v8 = vxor.u32 2147483648, %v3921_v36  ;;  %vm2189_vm3 = vcmp.eq.s32.totalorder %v2184_v17, 2  ;;  %v3656_v11 = vadd.s32 4294967294, %v2262_v29 }
 0x293   :  { %v2191_v38 = vsel %vm2189_vm3, %v2190_v28, %v3921_v36  ;;  %v2337_v39 = vsel %vm2331_vm0, %v2334_v0, %v2336_v22  ;;  %v2356_v1 = vadd.s32 1, %v5870_v19  ;;  %v2412_v27 = vadd.s32 1, %v3662_v20 }
 0x294   :  { %v2188_v59 = vsel %vm2186_vm1, %v3919_v33, %v2187_v8  ;;  %vm3657_vm4 = vcmp.lt.s32.totalorder %v3656_v11, 0  ;;  %v2281_v13 = vsel %vm2196_vm14, %v2280_v40, %v5818_v58  ;;  %v2409_v53 = vand.u32 8388607, %v2402_v43 }
 0x295   :  { %v2192_v23 = vsel %vm2185_vm13, %v2188_v59, %v2191_v38  ;;  %v2250_v9 = vadd.s32 %v5777_v60, %v5786_v24  ;;  %v2265_v48 = vsel %vm3657_vm4, 0, %v3656_v11  ;;  %vm2355_vm5 = vc.u32 %v5879_v15, %v5869_v41 }
 0x296   :  { %v2193_v62 = vsel %vm2182_vm15, nan, %v2192_v23  ;;  %v2266_v50 = vsub.s32 32, %v2265_v48  ;;  %v2270_v34 = vsub.s32 4294967266, %v2265_v48  ;;  %v2353_v3 = vmul.u32 %v2346_v26, %v2337_v39 }
 0x297   :  { %v2267_v58 = vshll.u32 %v5838_v47, %v2265_v48  ;;  %v2283_v57 = vsel %vm5858_vm2, 0, %v2281_v13  ;;  %v2357_v17 = vsel %vm2355_vm5, %v2356_v1, %v5870_v19  ;;  %vm2413_vm6 = vcmp.gt.s32.totalorder %v2412_v27, 0  ;;  %3548 = vst [vmem:[#allocation2 + $0x90] sm:$0xff] %v2193_v62 }
 0x298   :  { %v2268_v60 = vshrl.u32 %v2250_v9, %v2266_v50  ;;  %v2271_v24 = vadd.s32 127, %v2270_v34  ;;  %v2358_v45 = vadd.s32 %v2357_v17, %v2353_v3  ;;  %v2414_v33 = vsel %vm2413_vm6, %v2412_v27, 0 }
 0x299   :  { %v5902_v54 = vmul.f32 %v5426_v37, %v4093_v25  ;;  %v5906_v26 = vmul.f32 %v5415_v46, %v4108_v30  ;;  %v5910_v47 = vadd.f32 %v5587_v7, %v4529_v32  ;;  %v2416_v29 = vand.u32 31, %v2414_v33 }
 0x29a   :  { %v5914_v19 = vadd.f32 %v5600_v52, %v4531_v5  ;;  %v2269_v40 = vor.u32 %v2268_v60, %v2267_v58  ;;  %v2272_v0 = vshll.u32 %v2271_v24, 23  ;;  %v2359_v22 = vadd.s32 536870912, %v2358_v45 }
 0x29b   :  { %v5918_v25 = vadd.f32 %v5827_v42, %v4531_v5  ;;  %v5922_v36 = vadd.f32 %v5832_v51, %v4804_v56  ;;  %v2287_v28 = vadd.s32 3, %v2283_v57  ;;  %v2417_v49 = vsub.s32 32, %v2416_v29 }
 0x29c   :  { %v2273_v32 = vor.u32 4788187, %v2272_v0  ;;  %v5924_v7 = vshrl.u32 %v2359_v22, 30  ;;  %v2410_v20 = vor.u32 8388608, %v2409_v53  ;;  %v2509_v52 = vand.u32 2139095040, %v5836_v18 }
 0x29d   :  { %v2419_v8 = vshll.u32 %v3999_v4, %v2416_v29  ;;  %v2420_v11 = vshrl.u32 %v6812_v61, %v2417_v49  ;;  %v2423_v38 = vshrl.u32 %v4001_v10, %v2417_v49  ;;  %v2426_v5 = vshrl.u32 %v4002_v12, %v2417_v49 }
 0x29e   :  { %v2274_v42 = vand.u32 2147483647, %v2273_v32  ;;  %v2276_v39 = vcvt.s32.f32 %v2269_v40  ;;  %v2361_v51 = vshll.u32 %v5924_v7, 30  ;;  %v2429_v1 = vshrl.u32 %v4003_v14, %v2417_v49 }
 0x29f   :  { %v2415_v27 = vshrl.u32 %v2414_v33, 5  ;;  %v2422_v59 = vshll.u32 %v6812_v61, %v2416_v29  ;;  %v2425_v13 = vshll.u32 %v4001_v10, %v2416_v29  ;;  %v2428_v53 = vshll.u32 %v4002_v12, %v2416_v29 }
 0x2a0   :  { %v2277_v23 = vmul.f32 %v2276_v39, %v2274_v42  ;;  %v5936_v9 = vsub.s32 %v2358_v45, %v2361_v51  ;;  %v2421_v48 = vor.u32 %v2420_v11, %v2419_v8  ;;  %v2506_v62 = vand.u32 2147483647, %v5836_v18 }
 0x2a1   :  { %v2424_v50 = vor.u32 %v2423_v38, %v2422_v59  ;;  %v2427_v34 = vor.u32 %v2426_v5, %v2425_v13  ;;  %v2430_v3 = vor.u32 %v2429_v1, %v2428_v53  ;;  %v2432_v58 = vshrl.u32 %v6790_v44, %v2417_v49 }
 0x2a2   :  { %v2278_v57 = vxor.u32 2147483648, %v2277_v23  ;;  %v2364_v17 = vsub.s32 0, %v5936_v9  ;;  %v2431_v60 = vshll.u32 %v4003_v14, %v2416_v29  ;;  %v5942_v24 = vshll.u32 %v2410_v20, 8 }
 0x2a3   :  { %v2384_v33 = vsub.s32 4, %v5924_v7  ;;  %v2418_v45 = vshrl.u32 %v3999_v4, %v2417_v49  ;;  %vm2434_vm7 = vcmp.lt.s32.totalorder %v2415_v27, 1  ;;  %v2510_v40 = vshrl.u32 %v2509_v52, 23 }
 0x2a4   :  { %v2279_v0 = vsel %vm2196_vm14, %v2278_v57, %v2277_v23  ;;  %v3659_v22 = vmin.u32 %v2364_v17, %v5936_v9  ;;  %v2433_v32 = vor.u32 %v2432_v58, %v2431_v60  ;;  %vm2437_vm9 = vcmp.lt.s32.totalorder %v2415_v27, 4 }
 0x2a5   :  { %v2282_v8 = vsel %vm5858_vm2, %v5604_v21, %v2279_v0  ;;  %v2439_v29 = vsel %vm2437_vm9, %v2427_v34, 2102212464  ;;  %v2442_v20 = vsel %vm2434_vm7, %v2421_v48, %v2424_v50  ;;  %v2443_v11 = vsel %vm2437_vm9, %v2430_v3, 920167782 }
 0x2a6   :  { %3922 = vcosq.f32 %v2282_v8  ;;  %v2366_v49 = vclz %v3659_v22  ;;  %vm2435_vm10 = vcmp.lt.s32.totalorder %v2415_v27, 2  ;;  %vm2436_vm11 = vcmp.lt.s32.totalorder %v2415_v27, 3 }
 0x2a7   :  { %3924 = vsinq.f32 %v2282_v8  ;;  %vm5957_vm8 = vcmp.le.f32.partialorder %v2298_v55, 0.7853982  ;;  %v2438_v63 = vsel %vm2434_vm7, %v2418_v45, %v2421_v48  ;;  %v2444_v38 = vsel %vm2436_vm11, %v2427_v34, %v2443_v11 }
 0x2a8   :  { %v2446_v5 = vsel %vm2434_vm7, %v2424_v50, %v2427_v34  ;;  %v3660_v42 = vadd.s32 4294967294, %v2366_v49  ;;  %v2440_v39 = vsel %vm2436_vm11, %v2424_v50, %v2439_v29  ;;  %v2445_v51 = vsel %vm2435_vm10, %v2442_v20, %v2444_v38 }
 0x2a9   :  { %v2447_v1 = vsel %vm2437_vm9, %v2433_v32, 1326507024  ;;  %v5966_v13 = vmul.u32.u64.low %v5942_v24, %v2445_v51  ;;  %v5967_v53 = vmul.u32.u64.high %v5942_v24, %v2445_v51, %v5966_v13  ;;  %v3666_v55 = vadd.s32 4294967169, %v2510_v40 }
 0x2aa   :  { %v2448_v59 = vsel %vm2436_vm11, %v2430_v3, %v2447_v1  ;;  %v2288_v23 = vand.u32 3, %v2287_v28  ;;  %vm2300_vm14 = vcmp.lt.s32.totalorder %v5669_v2, 0  ;;  %vm3661_vm12 = vcmp.lt.s32.totalorder %v3660_v42, 0 }
 0x2ab   :  { %v2449_v48 = vsel %vm2435_vm10, %v2446_v5, %v2448_v59  ;;  %v2369_v34 = vsel %vm3661_vm12, 0, %v3660_v42  ;;  %v2516_v57 = vadd.s32 1, %v3666_v55  ;;  %v2354_v3 = vadd.s32 %v5869_v41, %v5879_v15 }
 0x2ac   :  { %v5973_v50 = vmul.u32.u64.low %v5942_v24, %v2449_v48  ;;  %v5974_v58 = vmul.u32.u64.high %v5942_v24, %v2449_v48, %v5973_v50  ;;  %v2370_v17 = vsub.s32 32, %v2369_v34  ;;  %v2374_v60 = vsub.s32 4294967266, %v2369_v34 }
 0x2ad   :  { %v2441_v45 = vsel %vm2435_vm10, %v2438_v63, %v2440_v39  ;;  %vm2286_vm13 = vweird.f32 %v5604_v21  ;;  %v2385_v28 = vsel %vm2300_vm14, %v2384_v33, %v5924_v7  ;;  %v2460_v40 = vadd.s32 1, %v5967_v53 }
 0x2ae   :  { %v2513_v0 = vand.u32 8388607, %v2506_v62  ;;  %vm2517_vm0 = vcmp.gt.s32.totalorder %v2516_v57, 0  ;;  %v2371_v22 = vshll.u32 %v5936_v9, %v2369_v34  ;;  %v2372_v32 = vshrl.u32 %v2354_v3, %v2370_v17 }
 0x2af   :  { %v2375_v41 = vadd.s32 127, %v2374_v60  ;;  %v2518_v15 = vsel %vm2517_vm0, %v2516_v57, 0  ;;  %vm2289_vm15 = vcmp.lt.s32.totalorder %v2288_v23, 2  ;;  %v2457_v27 = vmul.u32 %v5942_v24, %v2441_v45 }
 0x2b0   :  { %vm2459_vm2 = vc.u32 %v5974_v58, %v5966_v13  ;;  %v2520_v8 = vand.u32 31, %v2518_v15  ;;  %v3923_v29 = vpop.eup %3922  ;;  %v2373_v7 = vor.u32 %v2372_v32, %v2371_v22  ;;  %v2387_v20 = vsel %vm5957_vm8, 0, %v2385_v28 }
 0x2b1   :  { %v2376_v33 = vshll.u32 %v2375_v41, 23  ;;  %v2461_v11 = vsel %vm2459_vm2, %v2460_v40, %v5967_v53  ;;  %v3925_v49 = vpop.eup %3924  ;;  %vm2290_vm1 = vcmp.eq.s32.totalorder %v2288_v23, 0  ;;  %v2294_v9 = vxor.u32 2147483648, %v3923_v29 }
 0x2b2   :  { %v2462_v63 = vadd.s32 %v2461_v11, %v2457_v27  ;;  %v2521_v38 = vsub.s32 32, %v2520_v8  ;;  %v2291_v5 = vxor.u32 2147483648, %v3925_v49  ;;  %vm2293_vm3 = vcmp.eq.s32.totalorder %v2288_v23, 2 }
 0x2b3   :  { %v2377_v24 = vor.u32 4788187, %v2376_v33  ;;  %v2514_v42 = vor.u32 8388608, %v2513_v0  ;;  %v2295_v39 = vsel %vm2293_vm3, %v2294_v9, %v3925_v49  ;;  %v2391_v51 = vadd.s32 3, %v2387_v20 }
 0x2b4   :  { %v2463_v1 = vadd.s32 536870912, %v2462_v63  ;;  %v2613_v59 = vand.u32 2139095040, %v5910_v47  ;;  %v2292_v55 = vsel %vm2290_vm1, %v3923_v29, %v2291_v5  ;;  %v2380_v34 = vcvt.s32.f32 %v2373_v7 }
 0x2b5   :  { %v2378_v48 = vand.u32 2147483647, %v2377_v24  ;;  %v2519_v50 = vshrl.u32 %v2518_v15, 5  ;;  %v2296_v53 = vsel %vm2289_vm15, %v2292_v55, %v2295_v39  ;;  %v2524_v3 = vshrl.u32 %v6812_v61, %v2521_v38 }
 0x2b6   :  { %v5995_v57 = vshrl.u32 %v2463_v1, 30  ;;  %v2530_v17 = vshrl.u32 %v4002_v12, %v2521_v38  ;;  %v2297_v60 = vsel %vm2286_vm13, nan, %v2296_v53  ;;  %v2523_v28 = vshll.u32 %v3999_v4, %v2520_v8 }
 0x2b7   :  { %v2381_v45 = vmul.f32 %v2380_v34, %v2378_v48  ;;  %v2527_v40 = vshrl.u32 %v4001_v10, %v2521_v38  ;;  %v2526_v22 = vshll.u32 %v6812_v61, %v2520_v8  ;;  %v2529_v23 = vshll.u32 %v4001_v10, %v2520_v8  ;;  %3549 = vst [vmem:[#allocation2 + $0x98] sm:$0xff] %v2297_v60 }
 0x2b8   :  { %v2465_v0 = vshll.u32 %v5995_v57, 30  ;;  %v2533_v32 = vshrl.u32 %v4003_v14, %v2521_v38  ;;  %v2532_v15 = vshll.u32 %v4002_v12, %v2520_v8  ;;  %v2535_v21 = vshll.u32 %v4003_v14, %v2520_v8 }
 0x2b9   :  { %v2382_v41 = vxor.u32 2147483648, %v2381_v45  ;;  %v2536_v27 = vshrl.u32 %v6790_v44, %v2521_v38  ;;  %v6012_v29 = vadd.f32 %v5902_v54, %v4804_v56  ;;  %v2525_v33 = vor.u32 %v2524_v3, %v2523_v28 }
 0x2ba   :  { %v6014_v7 = vsub.s32 %v2462_v63, %v2465_v0  ;;  %v2531_v20 = vor.u32 %v2530_v17, %v2529_v23  ;;  %v2528_v49 = vor.u32 %v2527_v40, %v2526_v22  ;;  %v2534_v9 = vor.u32 %v2533_v32, %v2532_v15 }
 0x2bb   :  { %v2383_v11 = vsel %vm2300_vm14, %v2382_v41, %v2381_v45  ;;  %v2537_v5 = vor.u32 %v2536_v27, %v2535_v21  ;;  %v6021_v24 = vand.u32 3, %v2391_v51  ;;  %v2554_v56 = vshll.u32 %v2514_v42, 8 }
 0x2bc   :  { %v2386_v8 = vsel %vm5957_vm8, %v5669_v2, %v2383_v11  ;;  %v2468_v39 = vsub.s32 0, %v6014_v7  ;;  %v2522_v54 = vshrl.u32 %v3999_v4, %v2521_v38  ;;  %vm2541_vm4 = vcmp.lt.s32.totalorder %v2519_v50, 4 }
 0x2bd   :  { %3926 = vcosq.f32 %v2386_v8  ;;  %v2614_v63 = vshrl.u32 %v2613_v59, 23  ;;  %vm2538_vm5 = vcmp.lt.s32.totalorder %v2519_v50, 1  ;;  %v2543_v55 = vsel %vm2541_vm4, %v2531_v20, 2102212464 }
 0x2be   :  { %3928 = vsinq.f32 %v2386_v8  ;;  %v3663_v1 = vmin.u32 %v2468_v39, %v6014_v7  ;;  %v2546_v48 = vsel %vm2538_vm5, %v2525_v33, %v2528_v49  ;;  %v2547_v34 = vsel %vm2541_vm4, %v2534_v9, 920167782 }
 0x2bf   :  { %v2550_v53 = vsel %vm2538_vm5, %v2528_v49, %v2531_v20  ;;  %v2551_v52 = vsel %vm2541_vm4, %v2537_v5, 1326507024  ;;  %vm2539_vm6 = vcmp.lt.s32.totalorder %v2519_v50, 2  ;;  %vm2540_vm7 = vcmp.lt.s32.totalorder %v2519_v50, 3 }
 0x2c0   :  { %v2470_v3 = vclz %v3663_v1  ;;  %v2542_v51 = vsel %vm2538_vm5, %v2522_v54, %v2525_v33  ;;  %v2544_v17 = vsel %vm2540_vm7, %v2528_v49, %v2543_v55  ;;  %v2548_v42 = vsel %vm2540_vm7, %v2531_v20, %v2547_v34 }
 0x2c1   :  { %v2552_v60 = vsel %vm2540_vm7, %v2534_v9, %v2551_v52  ;;  %v3670_v45 = vadd.s32 4294967169, %v2614_v63  ;;  %vm2404_vm9 = vcmp.lt.s32.totalorder %v5699_v16, 0  ;;  %v2549_v59 = vsel %vm2539_vm6, %v2546_v48, %v2548_v42 }
 0x2c2   :  { %v3664_v38 = vadd.s32 4294967294, %v2470_v3  ;;  %v2553_v28 = vsel %vm2539_vm6, %v2550_v53, %v2552_v60  ;;  %v6032_v22 = vmul.u32.u64.low %v2554_v56, %v2549_v59  ;;  %v6033_v23 = vmul.u32.u64.high %v2554_v56, %v2549_v59, %v6032_v22 }
 0x2c3   :  { %v6029_v40 = vmul.u32.u64.low %v2554_v56, %v2553_v28  ;;  %v6030_v0 = vmul.u32.u64.high %v2554_v56, %v2553_v28, %v6029_v40  ;;  %vm2390_vm10 = vweird.f32 %v5669_v2  ;;  %vm2394_vm11 = vcmp.eq.s32.totalorder %v6021_v24, 0 }
 0x2c4   :  { %vm3665_vm8 = vcmp.lt.s32.totalorder %v3664_v38, 0  ;;  %v2545_v32 = vsel %vm2539_vm6, %v2542_v51, %v2544_v17  ;;  %v2620_v41 = vadd.s32 1, %v3670_v45  ;;  %vm2397_vm14 = vcmp.eq.s32.totalorder %v6021_v24, 2 }
 0x2c5   :  { %v2473_v15 = vsel %vm3665_vm8, 0, %v3664_v38  ;;  %v2488_v21 = vsub.s32 4, %v5995_v57  ;;  %v2610_v27 = vand.u32 2147483647, %v5910_v47  ;;  %v2458_v33 = vadd.s32 %v5966_v13, %v5974_v58 }
 0x2c6   :  { %v2474_v20 = vsub.s32 32, %v2473_v15  ;;  %v2478_v11 = vsub.s32 4294967266, %v2473_v15  ;;  %vm2621_vm12 = vcmp.gt.s32.totalorder %v2620_v41, 0  ;;  %v2561_v9 = vmul.u32 %v2554_v56, %v2545_v32 }
 0x2c7   :  { %v3927_v49 = vpop.eup %3926  ;;  %vm2563_vm13 = vc.u32 %v6030_v0, %v6032_v22  ;;  %v2564_v50 = vadd.s32 1, %v6033_v23  ;;  %v2622_v5 = vsel %vm2621_vm12, %v2620_v41, 0  ;;  %v2475_v54 = vshll.u32 %v6014_v7, %v2473_v15 }
 0x2c8   :  { %v3929_v8 = vpop.eup %3928  ;;  %v2398_v39 = vxor.u32 2147483648, %v3927_v49  ;;  %v2476_v63 = vshrl.u32 %v2458_v33, %v2474_v20  ;;  %v2479_v1 = vadd.s32 127, %v2478_v11  ;;  %v2489_v13 = vsel %vm2404_vm9, %v2488_v21, %v5995_v57 }
 0x2c9   :  { %v2395_v55 = vxor.u32 2147483648, %v3929_v8  ;;  %v2565_v58 = vsel %vm2563_vm13, %v2564_v50, %v6033_v23  ;;  %v2624_v56 = vand.u32 31, %v2622_v5  ;;  %vm2393_vm0 = vcmp.lt.s32.totalorder %v6021_v24, 2 }
 0x2ca   :  { %v2399_v48 = vsel %vm2397_vm14, %v2398_v39, %v3929_v8  ;;  %v2477_v34 = vor.u32 %v2476_v63, %v2475_v54  ;;  %v2480_v53 = vshll.u32 %v2479_v1, 23  ;;  %v2566_v52 = vadd.s32 %v2565_v58, %v2561_v9 }
 0x2cb   :  { %v2396_v7 = vsel %vm2394_vm11, %v3927_v49, %v2395_v55  ;;  %vm6059_vm15 = vcmp.le.f32.partialorder %v2402_v43, 0.7853982  ;;  %v2625_v57 = vsub.s32 32, %v2624_v56  ;;  %v2617_v60 = vand.u32 8388607, %v2610_v27 }
 0x2cc   :  { %v2400_v51 = vsel %vm2393_vm0, %v2396_v7, %v2399_v48  ;;  %v2481_v17 = vor.u32 4788187, %v2480_v53  ;;  %v2567_v42 = vadd.s32 536870912, %v2566_v52  ;;  %v2484_v38 = vcvt.s32.f32 %v2477_v34 }
 0x2cd   :  { %v2401_v45 = vsel %vm2390_vm10, nan, %v2400_v51  ;;  %v2491_v24 = vsel %vm6059_vm15, 0, %v2489_v13  ;;  %v2628_v59 = vshrl.u32 %v6812_v61, %v2625_v57  ;;  %v2631_v40 = vshrl.u32 %v4001_v10, %v2625_v57 }
 0x2ce   :  { %v2482_v43 = vand.u32 2147483647, %v2481_v17  ;;  %v2568_v28 = vshrl.u32 %v2567_v42, 30  ;;  %v2634_v23 = vshrl.u32 %v4002_v12, %v2625_v57  ;;  %3550 = vst [vmem:[#allocation2 + $0xa0] sm:$0xff] %v2401_v45  ;;  %v2623_v32 = vshrl.u32 %v2622_v5, 5 }
 0x2cf   :  { %v2627_v41 = vshll.u32 %v3999_v4, %v2624_v56  ;;  %v2636_v15 = vshll.u32 %v4002_v12, %v2624_v56  ;;  %v2637_v2 = vshrl.u32 %v4003_v14, %v2625_v57  ;;  %v2630_v20 = vshll.u32 %v6812_v61, %v2624_v56 }
 0x2d0   :  { %v2485_v21 = vmul.f32 %v2484_v38, %v2482_v43  ;;  %v2569_v33 = vshll.u32 %v2568_v28, 30  ;;  %v2633_v11 = vshll.u32 %v4001_v10, %v2624_v56  ;;  %v2495_v49 = vadd.s32 3, %v2491_v24 }
 0x2d1   :  { %v2629_v9 = vor.u32 %v2628_v59, %v2627_v41  ;;  %v2638_v50 = vor.u32 %v2637_v2, %v2636_v15  ;;  %v2640_v8 = vshrl.u32 %v6790_v44, %v2625_v57  ;;  %vm2508_vm2 = vcmp.lt.s32.totalorder %v5836_v18, 0 }
 0x2d2   :  { %v2486_v39 = vxor.u32 2147483648, %v2485_v21  ;;  %v6079_v5 = vsub.s32 %v2566_v52, %v2569_v33  ;;  %v2632_v54 = vor.u32 %v2631_v40, %v2630_v20  ;;  %v2635_v63 = vor.u32 %v2634_v23, %v2633_v11 }
 0x2d3   :  { %v2618_v1 = vor.u32 8388608, %v2617_v60  ;;  %v2626_v55 = vshrl.u32 %v3999_v4, %v2625_v57  ;;  %v2639_v13 = vshll.u32 %v4003_v14, %v2624_v56  ;;  %v2717_v58 = vand.u32 2139095040, %v5914_v19 }
 0x2d4   :  { %v2487_v48 = vsel %vm2404_vm9, %v2486_v39, %v2485_v21  ;;  %v2572_v34 = vsub.s32 0, %v6079_v5  ;;  %vm2642_vm1 = vcmp.lt.s32.totalorder %v2623_v32, 1  ;;  %vm2645_vm3 = vcmp.lt.s32.totalorder %v2623_v32, 4 }
 0x2d5   :  { %v2490_v53 = vsel %vm6059_vm15, %v5699_v16, %v2487_v48  ;;  %v2641_v52 = vor.u32 %v2640_v8, %v2639_v13  ;;  %vm2644_vm4 = vcmp.lt.s32.totalorder %v2623_v32, 3  ;;  %v2651_v7 = vsel %vm2645_vm3, %v2638_v50, 920167782 }
 0x2d6   :  { %3930 = vcosq.f32 %v2490_v53  ;;  %v3667_v56 = vmin.u32 %v2572_v34, %v6079_v5  ;;  %v2647_v57 = vsel %vm2645_vm3, %v2635_v63, 2102212464  ;;  %v2650_v51 = vsel %vm2642_vm1, %v2629_v9, %v2632_v54 }
 0x2d7   :  { %3932 = vsinq.f32 %v2490_v53  ;;  %v2592_v17 = vsub.s32 4, %v2568_v28  ;;  %v2652_v42 = vsel %vm2644_vm4, %v2635_v63, %v2651_v7  ;;  %v2658_v60 = vshll.u32 %v2618_v1, 8 }
 0x2d8   :  { %v2574_v45 = vclz %v3667_v56  ;;  %vm2643_vm5 = vcmp.lt.s32.totalorder %v2623_v32, 2  ;;  %v2646_v3 = vsel %vm2642_vm1, %v2626_v55, %v2629_v9  ;;  %v2654_v38 = vsel %vm2642_vm1, %v2632_v54, %v2635_v63 }
 0x2d9   :  { %v2648_v24 = vsel %vm2644_vm4, %v2632_v54, %v2647_v57  ;;  %v2653_v59 = vsel %vm2643_vm5, %v2650_v51, %v2652_v42  ;;  %v2655_v43 = vsel %vm2645_vm3, %v2641_v52, 1326507024  ;;  %v2718_v40 = vshrl.u32 %v2717_v58, 23 }
 0x2da   :  { %v3668_v23 = vadd.s32 4294967294, %v2574_v45  ;;  %v2656_v41 = vsel %vm2644_vm4, %v2638_v50, %v2655_v43  ;;  %v6100_v15 = vmul.u32.u64.low %v2658_v60, %v2653_v59  ;;  %v6101_v2 = vmul.u32.u64.high %v2658_v60, %v2653_v59, %v6100_v15 }
 0x2db   :  { %v2496_v21 = vand.u32 3, %v2495_v49  ;;  %v2593_v33 = vsel %vm2508_vm2, %v2592_v17, %v2568_v28  ;;  %v2657_v20 = vsel %vm2643_vm5, %v2654_v38, %v2656_v41  ;;  %v3674_v11 = vadd.s32 4294967169, %v2718_v40 }
 0x2dc   :  { %vm3669_vm6 = vcmp.lt.s32.totalorder %v3668_v23, 0  ;;  %v2649_v9 = vsel %vm2643_vm5, %v2646_v3, %v2648_v24  ;;  %v6106_v8 = vmul.u32.u64.low %v2658_v60, %v2657_v20  ;;  %v6107_v39 = vmul.u32.u64.high %v2658_v60, %v2657_v20, %v6106_v8 }
 0x2dd   :  { %vm2494_vm7 = vweird.f32 %v5699_v16  ;;  %vm6112_vm9 = vcmp.le.f32.partialorder %v2506_v62, 0.7853982  ;;  %v2577_v50 = vsel %vm3669_vm6, 0, %v3668_v23  ;;  %v2714_v49 = vand.u32 2147483647, %v5914_v19 }
 0x2de   :  { %v2724_v54 = vadd.s32 1, %v3674_v11  ;;  %v2562_v28 = vadd.s32 %v6032_v22, %v6030_v0  ;;  %v2578_v63 = vsub.s32 32, %v2577_v50  ;;  %v2582_v1 = vsub.s32 4294967266, %v2577_v50 }
 0x2df   :  { %v2668_v55 = vadd.s32 1, %v6101_v2  ;;  %vm2501_vm10 = vcmp.eq.s32.totalorder %v2496_v21, 2  ;;  %v2595_v13 = vsel %vm6112_vm9, 0, %v2593_v33  ;;  %v2665_v58 = vmul.u32 %v2658_v60, %v2649_v9 }
 0x2e0   :  { %vm2725_vm11 = vcmp.gt.s32.totalorder %v2724_v54, 0  ;;  %v3931_v62 = vpop.eup %3930  ;;  %v2579_v48 = vshll.u32 %v6079_v5, %v2577_v50  ;;  %v2580_v34 = vshrl.u32 %v2562_v28, %v2578_v63  ;;  %v2583_v53 = vadd.s32 127, %v2582_v1 }
 0x2e1   :  { %vm2667_vm8 = vc.u32 %v6107_v39, %v6100_v15  ;;  %v3933_v52 = vpop.eup %3932  ;;  %v2502_v0 = vxor.u32 2147483648, %v3931_v62  ;;  %v2721_v7 = vand.u32 8388607, %v2714_v49  ;;  %v2726_v56 = vsel %vm2725_vm11, %v2724_v54, 0 }
 0x2e2   :  { %v2669_v22 = vsel %vm2667_vm8, %v2668_v55, %v6101_v2  ;;  %v2499_v57 = vxor.u32 2147483648, %v3933_v52  ;;  %v2581_v51 = vor.u32 %v2580_v34, %v2579_v48  ;;  %v2584_v17 = vshll.u32 %v2583_v53, 23 }
 0x2e3   :  { %v2670_v42 = vadd.s32 %v2669_v22, %v2665_v58  ;;  %vm2498_vm14 = vcmp.eq.s32.totalorder %v2496_v21, 0  ;;  %v2503_v5 = vsel %vm2501_vm10, %v2502_v0, %v3933_v52  ;;  %v2728_v60 = vand.u32 31, %v2726_v56 }
 0x2e4   :  { %v2821_v45 = vand.u32 2139095040, %v5918_v25  ;;  %vm2497_vm12 = vcmp.lt.s32.totalorder %v2496_v21, 2  ;;  %v2500_v3 = vsel %vm2498_vm14, %v3931_v62, %v2499_v57  ;;  %v2585_v38 = vor.u32 4788187, %v2584_v17 }
 0x2e5   :  { %v2671_v24 = vadd.s32 536870912, %v2670_v42  ;;  %v2504_v59 = vsel %vm2497_vm12, %v2500_v3, %v2503_v5  ;;  %v2599_v43 = vadd.s32 3, %v2595_v13  ;;  %v2722_v40 = vor.u32 8388608, %v2721_v7 }
 0x2e6   :  { %v2729_v23 = vsub.s32 32, %v2728_v60  ;;  %v2505_v41 = vsel %vm2494_vm7, nan, %v2504_v59  ;;  %v2586_v2 = vand.u32 2147483647, %v2585_v38  ;;  %v2588_v33 = vcvt.s32.f32 %v2581_v51 }
 0x2e7   :  { %v6132_v20 = vshrl.u32 %v2671_v24, 30  ;;  %v2822_v8 = vshrl.u32 %v2821_v45, 23  ;;  %3551 = vst [vmem:[#allocation2 + $0xa8] sm:$0xff] %v2505_v41  ;;  %v2731_v28 = vshll.u32 %v3999_v4, %v2728_v60  ;;  %v2734_v16 = vshll.u32 %v6812_v61, %v2728_v60 }
 0x2e8   :  { %v2732_v11 = vshrl.u32 %v6812_v61, %v2729_v23  ;;  %v2735_v9 = vshrl.u32 %v4001_v10, %v2729_v23  ;;  %v2738_v21 = vshrl.u32 %v4002_v12, %v2729_v23  ;;  %v2589_v50 = vmul.f32 %v2588_v33, %v2586_v2 }
 0x2e9   :  { %v2673_v54 = vshll.u32 %v6132_v20, 30  ;;  %v2727_v63 = vshrl.u32 %v2726_v56, 5  ;;  %v2737_v1 = vshll.u32 %v4001_v10, %v2728_v60  ;;  %v2740_v55 = vshll.u32 %v4002_v12, %v2728_v60 }
 0x2ea   :  { %v2741_v13 = vshrl.u32 %v4003_v14, %v2729_v23  ;;  %v2590_v58 = vxor.u32 2147483648, %v2589_v50  ;;  %v2733_v48 = vor.u32 %v2732_v11, %v2731_v28  ;;  %v2736_v34 = vor.u32 %v2735_v9, %v2734_v16 }
 0x2eb   :  { %v6143_v62 = vsub.s32 %v2670_v42, %v2673_v54  ;;  %v2739_v53 = vor.u32 %v2738_v21, %v2737_v1  ;;  %v2743_v0 = vshll.u32 %v4003_v14, %v2728_v60  ;;  %v2744_v22 = vshrl.u32 %v6790_v44, %v2729_v23 }
 0x2ec   :  { %v2742_v52 = vor.u32 %v2741_v13, %v2740_v55  ;;  %v2591_v7 = vsel %vm2508_vm2, %v2590_v58, %v2589_v50  ;;  %v6149_v56 = vand.u32 3, %v2599_v43  ;;  %v2762_v51 = vshll.u32 %v2722_v40, 8 }
 0x2ed   :  { %v2676_v57 = vsub.s32 0, %v6143_v62  ;;  %v2594_v17 = vsel %vm6112_vm9, %v5836_v18, %v2591_v7  ;;  %v2730_v42 = vshrl.u32 %v3999_v4, %v2729_v23  ;;  %v2745_v5 = vor.u32 %v2744_v22, %v2743_v0 }
 0x2ee   :  { %v3678_v45 = vadd.s32 4294967169, %v2822_v8  ;;  %3934 = vcosq.f32 %v2594_v17  ;;  %vm2746_vm13 = vcmp.lt.s32.totalorder %v2727_v63, 1  ;;  %vm2749_vm0 = vcmp.lt.s32.totalorder %v2727_v63, 4 }
 0x2ef   :  { %v3671_v60 = vmin.u32 %v2676_v57, %v6143_v62  ;;  %3936 = vsinq.f32 %v2594_v17  ;;  %v2751_v3 = vsel %vm2749_vm0, %v2739_v53, 2102212464  ;;  %v2754_v38 = vsel %vm2746_vm13, %v2733_v48, %v2736_v34 }
 0x2f0   :  { %v2755_v24 = vsel %vm2749_vm0, %v2742_v52, 920167782  ;;  %vm2747_vm15 = vcmp.lt.s32.totalorder %v2727_v63, 2  ;;  %vm2748_vm2 = vcmp.lt.s32.totalorder %v2727_v63, 3  ;;  %v2750_v43 = vsel %vm2746_vm13, %v2730_v42, %v2733_v48 }
 0x2f1   :  { %v2678_v59 = vclz %v3671_v60  ;;  %v2752_v40 = vsel %vm2748_vm2, %v2736_v34, %v2751_v3  ;;  %v2756_v32 = vsel %vm2748_vm2, %v2739_v53, %v2755_v24  ;;  %v2758_v41 = vsel %vm2746_vm13, %v2736_v34, %v2739_v53 }
 0x2f2   :  { %v2759_v2 = vsel %vm2749_vm0, %v2745_v5, 1326507024  ;;  %v2696_v33 = vsub.s32 4, %v6132_v20  ;;  %v2757_v11 = vsel %vm2747_vm15, %v2754_v38, %v2756_v32  ;;  %vm6160_vm1 = vcmp.le.f32.partialorder %v2610_v27, 0.7853982 }
 0x2f3   :  { %v3672_v23 = vadd.s32 4294967294, %v2678_v59  ;;  %v2760_v9 = vsel %vm2748_vm2, %v2742_v52, %v2759_v2  ;;  %v6164_v50 = vmul.u32.u64.low %v2762_v51, %v2757_v11  ;;  %v6165_v54 = vmul.u32.u64.high %v2762_v51, %v2757_v11, %v6164_v50 }
 0x2f4   :  { %v2761_v8 = vsel %vm2747_vm15, %v2758_v41, %v2760_v9  ;;  %v2753_v28 = vsel %vm2747_vm15, %v2750_v43, %v2752_v40  ;;  %vm2605_vm4 = vcmp.eq.s32.totalorder %v6149_v56, 2  ;;  %vm2612_vm5 = vcmp.lt.s32.totalorder %v5910_v47, 0 }
 0x2f5   :  { %vm3673_vm3 = vcmp.lt.s32.totalorder %v3672_v23, 0  ;;  %v6168_v16 = vmul.u32.u64.low %v2762_v51, %v2761_v8  ;;  %v6169_v63 = vmul.u32.u64.high %v2762_v51, %v2761_v8, %v6168_v16  ;;  %v2828_v55 = vadd.s32 1, %v3678_v45 }
 0x2f6   :  { %v2681_v1 = vsel %vm3673_vm3, 0, %v3672_v23  ;;  %v2666_v27 = vadd.s32 %v6100_v15, %v6107_v39  ;;  %v2697_v48 = vsel %vm2612_vm5, %v2696_v33, %v6132_v20  ;;  %v2769_v34 = vmul.u32 %v2762_v51, %v2753_v28 }
 0x2f7   :  { %v2682_v13 = vsub.s32 32, %v2681_v1  ;;  %v2686_v58 = vsub.s32 4294967266, %v2681_v1  ;;  %v2772_v53 = vadd.s32 1, %v6165_v54  ;;  %v2818_v52 = vand.u32 2147483647, %v5918_v25 }
 0x2f8   :  { %vm2829_vm6 = vcmp.gt.s32.totalorder %v2828_v55, 0  ;;  %v3935_v0 = vpop.eup %3934  ;;  %v2683_v22 = vshll.u32 %v6143_v62, %v2681_v1  ;;  %vm2771_vm7 = vc.u32 %v6169_v63, %v6164_v50  ;;  %v2699_v17 = vsel %vm6160_vm1, 0, %v2697_v48 }
 0x2f9   :  { %v2684_v7 = vshrl.u32 %v2666_v27, %v2682_v13  ;;  %v2687_v57 = vadd.s32 127, %v2686_v58  ;;  %v3937_v15 = vpop.eup %3936  ;;  %v2606_v39 = vxor.u32 2147483648, %v3935_v0  ;;  %v2773_v20 = vsel %vm2771_vm7, %v2772_v53, %v6165_v54 }
 0x2fa   :  { %v2830_v51 = vsel %vm2829_vm6, %v2828_v55, 0  ;;  %v2603_v42 = vxor.u32 2147483648, %v3937_v15  ;;  %v2774_v60 = vadd.s32 %v2773_v20, %v2769_v34  ;;  %vm2602_vm9 = vcmp.eq.s32.totalorder %v6149_v56, 0 }
 0x2fb   :  { %v2685_v5 = vor.u32 %v2684_v7, %v2683_v22  ;;  %v2688_v45 = vshll.u32 %v2687_v57, 23  ;;  %v2607_v62 = vsel %vm2605_vm4, %v2606_v39, %v3937_v15  ;;  %v2825_v3 = vand.u32 8388607, %v2818_v52 }
 0x2fc   :  { %v2832_v38 = vand.u32 31, %v2830_v51  ;;  %vm2601_vm10 = vcmp.lt.s32.totalorder %v6149_v56, 2  ;;  %v2604_v24 = vsel %vm2602_vm9, %v3935_v0, %v2603_v42  ;;  %v2775_v43 = vadd.s32 536870912, %v2774_v60 }
 0x2fd   :  { %v2689_v59 = vor.u32 4788187, %v2688_v45  ;;  %vm2598_vm11 = vweird.f32 %v5836_v18  ;;  %v2608_v40 = vsel %vm2601_vm10, %v2604_v24, %v2607_v62  ;;  %v2703_v32 = vadd.s32 3, %v2699_v17 }
 0x2fe   :  { %v2833_v41 = vsub.s32 32, %v2832_v38  ;;  %v2609_v2 = vsel %vm2598_vm11, nan, %v2608_v40  ;;  %v2692_v33 = vcvt.s32.f32 %v2685_v5  ;;  %v6193_v11 = vshrl.u32 %v2775_v43, 30 }
 0x2ff   :  { %v2690_v23 = vand.u32 2147483647, %v2689_v59  ;;  %v2826_v9 = vor.u32 8388608, %v2825_v3  ;;  %3552 = vst [vmem:[#allocation2 + $0xb0] sm:$0xff] %v2609_v2  ;;  %v2835_v18 = vshll.u32 %v3999_v4, %v2832_v38  ;;  %v2838_v1 = vshll.u32 %v6812_v61, %v2832_v38 }
 0x300   :  { %v2836_v8 = vshrl.u32 %v6812_v61, %v2833_v41  ;;  %v2839_v54 = vshrl.u32 %v4001_v10, %v2833_v41  ;;  %v2842_v56 = vshrl.u32 %v4002_v12, %v2833_v41  ;;  %v2777_v16 = vshll.u32 %v6193_v11, 30 }
 0x301   :  { %v2693_v28 = vmul.f32 %v2692_v33, %v2690_v23  ;;  %v2831_v55 = vshrl.u32 %v2830_v51, 5  ;;  %v2841_v27 = vshll.u32 %v4001_v10, %v2832_v38  ;;  %v2844_v13 = vshll.u32 %v4002_v12, %v2832_v38 }
 0x302   :  { %v2845_v58 = vshrl.u32 %v4003_v14, %v2833_v41  ;;  %v6204_v34 = vsub.s32 %v2774_v60, %v2777_v16  ;;  %v2837_v53 = vor.u32 %v2836_v8, %v2835_v18  ;;  %v2840_v0 = vor.u32 %v2839_v54, %v2838_v1 }
 0x303   :  { %v2694_v48 = vxor.u32 2147483648, %v2693_v28  ;;  %v2843_v22 = vor.u32 %v2842_v56, %v2841_v27  ;;  %v2847_v57 = vshll.u32 %v4003_v14, %v2832_v38  ;;  %v2848_v15 = vshrl.u32 %v6790_v44, %v2833_v41 }
 0x304   :  { %v2846_v7 = vor.u32 %v2845_v58, %v2844_v13  ;;  %v6210_v17 = vand.u32 3, %v2703_v32  ;;  %v2780_v20 = vsub.s32 0, %v6204_v34  ;;  %v2866_v51 = vshll.u32 %v2826_v9, 8 }
 0x305   :  { %v2695_v39 = vsel %vm2612_vm5, %v2694_v48, %v2693_v28  ;;  %v2834_v5 = vshrl.u32 %v3999_v4, %v2833_v41  ;;  %v2849_v45 = vor.u32 %v2848_v15, %v2847_v57  ;;  %v2925_v60 = vand.u32 2139095040, %v5922_v36 }
 0x306   :  { %v2698_v42 = vsel %vm6160_vm1, %v5910_v47, %v2695_v39  ;;  %v3675_v62 = vmin.u32 %v2780_v20, %v6204_v34  ;;  %vm2850_vm8 = vcmp.lt.s32.totalorder %v2831_v55, 1  ;;  %vm2853_vm14 = vcmp.lt.s32.totalorder %v2831_v55, 4 }
 0x307   :  { %3938 = vcosq.f32 %v2698_v42  ;;  %v2855_v3 = vsel %vm2853_vm14, %v2843_v22, 2102212464  ;;  %v2858_v38 = vsel %vm2850_vm8, %v2837_v53, %v2840_v0  ;;  %v2859_v24 = vsel %vm2853_vm14, %v2846_v7, 920167782 }
 0x308   :  { %3940 = vsinq.f32 %v2698_v42  ;;  %v2782_v59 = vclz %v3675_v62  ;;  %vm2851_vm12 = vcmp.lt.s32.totalorder %v2831_v55, 2  ;;  %vm2852_vm13 = vcmp.lt.s32.totalorder %v2831_v55, 3 }
 0x309   :  { %v2854_v43 = vsel %vm2850_vm8, %v2834_v5, %v2837_v53  ;;  %v2856_v21 = vsel %vm2852_vm13, %v2840_v0, %v2855_v3  ;;  %v2860_v40 = vsel %vm2852_vm13, %v2843_v22, %v2859_v24  ;;  %v2862_v32 = vsel %vm2850_vm8, %v2840_v0, %v2843_v22 }
 0x30a   :  { %v2863_v41 = vsel %vm2853_vm14, %v2849_v45, 1326507024  ;;  %v3676_v2 = vadd.s32 4294967294, %v2782_v59  ;;  %v2800_v23 = vsub.s32 4, %v6193_v11  ;;  %v2861_v33 = vsel %vm2851_vm12, %v2858_v38, %v2860_v40 }
 0x30b   :  { %v2864_v9 = vsel %vm2852_vm13, %v2846_v7, %v2863_v41  ;;  %v2857_v8 = vsel %vm2851_vm12, %v2854_v43, %v2856_v21  ;;  %v6220_v56 = vmul.u32.u64.low %v2866_v51, %v2861_v33  ;;  %v6221_v28 = vmul.u32.u64.high %v2866_v51, %v2861_v33, %v6220_v56 }
 0x30c   :  { %v2865_v54 = vsel %vm2851_vm12, %v2862_v32, %v2864_v9  ;;  %vm3677_vm0 = vcmp.lt.s32.totalorder %v3676_v2, 0  ;;  %v2926_v1 = vshrl.u32 %v2925_v60, 23  ;;  %vm2702_vm15 = vweird.f32 %v5910_v47 }
 0x30d   :  { %v6224_v16 = vmul.u32.u64.low %v2866_v51, %v2865_v54  ;;  %v6225_v18 = vmul.u32.u64.high %v2866_v51, %v2865_v54, %v6224_v16  ;;  %vm6230_vm2 = vcmp.le.f32.partialorder %v2714_v49, 0.7853982  ;;  %vm2716_vm1 = vcmp.lt.s32.totalorder %v5914_v19, 0 }
 0x30e   :  { %v2770_v27 = vadd.s32 %v6164_v50, %v6169_v63  ;;  %v2785_v13 = vsel %vm3677_vm0, 0, %v3676_v2  ;;  %v2801_v53 = vsel %vm2716_vm1, %v2800_v23, %v6193_v11  ;;  %v3682_v0 = vadd.s32 4294967169, %v2926_v1 }
 0x30f   :  { %v2786_v58 = vsub.s32 32, %v2785_v13  ;;  %v2790_v48 = vsub.s32 4294967266, %v2785_v13  ;;  %vm2709_vm3 = vcmp.eq.s32.totalorder %v6210_v17, 2  ;;  %v2873_v22 = vmul.u32 %v2866_v51, %v2857_v8 }
 0x310   :  { %v2876_v49 = vadd.s32 1, %v6221_v28  ;;  %v2922_v7 = vand.u32 2147483647, %v5922_v36  ;;  %v2787_v15 = vshll.u32 %v6204_v34, %v2785_v13  ;;  %vm2875_vm4 = vc.u32 %v6225_v18, %v6220_v56 }
 0x311   :  { %v3939_v57 = vpop.eup %3938  ;;  %v2788_v39 = vshrl.u32 %v2770_v27, %v2786_v58  ;;  %v2791_v50 = vadd.s32 127, %v2790_v48  ;;  %v2803_v11 = vsel %vm6230_vm2, 0, %v2801_v53  ;;  %v2932_v51 = vadd.s32 1, %v3682_v0 }
 0x312   :  { %v3941_v63 = vpop.eup %3940  ;;  %v2710_v20 = vxor.u32 2147483648, %v3939_v57  ;;  %v2877_v42 = vsel %vm2875_vm4, %v2876_v49, %v6221_v28  ;;  %vm2705_vm5 = vcmp.lt.s32.totalorder %v6210_v17, 2  ;;  %vm2706_vm6 = vcmp.eq.s32.totalorder %v6210_v17, 0 }
 0x313   :  { %v2707_v5 = vxor.u32 2147483648, %v3941_v63  ;;  %v2789_v45 = vor.u32 %v2788_v39, %v2787_v15  ;;  %v2792_v60 = vshll.u32 %v2791_v50, 23  ;;  %v2878_v62 = vadd.s32 %v2877_v42, %v2873_v22 }
 0x314   :  { %v2711_v34 = vsel %vm2709_vm3, %v2710_v20, %v3941_v63  ;;  %vm2933_vm7 = vcmp.gt.s32.totalorder %v2932_v51, 0  ;;  %v2807_v24 = vadd.s32 3, %v2803_v11  ;;  %v2929_v21 = vand.u32 8388607, %v2922_v7 }
 0x315   :  { %v2708_v3 = vsel %vm2706_vm6, %v3939_v57, %v2707_v5  ;;  %v2793_v38 = vor.u32 4788187, %v2792_v60  ;;  %v2879_v59 = vadd.s32 536870912, %v2878_v62  ;;  %v2934_v40 = vsel %vm2933_vm7, %v2932_v51, 0 }
 0x316   :  { %v2712_v43 = vsel %vm2705_vm5, %v2708_v3, %v2711_v34  ;;  %v3029_v32 = vand.u32 2139095040, %v6012_v29  ;;  %v2796_v23 = vcvt.s32.f32 %v2789_v45  ;;  %v6262_v17 = vmul.f32 %v5426_v37, %v4108_v30 }
 0x317   :  { %v2713_v41 = vsel %vm2702_vm15, nan, %v2712_v43  ;;  %v2794_v2 = vand.u32 2147483647, %v2793_v38  ;;  %v6258_v33 = vshrl.u32 %v2879_v59, 30  ;;  %v6266_v9 = vmul.f32 %v5415_v46, %v4110_v31 }
 0x318   :  { %v2936_v8 = vand.u32 31, %v2934_v40  ;;  %3553 = vst [vmem:[#allocation2 + $0xb8] sm:$0xff] %v2713_v41  ;;  %v6270_v54 = vmul.f32 %v5426_v37, %v4110_v31  ;;  %v6274_v47 = vadd.f32 %v5906_v26, %v5002_v35  ;;  %v6277_v1 = vand.u32 3, %v2807_v24 }
 0x319   :  { %v2797_v28 = vmul.f32 %v2796_v23, %v2794_v2  ;;  %v2881_v16 = vshll.u32 %v6258_v33, 30  ;;  %v2930_v30 = vor.u32 8388608, %v2929_v21  ;;  %v3026_v46 = vand.u32 2147483647, %v6012_v29 }
 0x31a   :  { %v2937_v27 = vsub.s32 32, %v2936_v8  ;;  %v6282_v48 = vshrl.u32 %v2934_v40, 5  ;;  %v3030_v31 = vshrl.u32 %v3029_v32, 23  ;;  %v2939_v37 = vshll.u32 %v3999_v4, %v2936_v8 }
 0x31b   :  { %v2798_v13 = vxor.u32 2147483648, %v2797_v28  ;;  %v6280_v58 = vsub.s32 %v2878_v62, %v2881_v16  ;;  %v2942_v53 = vshll.u32 %v6812_v61, %v2936_v8  ;;  %v2945_v57 = vshll.u32 %v4001_v10, %v2936_v8 }
 0x31c   :  { %v2940_v26 = vshrl.u32 %v6812_v61, %v2937_v27  ;;  %v2943_v0 = vshrl.u32 %v4001_v10, %v2937_v27  ;;  %v2946_v15 = vshrl.u32 %v4002_v12, %v2937_v27  ;;  %v2948_v63 = vshll.u32 %v4002_v12, %v2936_v8 }
 0x31d   :  { %v2799_v22 = vsel %vm2716_vm1, %v2798_v13, %v2797_v28  ;;  %v2884_v49 = vsub.s32 0, %v6280_v58  ;;  %v2949_v20 = vshrl.u32 %v4003_v14, %v2937_v27  ;;  %v2951_v45 = vshll.u32 %v4003_v14, %v2936_v8 }
 0x31e   :  { %v2802_v39 = vsel %vm6230_vm2, %v5914_v19, %v2799_v22  ;;  %v2941_v50 = vor.u32 %v2940_v26, %v2939_v37  ;;  %v2944_v42 = vor.u32 %v2943_v0, %v2942_v53  ;;  %v2947_v51 = vor.u32 %v2946_v15, %v2945_v57 }
 0x31f   :  { %3942 = vcosq.f32 %v2802_v39  ;;  %v3679_v11 = vmin.u32 %v2884_v49, %v6280_v58  ;;  %v2950_v5 = vor.u32 %v2949_v20, %v2948_v63  ;;  %v2952_v60 = vshrl.u32 %v6790_v44, %v2937_v27 }
 0x320   :  { %3944 = vsinq.f32 %v2802_v39  ;;  %v2874_v55 = vadd.s32 %v6220_v56, %v6225_v18  ;;  %v6303_v34 = vshll.u32 %v2930_v30, 8  ;;  %v3686_v3 = vadd.s32 4294967169, %v3030_v31 }
 0x321   :  { %v2886_v62 = vclz %v3679_v11  ;;  %v2904_v38 = vsub.s32 4, %v6258_v33  ;;  %v2938_v24 = vshrl.u32 %v3999_v4, %v2937_v27  ;;  %v2953_v59 = vor.u32 %v2952_v60, %v2951_v45 }
 0x322   :  { %vm2954_vm9 = vcmp.lt.s32.totalorder %v6282_v48, 1  ;;  %vm2820_vm10 = vcmp.lt.s32.totalorder %v5918_v25, 0  ;;  %vm2956_vm11 = vcmp.lt.s32.totalorder %v6282_v48, 3  ;;  %vm2957_vm8 = vcmp.lt.s32.totalorder %v6282_v48, 4 }
 0x323   :  { %v3680_v43 = vadd.s32 4294967294, %v2886_v62  ;;  %v2962_v56 = vsel %vm2954_vm9, %v2941_v50, %v2944_v42  ;;  %vm2810_vm14 = vcmp.eq.s32.totalorder %v6277_v1, 0  ;;  %v2959_v18 = vsel %vm2957_vm8, %v2947_v51, 2102212464 }
 0x324   :  { %v2963_v21 = vsel %vm2957_vm8, %v2950_v5, 920167782  ;;  %v2966_v40 = vsel %vm2954_vm9, %v2944_v42, %v2947_v51  ;;  %v2967_v32 = vsel %vm2957_vm8, %v2953_v59, 1326507024  ;;  %vm2809_vm12 = vcmp.lt.s32.totalorder %v6277_v1, 2 }
 0x325   :  { %vm3681_vm13 = vcmp.lt.s32.totalorder %v3680_v43, 0  ;;  %vm2955_vm0 = vcmp.lt.s32.totalorder %v6282_v48, 2  ;;  %v2964_v41 = vsel %vm2956_vm11, %v2947_v51, %v2963_v21  ;;  %v2968_v2 = vsel %vm2956_vm11, %v2950_v5, %v2967_v32 }
 0x326   :  { %vm2806_vm15 = vweird.f32 %v5914_v19  ;;  %v2889_v23 = vsel %vm3681_vm13, 0, %v3680_v43  ;;  %v2958_v8 = vsel %vm2954_vm9, %v2938_v24, %v2941_v50  ;;  %v2965_v28 = vsel %vm2955_vm0, %v2962_v56, %v2964_v41 }
 0x327   :  { %v2969_v16 = vsel %vm2955_vm0, %v2966_v40, %v2968_v2  ;;  %vm6331_vm2 = vcmp.le.f32.partialorder %v2818_v52, 0.7853982  ;;  %v2890_v27 = vsub.s32 32, %v2889_v23  ;;  %v2894_v13 = vsub.s32 4294967266, %v2889_v23 }
 0x328   :  { %v2960_v31 = vsel %vm2956_vm11, %v2944_v42, %v2959_v18  ;;  %v3036_v37 = vadd.s32 1, %v3686_v3  ;;  %v6338_v26 = vmul.u32.u64.low %v6303_v34, %v2969_v16  ;;  %v6339_v53 = vmul.u32.u64.high %v6303_v34, %v2969_v16, %v6338_v26 }
 0x329   :  { %v6342_v0 = vmul.u32.u64.low %v6303_v34, %v2965_v28  ;;  %v6343_v22 = vmul.u32.u64.high %v6303_v34, %v2965_v28, %v6342_v0  ;;  %v3943_v49 = vpop.eup %3942  ;;  %v2891_v52 = vshll.u32 %v6280_v58, %v2889_v23  ;;  %v2892_v57 = vshrl.u32 %v2874_v55, %v2890_v27 }
 0x32a   :  { %v2895_v15 = vadd.s32 127, %v2894_v13  ;;  %vm3037_vm1 = vcmp.gt.s32.totalorder %v3036_v37, 0  ;;  %v3945_v39 = vpop.eup %3944  ;;  %v2814_v50 = vxor.u32 2147483648, %v3943_v49  ;;  %v2961_v63 = vsel %vm2955_vm0, %v2958_v8, %v2960_v31 }
 0x32b   :  { %v3033_v20 = vand.u32 8388607, %v3026_v46  ;;  %v3038_v11 = vsel %vm3037_vm1, %v3036_v37, 0  ;;  %v2811_v42 = vxor.u32 2147483648, %v3945_v39  ;;  %vm2813_vm3 = vcmp.eq.s32.totalorder %v6277_v1, 2 }
 0x32c   :  { %v2893_v51 = vor.u32 %v2892_v57, %v2891_v52  ;;  %v2896_v5 = vshll.u32 %v2895_v15, 23  ;;  %v2815_v45 = vsel %vm2813_vm3, %v2814_v50, %v3945_v39  ;;  %v2905_v58 = vsel %vm2820_vm10, %v2904_v38, %v6258_v33 }
 0x32d   :  { %vm2979_vm4 = vc.u32 %v6339_v53, %v6342_v0  ;;  %v2980_v48 = vadd.s32 1, %v6343_v22  ;;  %v2812_v60 = vsel %vm2810_vm14, %v3943_v49, %v2811_v42  ;;  %v2977_v62 = vmul.u32 %v6303_v34, %v2961_v63 }
 0x32e   :  { %v2897_v55 = vor.u32 4788187, %v2896_v5  ;;  %v3040_v3 = vand.u32 31, %v3038_v11  ;;  %v2816_v24 = vsel %vm2809_vm12, %v2812_v60, %v2815_v45  ;;  %v2900_v59 = vcvt.s32.f32 %v2893_v51 }
 0x32f   :  { %v2981_v43 = vsel %vm2979_vm4, %v2980_v48, %v6343_v22  ;;  %v3034_v56 = vor.u32 8388608, %v3033_v20  ;;  %v2817_v33 = vsel %vm2806_vm15, nan, %v2816_v24  ;;  %v2907_v40 = vsel %vm6331_vm2, 0, %v2905_v58 }
 0x330   :  { %v2898_v38 = vand.u32 2147483647, %v2897_v55  ;;  %v2982_v18 = vadd.s32 %v2981_v43, %v2977_v62  ;;  %v3041_v21 = vsub.s32 32, %v3040_v3  ;;  %v6368_v32 = vshrl.u32 %v3038_v11, 5  ;;  %3554 = vst [vmem:[#allocation2 + $0xc0] sm:$0xff] %v2817_v33 }
 0x331   :  { %v3043_v34 = vshll.u32 %v3999_v4, %v3040_v3  ;;  %v3046_v1 = vshll.u32 %v6812_v61, %v3040_v3  ;;  %v3049_v19 = vshll.u32 %v4001_v10, %v3040_v3  ;;  %vm2924_vm5 = vcmp.lt.s32.totalorder %v5922_v36, 0 }
 0x332   :  { %v2901_v41 = vmul.f32 %v2900_v59, %v2898_v38  ;;  %v2983_v2 = vadd.s32 536870912, %v2982_v18  ;;  %v3044_v23 = vshrl.u32 %v6812_v61, %v3041_v21  ;;  %v3047_v8 = vshrl.u32 %v4001_v10, %v3041_v21 }
 0x333   :  { %v3050_v28 = vshrl.u32 %v4002_v12, %v3041_v21  ;;  %v3052_v16 = vshll.u32 %v4002_v12, %v3040_v3  ;;  %v3053_v27 = vshrl.u32 %v4003_v14, %v3041_v21  ;;  %v3056_v26 = vshrl.u32 %v6790_v44, %v3041_v21 }
 0x334   :  { %v2902_v13 = vxor.u32 2147483648, %v2901_v41  ;;  %v2984_v31 = vshrl.u32 %v2983_v2, 30  ;;  %v3045_v37 = vor.u32 %v3044_v23, %v3043_v34  ;;  %v3048_v22 = vor.u32 %v3047_v8, %v3046_v1 }
 0x335   :  { %v3054_v49 = vor.u32 %v3053_v27, %v3052_v16  ;;  %v3055_v52 = vshll.u32 %v4003_v14, %v3040_v3  ;;  %v6381_v57 = vshll.u32 %v3034_v56, 8  ;;  %v2911_v39 = vadd.s32 3, %v2907_v40 }
 0x336   :  { %v2903_v15 = vsel %vm2820_vm10, %v2902_v13, %v2901_v41  ;;  %v2985_v50 = vshll.u32 %v2984_v31, 30  ;;  %v3051_v63 = vor.u32 %v3050_v28, %v3049_v19  ;;  %v3008_v11 = vsub.s32 4, %v2984_v31 }
 0x337   :  { %v2906_v20 = vsel %vm6331_vm2, %v5918_v25, %v2903_v15  ;;  %v3057_v42 = vor.u32 %v3056_v26, %v3055_v52  ;;  %vm3058_vm6 = vcmp.lt.s32.totalorder %v6368_v32, 1  ;;  %vm3061_vm7 = vcmp.lt.s32.totalorder %v6368_v32, 4 }
 0x338   :  { %3946 = vcosq.f32 %v2906_v20  ;;  %v6389_v51 = vsub.s32 %v2982_v18, %v2985_v50  ;;  %v3066_v5 = vsel %vm3058_vm6, %v3045_v37, %v3048_v22  ;;  %vm3060_vm9 = vcmp.lt.s32.totalorder %v6368_v32, 3 }
 0x339   :  { %3948 = vsinq.f32 %v2906_v20  ;;  %v3067_v45 = vsel %vm3061_vm7, %v3054_v49, 920167782  ;;  %v3133_v58 = vand.u32 2139095040, %v6274_v47  ;;  %v2912_v30 = vand.u32 3, %v2911_v39 }
 0x33a   :  { %v2988_v48 = vsub.s32 0, %v6389_v51  ;;  %vm3059_vm10 = vcmp.lt.s32.totalorder %v6368_v32, 2  ;;  %v3068_v60 = vsel %vm3060_vm9, %v3051_v63, %v3067_v45  ;;  %v3063_v55 = vsel %vm3061_vm7, %v3051_v63, 2102212464 }
 0x33b   :  { %v3069_v62 = vsel %vm3059_vm10, %v3066_v5, %v3068_v60  ;;  %v3070_v3 = vsel %vm3058_vm6, %v3048_v22, %v3051_v63  ;;  %v3071_v24 = vsel %vm3061_vm7, %v3057_v42, 1326507024  ;;  %v3009_v43 = vsel %vm2924_vm5, %v3008_v11, %v2984_v31 }
 0x33c   :  { %v3683_v59 = vmin.u32 %v2988_v48, %v6389_v51  ;;  %v3042_v56 = vshrl.u32 %v3999_v4, %v3041_v21  ;;  %v3072_v33 = vsel %vm3060_vm9, %v3054_v49, %v3071_v24  ;;  %v3134_v34 = vshrl.u32 %v3133_v58, 23 }
 0x33d   :  { %v3073_v38 = vsel %vm3059_vm10, %v3070_v3, %v3072_v33  ;;  %v6413_v18 = vmul.u32.u64.low %v6381_v57, %v3069_v62  ;;  %v6414_v40 = vmul.u32.u64.high %v6381_v57, %v3069_v62, %v6413_v18  ;;  %v6419_v1 = vadd.f32 %v6262_v17, %v5002_v35 }
 0x33e   :  { %v2990_v41 = vclz %v3683_v59  ;;  %v3062_v21 = vsel %vm3058_vm6, %v3042_v56, %v3045_v37  ;;  %v3064_v2 = vsel %vm3060_vm9, %v3048_v22, %v3063_v55  ;;  %vm6427_vm11 = vcmp.le.f32.partialorder %v2922_v7, 0.7853982 }
 0x33f   :  { %v6432_v19 = vmul.u32.u64.low %v6381_v57, %v3073_v38  ;;  %v6433_v8 = vmul.u32.u64.high %v6381_v57, %v3073_v38, %v6432_v19  ;;  %v3690_v28 = vadd.s32 4294967169, %v3134_v34  ;;  %vm2910_vm8 = vweird.f32 %v5918_v25 }
 0x340   :  { %vm2913_vm14 = vcmp.lt.s32.totalorder %v2912_v30, 2  ;;  %v3684_v35 = vadd.s32 4294967294, %v2990_v41  ;;  %v3011_v17 = vsel %vm6427_vm11, 0, %v3009_v43  ;;  %vm2914_vm12 = vcmp.eq.s32.totalorder %v2912_v30, 0 }
 0x341   :  { %v3065_v16 = vsel %vm3059_vm10, %v3062_v21, %v3064_v2  ;;  %v3084_v7 = vadd.s32 1, %v6414_v40  ;;  %v3140_v27 = vadd.s32 1, %v3690_v28  ;;  %vm2917_vm13 = vcmp.eq.s32.totalorder %v2912_v30, 2 }
 0x342   :  { %v3947_v13 = vpop.eup %3946  ;;  %v2978_v31 = vadd.s32 %v6342_v0, %v6339_v53  ;;  %vm3685_vm0 = vcmp.lt.s32.totalorder %v3684_v35, 0  ;;  %v3130_v37 = vand.u32 2147483647, %v6274_v47  ;;  %v3015_v52 = vadd.s32 3, %v3011_v17 }
 0x343   :  { %v3949_v26 = vpop.eup %3948  ;;  %v2918_v22 = vxor.u32 2147483648, %v3947_v13  ;;  %v2993_v49 = vsel %vm3685_vm0, 0, %v3684_v35  ;;  %vm3083_vm15 = vc.u32 %v6433_v8, %v6413_v18  ;;  %v3081_v50 = vmul.u32 %v6381_v57, %v3065_v16 }
 0x344   :  { %v2915_v32 = vxor.u32 2147483648, %v3949_v26  ;;  %v2994_v15 = vsub.s32 32, %v2993_v49  ;;  %v2998_v39 = vsub.s32 4294967266, %v2993_v49  ;;  %v2995_v20 = vshll.u32 %v6389_v51, %v2993_v49 }
 0x345   :  { %v2919_v63 = vsel %vm2917_vm13, %v2918_v22, %v3949_v26  ;;  %v3085_v53 = vsel %vm3083_vm15, %v3084_v7, %v6414_v40  ;;  %vm3141_vm2 = vcmp.gt.s32.totalorder %v3140_v27, 0  ;;  %v3137_v58 = vand.u32 8388607, %v3130_v37 }
 0x346   :  { %v2916_v0 = vsel %vm2914_vm12, %v3947_v13, %v2915_v32  ;;  %v2996_v11 = vshrl.u32 %v2978_v31, %v2994_v15  ;;  %v2999_v42 = vadd.s32 127, %v2998_v39  ;;  %v3086_v5 = vadd.s32 %v3085_v53, %v3081_v50 }
 0x347   :  { %v2920_v45 = vsel %vm2913_vm14, %v2916_v0, %v2919_v63  ;;  %v3142_v48 = vsel %vm3141_vm2, %v3140_v27, 0  ;;  %v3234_v60 = vand.u32 2147483647, %v6419_v1  ;;  %v6458_v24 = vadd.f32 %v6266_v9, %v5147_v6 }
 0x348   :  { %v2921_v57 = vsel %vm2910_vm8, nan, %v2920_v45  ;;  %v2997_v51 = vor.u32 %v2996_v11, %v2995_v20  ;;  %v3000_v55 = vshll.u32 %v2999_v42, 23  ;;  %v3087_v62 = vadd.s32 536870912, %v3086_v5 }
 0x349   :  { %v3144_v3 = vand.u32 31, %v3142_v48  ;;  %3555 = vst [vmem:[#allocation2 + $0xc8] sm:$0xff] %v2921_v57  ;;  %v6462_v30 = vadd.f32 %v6270_v54, %v5147_v6  ;;  %v6466_v56 = vand.u32 3, %v3015_v52  ;;  %v3138_v25 = vor.u32 8388608, %v3137_v58 }
 0x34a   :  { %v3001_v59 = vor.u32 4788187, %v3000_v55  ;;  %v6464_v43 = vshrl.u32 %v3087_v62, 30  ;;  %v3237_v38 = vand.u32 2139095040, %v6419_v1  ;;  %v3004_v34 = vcvt.s32.f32 %v2997_v51 }
 0x34b   :  { %v3145_v33 = vsub.s32 32, %v3144_v3  ;;  %v6472_v9 = vand.u32 8388607, %v3234_v60  ;;  %v3082_v6 = vadd.s32 %v6413_v18, %v6433_v8  ;;  %v3147_v35 = vshll.u32 %v3999_v4, %v3144_v3 }
 0x34c   :  { %v3002_v40 = vand.u32 2147483647, %v3001_v59  ;;  %v3089_v41 = vshll.u32 %v6464_v43, 30  ;;  %v3143_v16 = vshrl.u32 %v3142_v48, 5  ;;  %v3150_v7 = vshll.u32 %v6812_v61, %v3144_v3 }
 0x34d   :  { %v3148_v54 = vshrl.u32 %v6812_v61, %v3145_v33  ;;  %v3151_v21 = vshrl.u32 %v4001_v10, %v3145_v33  ;;  %v3154_v2 = vshrl.u32 %v4002_v12, %v3145_v33  ;;  %v3157_v17 = vshrl.u32 %v4003_v14, %v3145_v33 }
 0x34e   :  { %v3005_v19 = vmul.f32 %v3004_v34, %v3002_v40  ;;  %v6479_v28 = vsub.s32 %v3086_v5, %v3089_v41  ;;  %v3153_v27 = vshll.u32 %v4001_v10, %v3144_v3  ;;  %v3238_v13 = vshrl.u32 %v3237_v38, 23 }
 0x34f   :  { %v3149_v31 = vor.u32 %v3148_v54, %v3147_v35  ;;  %v3156_v26 = vshll.u32 %v4002_v12, %v3144_v3  ;;  %v3152_v22 = vor.u32 %v3151_v21, %v3150_v7  ;;  %v3159_v52 = vshll.u32 %v4003_v14, %v3144_v3 }
 0x350   :  { %v3006_v18 = vxor.u32 2147483648, %v3005_v19  ;;  %v3092_v8 = vsub.s32 0, %v6479_v28  ;;  %v3155_v49 = vor.u32 %v3154_v2, %v3153_v27  ;;  %v3160_v32 = vshrl.u32 %v6790_v44, %v3145_v33 }
 0x351   :  { %v3158_v50 = vor.u32 %v3157_v17, %v3156_v26  ;;  %v6492_v63 = vshll.u32 %v3138_v25, 8  ;;  %v3146_v53 = vshrl.u32 %v3999_v4, %v3145_v33  ;;  %v3694_v11 = vadd.s32 4294967169, %v3238_v13 }
 0x352   :  { %v3007_v15 = vsel %vm2924_vm5, %v3006_v18, %v3005_v19  ;;  %v3687_v39 = vmin.u32 %v3092_v8, %v6479_v28  ;;  %v3161_v0 = vor.u32 %v3160_v32, %v3159_v52  ;;  %vm3162_vm1 = vcmp.lt.s32.totalorder %v3143_v16, 1 }
 0x353   :  { %v3010_v20 = vsel %vm6427_vm11, %v5922_v36, %v3007_v15  ;;  %vm3165_vm3 = vcmp.lt.s32.totalorder %v3143_v16, 4  ;;  %vm3163_vm4 = vcmp.lt.s32.totalorder %v3143_v16, 2  ;;  %v3170_v45 = vsel %vm3162_vm1, %v3149_v31, %v3152_v22 }
 0x354   :  { %3950 = vcosq.f32 %v3010_v20  ;;  %v3094_v42 = vclz %v3687_v39  ;;  %v3167_v5 = vsel %vm3165_vm3, %v3155_v49, 2102212464  ;;  %vm3164_vm5 = vcmp.lt.s32.totalorder %v3143_v16, 3 }
 0x355   :  { %3952 = vsinq.f32 %v3010_v20  ;;  %v3171_v48 = vsel %vm3165_vm3, %v3158_v50, 920167782  ;;  %v3174_v57 = vsel %vm3162_vm1, %v3152_v22, %v3155_v49  ;;  %v3166_v51 = vsel %vm3162_vm1, %v3146_v53, %v3149_v31 }
 0x356   :  { %v3688_v58 = vadd.s32 4294967294, %v3094_v42  ;;  %v3172_v55 = vsel %vm3164_vm5, %v3155_v49, %v3171_v48  ;;  %v3175_v23 = vsel %vm3165_vm3, %v3161_v0, 1326507024  ;;  %v3244_v62 = vadd.s32 1, %v3694_v11 }
 0x357   :  { %vm6500_vm6 = vcmp.le.f32.partialorder %v3026_v46, 0.7853982  ;;  %v3168_v59 = vsel %vm3164_vm5, %v3152_v22, %v3167_v5  ;;  %v3173_v25 = vsel %vm3163_vm4, %v3170_v45, %v3172_v55  ;;  %v3176_v33 = vsel %vm3164_vm5, %v3158_v50, %v3175_v23 }
 0x358   :  { %vm3689_vm7 = vcmp.lt.s32.totalorder %v3688_v58, 0  ;;  %v3177_v40 = vsel %vm3163_vm4, %v3174_v57, %v3176_v33  ;;  %v6507_v34 = vmul.u32.u64.low %v6492_v63, %v3173_v25  ;;  %v6508_v41 = vmul.u32.u64.high %v6492_v63, %v3173_v25, %v6507_v34 }
 0x359   :  { %v3097_v38 = vsel %vm3689_vm7, 0, %v3688_v58  ;;  %v3112_v46 = vsub.s32 4, %v6464_v43  ;;  %vm3245_vm9 = vcmp.gt.s32.totalorder %v3244_v62, 0  ;;  %vm3014_vm10 = vweird.f32 %v5922_v36 }
 0x35a   :  { %v3098_v54 = vsub.s32 32, %v3097_v38  ;;  %v3102_v21 = vsub.s32 4294967266, %v3097_v38  ;;  %v3169_v2 = vsel %vm3163_vm4, %v3166_v51, %v3168_v59  ;;  %v3246_v17 = vsel %vm3245_vm9, %v3244_v62, 0 }
 0x35b   :  { %v6515_v19 = vmul.u32.u64.low %v6492_v63, %v3177_v40  ;;  %v6516_v35 = vmul.u32.u64.high %v6492_v63, %v3177_v40, %v6515_v19  ;;  %v3099_v7 = vshll.u32 %v6479_v28, %v3097_v38  ;;  %v3248_v18 = vand.u32 31, %v3246_v17 }
 0x35c   :  { %v3100_v27 = vshrl.u32 %v3082_v6, %v3098_v54  ;;  %v3103_v13 = vadd.s32 127, %v3102_v21  ;;  %vm3017_vm11 = vcmp.lt.s32.totalorder %v6466_v56, 2  ;;  %vm3028_vm8 = vcmp.lt.s32.totalorder %v6012_v29, 0 }
 0x35d   :  { %v3188_v8 = vadd.s32 1, %v6508_v41  ;;  %v3242_v31 = vor.u32 8388608, %v6472_v9  ;;  %vm3018_vm14 = vcmp.eq.s32.totalorder %v6466_v56, 0  ;;  %v3113_v28 = vsel %vm3028_vm8, %v3112_v46, %v6464_v43 }
 0x35e   :  { %v3951_v16 = vpop.eup %3950  ;;  %v3101_v26 = vor.u32 %v3100_v27, %v3099_v7  ;;  %v3104_v22 = vshll.u32 %v3103_v13, 23  ;;  %v3185_v52 = vmul.u32 %v6492_v63, %v3169_v2  ;;  %vm3187_vm12 = vc.u32 %v6516_v35, %v6507_v34 }
 0x35f   :  { %v3953_v6 = vpop.eup %3952  ;;  %v3022_v49 = vxor.u32 2147483648, %v3951_v16  ;;  %v3249_v32 = vsub.s32 32, %v3248_v18  ;;  %vm3021_vm13 = vcmp.eq.s32.totalorder %v6466_v56, 2  ;;  %v3189_v39 = vsel %vm3187_vm12, %v3188_v8, %v6508_v41 }
 0x360   :  { %v3019_v15 = vxor.u32 2147483648, %v3953_v6  ;;  %v3105_v9 = vor.u32 4788187, %v3104_v22  ;;  %v3115_v20 = vsel %vm6500_vm6, 0, %v3113_v28  ;;  %v3190_v53 = vadd.s32 %v3189_v39, %v3185_v52 }
 0x361   :  { %v3023_v50 = vsel %vm3021_vm13, %v3022_v49, %v3953_v6  ;;  %v6534_v43 = vshll.u32 %v3242_v31, 8  ;;  %v3108_v11 = vcvt.s32.f32 %v3101_v26  ;;  %v6538_v42 = vshrl.u32 %v3246_v17, 5 }
 0x362   :  { %v3020_v63 = vsel %vm3018_vm14, %v3951_v16, %v3019_v15  ;;  %v3106_v0 = vand.u32 2147483647, %v3105_v9  ;;  %v3191_v45 = vadd.s32 536870912, %v3190_v53  ;;  %v3252_v58 = vshrl.u32 %v6812_v61, %v3249_v32 }
 0x363   :  { %v3024_v5 = vsel %vm3017_vm11, %v3020_v63, %v3023_v50  ;;  %v3255_v48 = vshrl.u32 %v4001_v10, %v3249_v32  ;;  %v3251_v55 = vshll.u32 %v3999_v4, %v3248_v18  ;;  %v3258_v23 = vshrl.u32 %v4002_v12, %v3249_v32 }
 0x364   :  { %v3025_v57 = vsel %vm3014_vm10, nan, %v3024_v5  ;;  %v3109_v51 = vmul.f32 %v3108_v11, %v3106_v0  ;;  %v3192_v62 = vshrl.u32 %v3191_v45, 30  ;;  %v3254_v59 = vshll.u32 %v6812_v61, %v3248_v18 }
 0x365   :  { %v3257_v25 = vshll.u32 %v4001_v10, %v3248_v18  ;;  %v3261_v56 = vshrl.u32 %v4003_v14, %v3249_v32  ;;  %3556 = vst [vmem:[#allocation2 + $0xd0] sm:$0xff] %v3025_v57  ;;  %v3260_v38 = vshll.u32 %v4002_v12, %v3248_v18  ;;  %v3263_v40 = vshll.u32 %v4003_v14, %v3248_v18 }
 0x366   :  { %v3110_v33 = vxor.u32 2147483648, %v3109_v51  ;;  %v3264_v36 = vshrl.u32 %v6790_v44, %v3249_v32  ;;  %v3119_v41 = vadd.s32 3, %v3115_v20  ;;  %v3193_v54 = vshll.u32 %v3192_v62, 30 }
 0x367   :  { %v3253_v21 = vor.u32 %v3252_v58, %v3251_v55  ;;  %v3256_v46 = vor.u32 %v3255_v48, %v3254_v59  ;;  %vm3132_vm0 = vcmp.lt.s32.totalorder %v6274_v47, 0  ;;  %v3259_v19 = vor.u32 %v3258_v23, %v3257_v25 }
 0x368   :  { %v3111_v2 = vsel %vm3028_vm8, %v3110_v33, %v3109_v51  ;;  %v3262_v17 = vor.u32 %v3261_v56, %v3260_v38  ;;  %v3265_v7 = vor.u32 %v3264_v36, %v3263_v40  ;;  %v6560_v13 = vsub.s32 %v3190_v53, %v3193_v54 }
 0x369   :  { %v3114_v27 = vsel %vm6500_vm6, %v6012_v29, %v3111_v2  ;;  %v3250_v18 = vshrl.u32 %v3999_v4, %v3249_v32  ;;  %v3341_v8 = vand.u32 2139095040, %v6458_v24  ;;  %vm3266_vm15 = vcmp.lt.s32.totalorder %v6538_v42, 1 }
 0x36a   :  { %3954 = vcosq.f32 %v3114_v27  ;;  %vm3267_vm2 = vcmp.lt.s32.totalorder %v6538_v42, 2  ;;  %vm3268_vm1 = vcmp.lt.s32.totalorder %v6538_v42, 3  ;;  %v3196_v31 = vsub.s32 0, %v6560_v13 }
 0x36b   :  { %3956 = vsinq.f32 %v3114_v27  ;;  %vm3269_vm3 = vcmp.lt.s32.totalorder %v6538_v42, 4  ;;  %v3274_v3 = vsel %vm3266_vm15, %v3253_v21, %v3256_v46  ;;  %v3278_v22 = vsel %vm3266_vm15, %v3256_v46, %v3259_v19 }
 0x36c   :  { %v3271_v16 = vsel %vm3269_vm3, %v3259_v19, 2102212464  ;;  %v3275_v26 = vsel %vm3269_vm3, %v3262_v17, 920167782  ;;  %v3279_v28 = vsel %vm3269_vm3, %v3265_v7, 1326507024  ;;  %v3691_v6 = vmin.u32 %v3196_v31, %v6560_v13 }
 0x36d   :  { %v3216_v49 = vsub.s32 4, %v3192_v62  ;;  %v3276_v52 = vsel %vm3268_vm1, %v3259_v19, %v3275_v26  ;;  %v3280_v32 = vsel %vm3268_vm1, %v3262_v17, %v3279_v28  ;;  %v3120_v15 = vand.u32 3, %v3119_v41 }
 0x36e   :  { %v3277_v9 = vsel %vm3267_vm2, %v3274_v3, %v3276_v52  ;;  %v3281_v39 = vsel %vm3267_vm2, %v3278_v22, %v3280_v32  ;;  %v3342_v50 = vshrl.u32 %v3341_v8, 23  ;;  %v3198_v20 = vclz %v3691_v6 }
 0x36f   :  { %v3270_v53 = vsel %vm3266_vm15, %v3250_v18, %v3253_v21  ;;  %v3272_v63 = vsel %vm3268_vm1, %v3256_v46, %v3271_v16  ;;  %v3338_v0 = vand.u32 2147483647, %v6458_v24  ;;  %vm3118_vm4 = vweird.f32 %v6012_v29 }
 0x370   :  { %v6588_v11 = vmul.u32.u64.low %v6534_v43, %v3281_v39  ;;  %v6589_v5 = vmul.u32.u64.high %v6534_v43, %v3281_v39, %v6588_v11  ;;  %v6592_v45 = vmul.u32.u64.low %v6534_v43, %v3277_v9  ;;  %v6593_v58 = vmul.u32.u64.high %v6534_v43, %v3277_v9, %v6592_v45 }
 0x371   :  { %v3692_v48 = vadd.s32 4294967294, %v3198_v20  ;;  %v3217_v57 = vsel %vm3132_vm0, %v3216_v49, %v3192_v62  ;;  %v3698_v51 = vadd.s32 4294967169, %v3342_v50  ;;  %vm3122_vm5 = vcmp.eq.s32.totalorder %v3120_v15, 0 }
 0x372   :  { %vm3125_vm6 = vcmp.eq.s32.totalorder %v3120_v15, 2  ;;  %vm6601_vm7 = vcmp.le.f32.partialorder %v3130_v37, 0.7853982  ;;  %v3273_v23 = vsel %vm3267_vm2, %v3270_v53, %v3272_v63  ;;  %v3186_v59 = vadd.s32 %v6507_v34, %v6516_v35 }
 0x373   :  { %vm3693_vm9 = vcmp.lt.s32.totalorder %v3692_v48, 0  ;;  %v3345_v25 = vand.u32 8388607, %v3338_v0  ;;  %v3348_v62 = vadd.s32 1, %v3698_v51  ;;  %v3219_v38 = vsel %vm6601_vm7, 0, %v3217_v57 }
 0x374   :  { %v3955_v56 = vpop.eup %3954  ;;  %v3201_v33 = vsel %vm3693_vm9, 0, %v3692_v48  ;;  %vm3291_vm10 = vc.u32 %v6589_v5, %v6592_v45  ;;  %v3292_v37 = vadd.s32 1, %v6593_v58  ;;  %v3289_v34 = vmul.u32 %v6534_v43, %v3273_v23 }
 0x375   :  { %v3957_v42 = vpop.eup %3956  ;;  %v3126_v40 = vxor.u32 2147483648, %v3955_v56  ;;  %v3202_v36 = vsub.s32 32, %v3201_v33  ;;  %v3206_v41 = vsub.s32 4294967266, %v3201_v33  ;;  %v3203_v54 = vshll.u32 %v6560_v13, %v3201_v33 }
 0x376   :  { %v3123_v35 = vxor.u32 2147483648, %v3957_v42  ;;  %v3293_v21 = vsel %vm3291_vm10, %v3292_v37, %v6593_v58  ;;  %vm3349_vm11 = vcmp.gt.s32.totalorder %v3348_v62, 0  ;;  %vm3121_vm8 = vcmp.lt.s32.totalorder %v3120_v15, 2 }
 0x377   :  { %v3127_v46 = vsel %vm3125_vm6, %v3126_v40, %v3957_v42  ;;  %v3204_v2 = vshrl.u32 %v3186_v59, %v3202_v36  ;;  %v3207_v19 = vadd.s32 127, %v3206_v41  ;;  %v3294_v17 = vadd.s32 %v3293_v21, %v3289_v34 }
 0x378   :  { %v3124_v7 = vsel %vm3122_vm5, %v3955_v56, %v3123_v35  ;;  %v3223_v27 = vadd.s32 3, %v3219_v38  ;;  %v3350_v18 = vsel %vm3349_vm11, %v3348_v62, 0  ;;  %v3346_v16 = vor.u32 8388608, %v3345_v25 }
 0x379   :  { %v3128_v8 = vsel %vm3121_vm8, %v3124_v7, %v3127_v46  ;;  %v3205_v31 = vor.u32 %v3204_v2, %v3203_v54  ;;  %v3208_v3 = vshll.u32 %v3207_v19, 23  ;;  %v3295_v43 = vadd.s32 536870912, %v3294_v17 }
 0x37a   :  { %v3129_v13 = vsel %vm3118_vm4, nan, %v3128_v8  ;;  %v3352_v26 = vand.u32 31, %v3350_v18  ;;  %v3445_v49 = vand.u32 2139095040, %v6462_v30  ;;  %v6626_v15 = vand.u32 3, %v3223_v27 }
 0x37b   :  { %v3209_v22 = vor.u32 4788187, %v3208_v3  ;;  %v6623_v28 = vshrl.u32 %v3295_v43, 30  ;;  %3557 = vst [vmem:[#allocation2 + $0xd8] sm:$0xff] %v3129_v13  ;;  %v3212_v32 = vcvt.s32.f32 %v3205_v31  ;;  %v6632_v20 = vshll.u32 %v3346_v16, 8 }
 0x37c   :  { %v3353_v6 = vsub.s32 32, %v3352_v26  ;;  %v3355_v11 = vshll.u32 %v3999_v4, %v3352_v26  ;;  %v3351_v48 = vshrl.u32 %v3350_v18, 5  ;;  %v3358_v57 = vshll.u32 %v6812_v61, %v3352_v26 }
 0x37d   :  { %v3210_v52 = vand.u32 2147483647, %v3209_v22  ;;  %v3297_v9 = vshll.u32 %v6623_v28, 30  ;;  %v3361_v51 = vshll.u32 %v4001_v10, %v3352_v26  ;;  %v3446_v23 = vshrl.u32 %v3445_v49, 23 }
 0x37e   :  { %v3356_v39 = vshrl.u32 %v6812_v61, %v3353_v6  ;;  %v3359_v29 = vshrl.u32 %v4001_v10, %v3353_v6  ;;  %v3362_v50 = vshrl.u32 %v4002_v12, %v3353_v6  ;;  %v3365_v58 = vshrl.u32 %v4003_v14, %v3353_v6 }
 0x37f   :  { %v3213_v53 = vmul.f32 %v3212_v32, %v3210_v52  ;;  %v6634_v63 = vsub.s32 %v3294_v17, %v3297_v9  ;;  %v3364_v56 = vshll.u32 %v4002_v12, %v3352_v26  ;;  %v3367_v37 = vshll.u32 %v4003_v14, %v3352_v26 }
 0x380   :  { %v3357_v62 = vor.u32 %v3356_v39, %v3355_v11  ;;  %v3360_v33 = vor.u32 %v3359_v29, %v3358_v57  ;;  %v3363_v38 = vor.u32 %v3362_v50, %v3361_v51  ;;  %v3368_v42 = vshrl.u32 %v6790_v44, %v3353_v6 }
 0x381   :  { %v3214_v59 = vxor.u32 2147483648, %v3213_v53  ;;  %v3300_v25 = vsub.s32 0, %v6634_v63  ;;  %v3290_v36 = vadd.s32 %v6592_v45, %v6589_v5  ;;  %v3366_v34 = vor.u32 %v3365_v58, %v3364_v56 }
 0x382   :  { %v3354_v54 = vshrl.u32 %v3999_v4, %v3353_v6  ;;  %v3369_v21 = vor.u32 %v3368_v42, %v3367_v37  ;;  %v3702_v46 = vadd.s32 4294967169, %v3446_v23  ;;  %vm3370_vm14 = vcmp.lt.s32.totalorder %v3351_v48, 1 }
 0x383   :  { %v3215_v40 = vsel %vm3132_vm0, %v3214_v59, %v3213_v53  ;;  %v3695_v41 = vmin.u32 %v3300_v25, %v6634_v63  ;;  %vm3373_vm12 = vcmp.lt.s32.totalorder %v3351_v48, 4  ;;  %vm3236_vm13 = vcmp.lt.s32.totalorder %v6419_v1, 0 }
 0x384   :  { %v3218_v35 = vsel %vm6601_vm7, %v6274_v47, %v3215_v40  ;;  %vm3371_vm0 = vcmp.lt.s32.totalorder %v3351_v48, 2  ;;  %v3375_v5 = vsel %vm3373_vm12, %v3363_v38, 2102212464  ;;  %v3378_v45 = vsel %vm3370_vm14, %v3357_v62, %v3360_v33 }
 0x385   :  { %3958 = vcosq.f32 %v3218_v35  ;;  %v3302_v2 = vclz %v3695_v41  ;;  %vm3372_vm15 = vcmp.lt.s32.totalorder %v3351_v48, 3  ;;  %v3379_v17 = vsel %vm3373_vm12, %v3366_v34, 920167782 }
 0x386   :  { %3960 = vsinq.f32 %v3218_v35  ;;  %v3382_v7 = vsel %vm3370_vm14, %v3360_v33, %v3363_v38  ;;  %v3374_v55 = vsel %vm3370_vm14, %v3354_v54, %v3357_v62  ;;  %v3380_v27 = vsel %vm3372_vm15, %v3363_v38, %v3379_v17 }
 0x387   :  { %v3696_v19 = vadd.s32 4294967294, %v3302_v2  ;;  %v3383_v18 = vsel %vm3373_vm12, %v3369_v21, 1326507024  ;;  %v3452_v8 = vadd.s32 1, %v3702_v46  ;;  %v3376_v31 = vsel %vm3372_vm15, %v3360_v33, %v3375_v5 }
 0x388   :  { %v3381_v3 = vsel %vm3371_vm0, %v3378_v45, %v3380_v27  ;;  %v3384_v43 = vsel %vm3372_vm15, %v3366_v34, %v3383_v18  ;;  %v3320_v52 = vsub.s32 4, %v6623_v28  ;;  %vm3222_vm3 = vweird.f32 %v6274_v47 }
 0x389   :  { %vm3697_vm2 = vcmp.lt.s32.totalorder %v3696_v19, 0  ;;  %v3385_v16 = vsel %vm3371_vm0, %v3382_v7, %v3384_v43  ;;  %v6657_v26 = vmul.u32.u64.low %v6632_v20, %v3381_v3  ;;  %v6658_v22 = vmul.u32.u64.high %v6632_v20, %v3381_v3, %v6657_v26 }
 0x38a   :  { %v3305_v13 = vsel %vm3697_vm2, 0, %v3696_v19  ;;  %vm3453_vm1 = vcmp.gt.s32.totalorder %v3452_v8, 0  ;;  %v3377_v32 = vsel %vm3371_vm0, %v3374_v55, %v3376_v31  ;;  %vm3225_vm4 = vcmp.lt.s32.totalorder %v6626_v15, 2 }
 0x38b   :  { %v3306_v6 = vsub.s32 32, %v3305_v13  ;;  %v3310_v49 = vsub.s32 4294967266, %v3305_v13  ;;  %v6665_v9 = vmul.u32.u64.low %v6632_v20, %v3385_v16  ;;  %v6666_v39 = vmul.u32.u64.high %v6632_v20, %v3385_v16, %v6665_v9 }
 0x38c   :  { %v3454_v29 = vsel %vm3453_vm1, %v3452_v8, 0  ;;  %v3307_v50 = vshll.u32 %v6634_v63, %v3305_v13  ;;  %vm6672_vm5 = vcmp.le.f32.partialorder %v3234_v60, 0.7853982  ;;  %v3396_v48 = vadd.s32 1, %v6658_v22 }
 0x38d   :  { %v3308_v53 = vshrl.u32 %v3290_v36, %v3306_v6  ;;  %v3311_v11 = vadd.s32 127, %v3310_v49  ;;  %v3456_v58 = vand.u32 31, %v3454_v29  ;;  %v3442_v51 = vand.u32 2147483647, %v6462_v30 }
 0x38e   :  { %vm3226_vm6 = vcmp.eq.s32.totalorder %v6626_v15, 0  ;;  %v3321_v25 = vsel %vm3236_vm13, %v3320_v52, %v6623_v28  ;;  %v3393_v60 = vmul.u32 %v6632_v20, %v3377_v32  ;;  %vm3395_vm7 = vc.u32 %v6666_v39, %v6657_v26 }
 0x38f   :  { %v3959_v23 = vpop.eup %3958  ;;  %v3309_v59 = vor.u32 %v3308_v53, %v3307_v50  ;;  %v3312_v63 = vshll.u32 %v3311_v11, 23  ;;  %v3457_v33 = vsub.s32 32, %v3456_v58  ;;  %vm3229_vm9 = vcmp.eq.s32.totalorder %v6626_v15, 2 }
 0x390   :  { %v3961_v62 = vpop.eup %3960  ;;  %v3230_v56 = vxor.u32 2147483648, %v3959_v23  ;;  %v3397_v42 = vsel %vm3395_vm7, %v3396_v48, %v6658_v22  ;;  %v3323_v36 = vsel %vm6672_vm5, 0, %v3321_v25  ;;  %v3449_v28 = vand.u32 8388607, %v3442_v51 }
 0x391   :  { %v3227_v38 = vxor.u32 2147483648, %v3961_v62  ;;  %v3313_v37 = vor.u32 4788187, %v3312_v63  ;;  %v3398_v41 = vadd.s32 %v3397_v42, %v3393_v60  ;;  %v3316_v35 = vcvt.s32.f32 %v3309_v59 }
 0x392   :  { %v3231_v40 = vsel %vm3229_vm9, %v3230_v56, %v3961_v62  ;;  %v3455_v54 = vshrl.u32 %v3454_v29, 5  ;;  %v3460_v2 = vshrl.u32 %v6812_v61, %v3457_v33  ;;  %v3463_v5 = vshrl.u32 %v4001_v10, %v3457_v33 }
 0x393   :  { %v3228_v20 = vsel %vm3226_vm6, %v3959_v23, %v3227_v38  ;;  %v3314_v34 = vand.u32 2147483647, %v3313_v37  ;;  %v3399_v46 = vadd.s32 536870912, %v3398_v41  ;;  %v3459_v17 = vshll.u32 %v3999_v4, %v3456_v58 }
 0x394   :  { %v3232_v21 = vsel %vm3225_vm4, %v3228_v20, %v3231_v40  ;;  %v3466_v7 = vshrl.u32 %v4002_v12, %v3457_v33  ;;  %v3462_v27 = vshll.u32 %v6812_v61, %v3456_v58  ;;  %v3465_v15 = vshll.u32 %v4001_v10, %v3456_v58 }
 0x395   :  { %v3233_v45 = vsel %vm3222_vm3, nan, %v3232_v21  ;;  %v3317_v19 = vmul.f32 %v3316_v35, %v3314_v34  ;;  %v6701_v55 = vshrl.u32 %v3399_v46, 30  ;;  %v3469_v18 = vshrl.u32 %v4003_v14, %v3457_v33 }
 0x396   :  { %3558 = vst [vmem:[#allocation2 + $0xe0] sm:$0xff] %v3233_v45  ;;  %v3468_v31 = vshll.u32 %v4002_v12, %v3456_v58  ;;  %v3471_v47 = vshll.u32 %v4003_v14, %v3456_v58  ;;  %v3472_v3 = vshrl.u32 %v6790_v44, %v3457_v33  ;;  %v3461_v13 = vor.u32 %v3460_v2, %v3459_v17 }
 0x397   :  { %v3318_v8 = vxor.u32 2147483648, %v3317_v19  ;;  %v3401_v43 = vshll.u32 %v6701_v55, 30  ;;  %v3464_v16 = vor.u32 %v3463_v5, %v3462_v27  ;;  %v3467_v61 = vor.u32 %v3466_v7, %v3465_v15 }
 0x398   :  { %v3470_v6 = vor.u32 %v3469_v18, %v3468_v31  ;;  %v3473_v10 = vor.u32 %v3472_v3, %v3471_v47  ;;  %v3327_v52 = vadd.s32 3, %v3323_v36  ;;  %v3450_v32 = vor.u32 8388608, %v3449_v28 }
 0x399   :  { %v3319_v22 = vsel %vm3236_vm13, %v3318_v8, %v3317_v19  ;;  %v3402_v12 = vsub.s32 %v3398_v41, %v3401_v43  ;;  %v3458_v14 = vshrl.u32 %v3999_v4, %v3457_v33  ;;  %vm3474_vm10 = vcmp.lt.s32.totalorder %v3455_v54, 1 }
 0x39a   :  { %v3322_v49 = vsel %vm6672_vm5, %v6419_v1, %v3319_v22  ;;  %vm3476_vm11 = vcmp.lt.s32.totalorder %v3455_v54, 3  ;;  %vm3477_vm8 = vcmp.lt.s32.totalorder %v3455_v54, 4  ;;  %v3482_v9 = vsel %vm3474_vm10, %v3461_v13, %v3464_v16 }
 0x39b   :  { %3962 = vcosq.f32 %v3322_v49  ;;  %v3404_v44 = vsub.s32 0, %v3402_v12  ;;  %v3479_v29 = vsel %vm3477_vm8, %v3467_v61, 2102212464  ;;  %v3483_v50 = vsel %vm3477_vm8, %v3470_v6, 920167782 }
 0x39c   :  { %3964 = vsinq.f32 %v3322_v49  ;;  %v3486_v53 = vsel %vm3474_vm10, %v3464_v16, %v3467_v61  ;;  %v3487_v11 = vsel %vm3477_vm8, %v3473_v10, 1326507024  ;;  %vm3475_vm14 = vcmp.lt.s32.totalorder %v3455_v54, 2 }
 0x39d   :  { %v3699_v58 = vmin.u32 %v3404_v44, %v3402_v12  ;;  %v3484_v57 = vsel %vm3476_vm11, %v3467_v61, %v3483_v50  ;;  %v3488_v48 = vsel %vm3476_vm11, %v3470_v6, %v3487_v11  ;;  %v3490_v59 = vshll.u32 %v3450_v32, 8 }
 0x39e   :  { %v3485_v23 = vsel %vm3475_vm14, %v3482_v9, %v3484_v57  ;;  %v3489_v4 = vsel %vm3475_vm14, %v3486_v53, %v3488_v48  ;;  %v3328_v63 = vand.u32 3, %v3327_v52  ;;  %v3478_v62 = vsel %vm3474_vm10, %v3458_v14, %v3461_v13 }
 0x39f   :  { %v3406_v25 = vclz %v3699_v58  ;;  %v3480_v56 = vsel %vm3476_vm11, %v3464_v16, %v3479_v29  ;;  %v6722_v60 = vmul.u32.u64.low %v3490_v59, %v3489_v4  ;;  %v6723_v33 = vmul.u32.u64.high %v3490_v59, %v3489_v4, %v6722_v60 }
 0x3a0   :  { %v6725_v38 = vmul.u32.u64.low %v3490_v59, %v3485_v23  ;;  %v6726_v37 = vmul.u32.u64.high %v3490_v59, %v3485_v23, %v6725_v38  ;;  %v3481_v40 = vsel %vm3475_vm14, %v3478_v62, %v3480_v56  ;;  %vm3330_vm12 = vcmp.eq.s32.totalorder %v3328_v63, 0 }
 0x3a1   :  { %v3700_v42 = vadd.s32 4294967294, %v3406_v25  ;;  %v3394_v41 = vadd.s32 %v6657_v26, %v6666_v39  ;;  %v3497_v46 = vmul.u32 %v3490_v59, %v3481_v40  ;;  %vm3333_vm15 = vcmp.eq.s32.totalorder %v3328_v63, 2 }
 0x3a2   :  { %vm3499_vm0 = vc.u32 %v6723_v33, %v6725_v38  ;;  %v3500_v20 = vadd.s32 1, %v6726_v37  ;;  %vm3326_vm2 = vweird.f32 %v6419_v1  ;;  %vm3329_vm1 = vcmp.lt.s32.totalorder %v3328_v63, 2 }
 0x3a3   :  { %vm3701_vm13 = vcmp.lt.s32.totalorder %v3700_v42, 0  ;;  %v3424_v61 = vsub.s32 4, %v6701_v55  ;;  %vm3340_vm3 = vcmp.lt.s32.totalorder %v6458_v24, 0  ;;  %vm3339_vm4 = vcmp.le.f32.partialorder %v3338_v0, 0.7853982 }
 0x3a4   :  { %v3409_v28 = vsel %vm3701_vm13, 0, %v3700_v42  ;;  %v3501_v45 = vsel %vm3499_vm0, %v3500_v20, %v6726_v37  ;;  %v3498_v53 = vadd.s32 %v6725_v38, %v6723_v33  ;;  %vm3430_vm10 = vweird.f32 %v6458_v24 }
 0x3a5   :  { %v3963_v36 = vpop.eup %3962  ;;  %v3410_v54 = vsub.s32 32, %v3409_v28  ;;  %v3414_v21 = vsub.s32 4294967266, %v3409_v28  ;;  %v3411_v5 = vshll.u32 %v3402_v12, %v3409_v28  ;;  %v3502_v27 = vadd.s32 %v3501_v45, %v3497_v46 }
 0x3a6   :  { %v3965_v34 = vpop.eup %3964  ;;  %v3334_v35 = vxor.u32 2147483648, %v3963_v36  ;;  %v3425_v52 = vsel %vm3340_vm3, %v3424_v61, %v6701_v55  ;;  %vm3444_vm11 = vcmp.lt.s32.totalorder %v6462_v30, 0  ;;  %vm3443_vm8 = vcmp.le.f32.partialorder %v3442_v51, 0.7853982 }
 0x3a7   :  { %v3331_v2 = vxor.u32 2147483648, %v3965_v34  ;;  %v3412_v17 = vshrl.u32 %v3394_v41, %v3410_v54  ;;  %v3415_v7 = vadd.s32 127, %v3414_v21  ;;  %v3503_v8 = vadd.s32 536870912, %v3502_v27 }
 0x3a8   :  { %v3335_v19 = vsel %vm3333_vm15, %v3334_v35, %v3965_v34  ;;  %v3427_v44 = vsel %vm3339_vm4, 0, %v3425_v52  ;;  %vm3534_vm0 = vweird.f32 %v6462_v30 }
 0x3a9   :  { %v3332_v26 = vsel %vm3330_vm12, %v3963_v36, %v3331_v2  ;;  %v3413_v15 = vor.u32 %v3412_v17, %v3411_v5  ;;  %v3416_v18 = vshll.u32 %v3415_v7, 23  ;;  %v3504_v3 = vshrl.u32 %v3503_v8, 30 }
 0x3aa   :  { %v3336_v39 = vsel %vm3329_vm1, %v3332_v26, %v3335_v19  ;;  %v3431_v29 = vadd.s32 3, %v3427_v44 }
 0x3ab   :  { %v3337_v31 = vsel %vm3326_vm2, nan, %v3336_v39  ;;  %v3417_v47 = vor.u32 4788187, %v3416_v18  ;;  %v3420_v13 = vcvt.s32.f32 %v3413_v15  ;;  %v3505_v16 = vshll.u32 %v3504_v3, 30 }
 0x3ac   :  { %3559 = vst [vmem:[#allocation2 + $0xe8] sm:$0xff] %v3337_v31  ;;  %v3432_v57 = vand.u32 3, %v3431_v29  ;;  %v3528_v41 = vsub.s32 4, %v3504_v3 }
 0x3ad   :  { %v3418_v43 = vand.u32 2147483647, %v3417_v47  ;;  %v3506_v6 = vsub.s32 %v3502_v27, %v3505_v16 }
 0x3ae   :  { %vm3437_vm6 = vcmp.eq.s32.totalorder %v3432_v57, 2  ;;  %vm3434_vm7 = vcmp.eq.s32.totalorder %v3432_v57, 0  ;;  %vm3433_vm9 = vcmp.lt.s32.totalorder %v3432_v57, 2  ;;  %v3529_v34 = vsel %vm3444_vm11, %v3528_v41, %v3504_v3 }
 0x3af   :  { %v3421_v22 = vmul.f32 %v3420_v13, %v3418_v43  ;;  %v3508_v1 = vsub.s32 0, %v3506_v6  ;;  %v3531_v54 = vsel %vm3443_vm8, 0, %v3529_v34 }
 0x3b0   :  { %v3535_v21 = vadd.s32 3, %v3531_v54 }
 0x3b1   :  { %v3422_v10 = vxor.u32 2147483648, %v3421_v22  ;;  %v3703_v12 = vmin.u32 %v3508_v1, %v3506_v6 }
 0x3b3   :  { %v3423_v49 = vsel %vm3340_vm3, %v3422_v10, %v3421_v22  ;;  %v3510_v14 = vclz %v3703_v12 }
 0x3b4   :  { %v3426_v32 = vsel %vm3339_vm4, %v6458_v24, %v3423_v49  ;;  %v3536_v24 = vand.u32 3, %v3535_v21 }
 0x3b5   :  { %3966 = vcosq.f32 %v3426_v32  ;;  %v3704_v9 = vadd.s32 4294967294, %v3510_v14 }
 0x3b6   :  { %3968 = vsinq.f32 %v3426_v32  ;;  %vm3541_vm14 = vcmp.eq.s32.totalorder %v3536_v24, 2  ;;  %vm3538_vm12 = vcmp.eq.s32.totalorder %v3536_v24, 0  ;;  %vm3537_vm13 = vcmp.lt.s32.totalorder %v3536_v24, 2 }
 0x3b7   :  { %vm3705_vm5 = vcmp.lt.s32.totalorder %v3704_v9, 0 }
 0x3b8   :  { %v3513_v50 = vsel %vm3705_vm5, 0, %v3704_v9 }
 0x3b9   :  { %v3514_v11 = vsub.s32 32, %v3513_v50  ;;  %v3518_v58 = vsub.s32 4294967266, %v3513_v50  ;;  %v3515_v0 = vshll.u32 %v3506_v6, %v3513_v50 }
 0x3bb   :  { %v3516_v48 = vshrl.u32 %v3498_v53, %v3514_v11  ;;  %v3519_v23 = vadd.s32 127, %v3518_v58 }
 0x3bd   :  { %v3517_v4 = vor.u32 %v3516_v48, %v3515_v0  ;;  %v3520_v59 = vshll.u32 %v3519_v23, 23 }
 0x3bf   :  { %v3967_v55 = vpop.eup %3966  ;;  %v3521_v56 = vor.u32 4788187, %v3520_v59  ;;  %v3524_v33 = vcvt.s32.f32 %v3517_v4 }
 0x3c0   :  { %v3969_v63 = vpop.eup %3968  ;;  %v3438_v25 = vxor.u32 2147483648, %v3967_v55 }
 0x3c1   :  { %v3435_v62 = vxor.u32 2147483648, %v3969_v63  ;;  %v3522_v42 = vand.u32 2147483647, %v3521_v56 }
 0x3c2   :  { %v3439_v60 = vsel %vm3437_vm6, %v3438_v25, %v3969_v63 }
 0x3c3   :  { %v3436_v37 = vsel %vm3434_vm7, %v3967_v55, %v3435_v62  ;;  %v3525_v36 = vmul.f32 %v3524_v33, %v3522_v42 }
 0x3c4   :  { %v3440_v38 = vsel %vm3433_vm9, %v3436_v37, %v3439_v60 }
 0x3c5   :  { %v3441_v40 = vsel %vm3430_vm10, nan, %v3440_v38  ;;  %v3526_v28 = vxor.u32 2147483648, %v3525_v36 }
 0x3c6   :  { %3560 = vst [vmem:[#allocation2 + $0xf0] sm:$0xff] %v3441_v40 }
 0x3c7   :  { %v3527_v20 = vsel %vm3444_vm11, %v3526_v28, %v3525_v36 }
 0x3c8   :  { %v3530_v35 = vsel %vm3443_vm8, %v6462_v30, %v3527_v20 }
 0x3c9   :  { %3970 = vcosq.f32 %v3530_v35 }
 0x3ca   :  { %3972 = vsinq.f32 %v3530_v35 }
 0x3d3   :  { %v3971_v46 = vpop.eup %3970 }
 0x3d4   :  { %v3973_v2 = vpop.eup %3972  ;;  %v3542_v5 = vxor.u32 2147483648, %v3971_v46 }
 0x3d5   :  { %v3539_v45 = vxor.u32 2147483648, %v3973_v2 }
 0x3d6   :  { %v3543_v19 = vsel %vm3541_vm14, %v3542_v5, %v3973_v2 }
 0x3d7   :  { %v3540_v51 = vsel %vm3538_vm12, %v3971_v46, %v3539_v45 }
 0x3d8   :  { %v3544_v17 = vsel %vm3537_vm13, %v3540_v51, %v3543_v19 }
 0x3d9   :  { %v3545_v7 = vsel %vm3534_vm0, nan, %v3544_v17 }
 0x3da   :  { %3561 = vst [vmem:[#allocation2 + $0xf8] sm:$0xff] %v3545_v7 }
 0x3db   :  { %3985 = shalt.err (!%p3982_p4)
}
 0x3dc   :  { %s3986_s26 = scalar_lea.hbm %s6764_s4, 4096 }
 0x3dd   :  { %p3987_p5 = scmp.ne.s32.totalorder %s6764_s4, %s3986_s26  ;;  %p3990_p6 = scmp.lt.u32.totalorder %s3986_s26, %s6764_s4 }
 0x3df   :  { %p3992_p7 = pnand %p3990_p6, %p3987_p5 }
 0x3e1   :  { %3995 = shalt.err (!%p3992_p7)
}
 0x3e2   :  { %s4006_s5 = smov 256   ;;  %s4007_s6 = smov 16  }
 0x3e3   :  { %3573 = dma.vmem_to_hbm [thread:$0]  %s3568_s22, 4096, %s6764_s4, [#allocation3], %s4006_s5, %s4006_s5, %s4007_s6  }
 0x3e4   :  { %3996 = dma.done.wait [#allocation3], 4096  }
 0x3e5   :  { %3997 = vsyncadd [#allocation3], 4294963200 }
 0x3e6   :  { %3577 = vsyncpa [#allocation3], 1 }

</bundles_post_ra>
